<compile_context>
chip_gen: v7x
topology: tpu7x:2x2x1
jax: 0.10.0
libtpu: 0.0.40
codegen_flags: <defaults>
</compile_context>

<pallas_src>
import functools

import jax
import jax.numpy as jnp
from jax import lax
from jax.experimental import pallas as pl
from jax.experimental.pallas import tpu as pltpu

EPS = 1e-5
LANE = 128
F32 = jnp.float32
BF16 = jnp.bfloat16


# --------------------------------- helpers ---------------------------------
def _round_up(x, m):
    return (x + m - 1) // m * m


def _pad_to(a, shape):
    return jnp.pad(a, [(0, t - s) for s, t in zip(a.shape, shape)])


def _pick_row_tile(rows, max_rows=4096):
    """Largest divisor of `rows` (multiple of 16, then 8) up to max_rows,
    preferring >= 4 grid steps (pipelining + megacore), then >= 2."""
    def divisors(step):
        hi = min(rows, max_rows)
        return [d for d in range(step, hi + 1, step) if rows % d == 0]

    for min_steps in (4, 2):
        for step in (16, 8):
            ok = [d for d in divisors(step) if rows // d >= min_steps]
            if ok:
                return max(ok)
    return rows  # tiny / awkward row count: single full-extent block


def _pick_h_tile(H, W, max_rows=2048):
    """Largest divisor TH < H with TH*W <= max_rows rows per block (prefer
    16-row alignment for bf16 sublane packing); falls back to the full image."""
    cands = [th for th in range(1, H) if H % th == 0 and th * W <= max_rows]
    for align in (16, 8):
        ok = [th for th in cands if (th * W) % align == 0]
        if ok:
            return max(ok)
    return H


def _partial_stats(y):
    # (2, C): per-tile channel sum and sum-of-squares on the f32 accumulator.
    return jnp.concatenate(
        [jnp.sum(y, axis=0, keepdims=True),
         jnp.sum(y * y, axis=0, keepdims=True)], axis=0)


def _fold_bn(partial_stats, count, gamma_p, beta_p):
    # Global training-mode BN statistics -> per-channel (scale, shift) affine.
    s = jnp.sum(partial_stats.reshape(-1, 2, partial_stats.shape[-1]), axis=0)
    mean = s[0] / count
    var = jnp.maximum(s[1] / count - mean * mean, 0.0)   # E[y^2] - E[y]^2 (f32)
    scale = gamma_p * lax.rsqrt(var + EPS)               # (1, C)
    shift = beta_p - mean * scale                        # (1, C)
    return scale, shift


# --------------------------------- kernels ---------------------------------
def _conv1x1_stats_kernel(x_ref, w_ref, y_ref, st_ref):
    # x: (TM, Cin_p) f32, w: (Cin_p, P_p) bf16 -> y: (TM, P_p) bf16 + f32 stats.
    acc = jnp.dot(x_ref[...].astype(BF16), w_ref[...],
                  preferred_element_type=F32)
    y_ref[...] = acc.astype(y_ref.dtype)
    st_ref[...] = _partial_stats(acc)[None]


def _affine_relu_conv1x1_stats_kernel(y_ref, sc_ref, sh_ref, w_ref, o_ref, st_ref):
    # Previous-BN folded affine + ReLU (f32), then 1x1 conv, emit stats.
    z = jnp.maximum(y_ref[...].astype(F32) * sc_ref[...] + sh_ref[...], 0.0)
    acc = jnp.dot(z.astype(BF16), w_ref[...], preferred_element_type=F32)
    o_ref[...] = acc.astype(o_ref.dtype)
    st_ref[...] = _partial_stats(acc)[None]


def _affine_relu_conv3x3_stats_kernel(top_ref, body_ref, bot_ref, sc_ref, sh_ref,
                                      w2_ref, y2_ref, st_ref, zbuf, *, TH, W):
    # One (image, TH-row block) per grid step. The 3x3/pad=1 conv is computed on
    # the flattened (TH*W, C) block via 9 row-shifted matmuls against a bf16
    # VMEM scratch that holds [8 guard | top-halo W | body TH*W | bottom-halo W |
    # 8 guard] post-BN1-ReLU rows; column wrap-around is removed with per-row
    # masks (guard rows are only ever read under those masks).
    THW = TH * W
    FPAD = 8
    Pp = zbuf.shape[-1]
    hb = pl.program_id(1)
    sc = sc_ref[...]
    sh = sh_ref[...]

    def act(v):  # BN1 affine + ReLU in f32, stored once as bf16.
        return jnp.maximum(v.astype(F32) * sc + sh, 0.0).astype(BF16)

    zbuf[pl.ds(FPAD, W), :] = act(top_ref[0, 0])
    zbuf[pl.ds(FPAD + W, THW), :] = act(body_ref[0])
    zbuf[pl.ds(FPAD + W + THW, W), :] = act(bot_ref[0, 0])

    # Zero-padding halos at the image top / bottom only.
    @pl.when(hb == 0)
    def _():
        zbuf[pl.ds(FPAD, W), :] = jnp.zeros((W, Pp), BF16)

    @pl.when(hb == pl.num_programs(1) - 1)
    def _():
        zbuf[pl.ds(FPAD + W + THW, W), :] = jnp.zeros((W, Pp), BF16)

    col = lax.broadcasted_iota(jnp.int32, (THW, 1), 0) % W
    left_edge = col == 0            # invalid outputs for dx == -1
    right_edge = col == (W - 1)     # invalid outputs for dx == +1
    zero_bf = jnp.zeros((), BF16)

    acc = None
    k = 0
    for dy in (-1, 0, 1):
        for dx in (-1, 0, 1):
            src = zbuf[pl.ds(FPAD + W + dy * W + dx, THW), :]
            if dx == -1:
                src = jnp.where(left_edge, zero_bf, src)
            elif dx == 1:
                src = jnp.where(right_edge, zero_bf, src)
            contrib = jnp.dot(src, w2_ref[k], preferred_element_type=F32)
            acc = contrib if acc is None else acc + contrib
            k += 1

    y2_ref[0] = acc.astype(y2_ref.dtype)        # single output write
    st_ref[...] = _partial_stats(acc)[None, None]


def _affine_residual_relu_kernel(y_ref, sc_ref, sh_ref, id_ref, o_ref):
    # BN3 affine + residual add + ReLU (in place on the residual buffer).
    o_ref[...] = jnp.maximum(
        y_ref[...].astype(F32) * sc_ref[...] + sh_ref[...] + id_ref[...], 0.0)


# --------------------------------- wrapper ---------------------------------
def bottleneck_forward(x_nchw, params):
    N, Cin, H, W = x_nchw.shape
    P = params["w1"].shape[1]
    Cout = params["w3"].shape[1]
    assert Cout == Cin, "identity add requires inplanes == planes * expansion"

    Cinp = _round_up(Cin, LANE)
    Pp = _round_up(P, LANE)
    Coutp = _round_up(Cout, LANE)
    assert Cinp == Coutp
    R = N * H * W
    HW = H * W
    TM = _pick_row_tile(R)
    G = R // TM
    TH = _pick_h_tile(H, W)
    HB = H // TH

    # NCHW -> (rows, channels) with channels padded to 128 lanes (lane-dense).
    x_nhwc = jnp.transpose(x_nchw, (0, 2, 3, 1)).astype(F32)       # NHWC
    x2d = _pad_to(x_nhwc.reshape(R, Cin), (R, Cinp))               # (R, Cinp) f32

    w1p = _pad_to(params["w1"], (Cinp, Pp)).astype(BF16)
    w2p = _pad_to(params["w2"], (3, 3, Pp, Pp)).reshape(9, Pp, Pp).astype(BF16)
    w3p = _pad_to(params["w3"], (Pp, Coutp)).astype(BF16)
    # gamma/beta zero-padded so padded lanes stay exactly zero through the chain.
    g1p = _pad_to(params["g1"], (1, Pp));    b1p = _pad_to(params["b1"], (1, Pp))
    g2p = _pad_to(params["g2"], (1, Pp));    b2p = _pad_to(params["b2"], (1, Pp))
    g3p = _pad_to(params["g3"], (1, Coutp)); b3p = _pad_to(params["b3"], (1, Coutp))

    parallel1 = pltpu.CompilerParams(dimension_semantics=("parallel",))
    parallel2 = pltpu.CompilerParams(dimension_semantics=("parallel", "parallel"))

    # ---- K1: conv1x1 + BN1 partial stats (row-tiled, pipelined) ----
    y1, st1 = pl.pallas_call(
        _conv1x1_stats_kernel,
        grid=(G,),
        in_specs=[pl.BlockSpec((TM, Cinp), lambda i: (i, 0)),
                  pl.BlockSpec((Cinp, Pp), lambda i: (0, 0))],
        out_specs=[pl.BlockSpec((TM, Pp), lambda i: (i, 0)),
                   pl.BlockSpec((1, 2, Pp), lambda i: (i, 0, 0))],
        out_shape=[jax.ShapeDtypeStruct((R, Pp), BF16),
                   jax.ShapeDtypeStruct((G, 2, Pp), F32)],
        compiler_params=parallel1,
    )(x2d, w1p)
    scale1, shift1 = _fold_bn(st1, R, g1p, b1p)

    # ---- K2: BN1-affine + ReLU + conv3x3 + BN2 partial stats ----
    # Row-block tiling with a 1-row halo fetched via clamped-index BlockSpecs
    # (auto-pipelined); halo rows at the image top/bottom are zeroed in-kernel.
    y1_4d = y1.reshape(N, H, W, Pp)      # free reshape (row-major, same buffer)
    y1_3d = y1.reshape(N, HW, Pp)
    k2 = functools.partial(_affine_relu_conv3x3_stats_kernel, TH=TH, W=W)
    zrows = 8 + (TH + 2) * W + 8
    y2, st2 = pl.pallas_call(
        k2,
        grid=(N, HB),
        in_specs=[
            # top-halo row (clamped at image top; zeroed in-kernel when hb == 0)
            pl.BlockSpec((1, 1, W, Pp),
                         lambda n, hb: (n, jnp.maximum(hb * TH - 1, 0), 0, 0)),
            # body: TH rows of the image, flattened to (TH*W, Pp)
            pl.BlockSpec((1, TH * W, Pp), lambda n, hb: (n, hb, 0)),
            # bottom-halo row (clamped at image bottom; zeroed when hb == HB-1)
            pl.BlockSpec((1, 1, W, Pp),
                         lambda n, hb: (n, jnp.minimum(hb * TH + TH, H - 1), 0, 0)),
            pl.BlockSpec((1, Pp), lambda n, hb: (0, 0)),       # scale1
            pl.BlockSpec((1, Pp), lambda n, hb: (0, 0)),       # shift1
            pl.BlockSpec((9, Pp, Pp), lambda n, hb: (0, 0, 0)),  # w2 taps
        ],
        out_specs=[pl.BlockSpec((1, TH * W, Pp), lambda n, hb: (n, hb, 0)),
                   pl.BlockSpec((1, 1, 2, Pp), lambda n, hb: (n, hb, 0, 0))],
        out_shape=[jax.ShapeDtypeStruct((N, HW, Pp), BF16),
                   jax.ShapeDtypeStruct((N, HB, 2, Pp), F32)],
        scratch_shapes=[pltpu.VMEM((zrows, Pp), BF16)],
        compiler_params=parallel2,
    )(y1_4d, y1_3d, y1_4d, scale1, shift1, w2p)
    scale2, shift2 = _fold_bn(st2, R, g2p, b2p)

    # ---- K3: BN2-affine + ReLU + conv1x1 (w3) + BN3 partial stats ----
    y3, st3 = pl.pallas_call(
        _affine_relu_conv1x1_stats_kernel,
        grid=(G,),
        in_specs=[pl.BlockSpec((TM, Pp), lambda i: (i, 0)),
                  pl.BlockSpec((1, Pp), lambda i: (0, 0)),
                  pl.BlockSpec((1, Pp), lambda i: (0, 0)),
                  pl.BlockSpec((Pp, Coutp), lambda i: (0, 0))],
        out_specs=[pl.BlockSpec((TM, Coutp), lambda i: (i, 0)),
                   pl.BlockSpec((1, 2, Coutp), lambda i: (i, 0, 0))],
        out_shape=[jax.ShapeDtypeStruct((R, Coutp), BF16),
                   jax.ShapeDtypeStruct((G, 2, Coutp), F32)],
        compiler_params=parallel1,
    )(y2.reshape(R, Pp), scale2, shift2, w3p)
    scale3, shift3 = _fold_bn(st3, R, g3p, b3p)

    # ---- K4: BN3-affine + residual add + ReLU (aliased onto residual buf) ----
    out2d = pl.pallas_call(
        _affine_residual_relu_kernel,
        grid=(G,),
        in_specs=[pl.BlockSpec((TM, Coutp), lambda i: (i, 0)),
                  pl.BlockSpec((1, Coutp), lambda i: (0, 0)),
                  pl.BlockSpec((1, Coutp), lambda i: (0, 0)),
                  pl.BlockSpec((TM, Coutp), lambda i: (i, 0))],
        out_specs=pl.BlockSpec((TM, Coutp), lambda i: (i, 0)),
        out_shape=jax.ShapeDtypeStruct((R, Coutp), F32),
        input_output_aliases={3: 0},
        compiler_params=parallel1,
    )(y3, scale3, shift3, x2d)

    # Kept only to preserve the module's NCHW contract (extra XLA pass).
    out = out2d[:, :Cout].reshape(N, H, W, Cout)
    return jnp.transpose(out, (0, 3, 1, 2))


# ---------------------------- pure-JAX reference ----------------------------
def bottleneck_reference(x_nchw, p):
    # Numerical mirror of the kernel pipeline: bf16 MXU operands, f32
    # accumulation, bf16 HBM storage of intermediates, training-mode BN whose
    # batch statistics come from the f32 accumulator (pre-downcast), and an
    # f32 residual add.
    x = jnp.transpose(x_nchw, (0, 2, 3, 1)).astype(F32)

    def bn_affine(y_f32, g, b):
        mean = jnp.mean(y_f32, axis=(0, 1, 2))
        var = jnp.mean((y_f32 - mean) ** 2, axis=(0, 1, 2))
        scale = g.reshape(-1) * lax.rsqrt(var + EPS)
        shift = b.reshape(-1) - mean * scale
        y_q = y_f32.astype(BF16).astype(F32)     # bf16 round-trip (HBM storage)
        return y_q * scale + shift

    y1 = jnp.einsum("nhwc,cd->nhwd", x.astype(BF16), p["w1"].astype(BF16),
                    preferred_element_type=F32)
    z1 = jax.nn.relu(bn_affine(y1, p["g1"], p["b1"]))
    y2 = lax.conv_general_dilated(z1.astype(BF16), p["w2"].astype(BF16), (1, 1),
                                  "SAME",
                                  dimension_numbers=("NHWC", "HWIO", "NHWC"),
                                  preferred_element_type=F32)
    z2 = jax.nn.relu(bn_affine(y2, p["g2"], p["b2"]))
    y3 = jnp.einsum("nhwc,cd->nhwd", z2.astype(BF16), p["w3"].astype(BF16),
                    preferred_element_type=F32)
    z3 = bn_affine(y3, p["g3"], p["b3"])
    out = jax.nn.relu(z3 + x)
    return jnp.transpose(out, (0, 3, 1, 2))


if __name__ == "__main__":
    # inplanes=16, planes=4, expansion=4 -> out channels 16 (stride=1, no downsample).
    N, H, W = 2, 16, 16
    inplanes, planes = 16, 4
    cout = planes * 4

    key = jax.random.PRNGKey(0)
    ks = jax.random.split(key, 10)
    params = {
        "w1": 0.1 * jax.random.normal(ks[0], (inplanes, planes), jnp.float32),
        "w2": 0.1 * jax.random.normal(ks[1], (3, 3, planes, planes), jnp.float32),
        "w3": 0.1 * jax.random.normal(ks[2], (planes, cout), jnp.float32),
        "g1": 1.0 + 0.1 * jax.random.normal(ks[3], (1, planes), jnp.float32),
        "b1": 0.1 * jax.random.normal(ks[4], (1, planes), jnp.float32),
        "g2": 1.0 + 0.1 * jax.random.normal(ks[5], (1, planes), jnp.float32),
        "b2": 0.1 * jax.random.normal(ks[6], (1, planes), jnp.float32),
        "g3": 1.0 + 0.1 * jax.random.normal(ks[7], (1, cout), jnp.float32),
        "b3": 0.1 * jax.random.normal(ks[8], (1, cout), jnp.float32),
    }
    x = jax.random.normal(ks[9], (N, inplanes, H, W), jnp.float32)

    fwd = jax.jit(bottleneck_forward)
    out = jax.block_until_ready(fwd(x, params))
    ref = jax.block_until_ready(bottleneck_reference(x, params))

    assert out.shape == (N, cout, H, W)
    err = float(jnp.max(jnp.abs(out - ref)))
    assert err < 1e-2, f"max abs err {err}"
    print("KERNEL_OK")
</pallas_src>

<mosaic_0001>
module attributes {stable_mosaic.version = 11 : i64} {
  func.func @_conv1x1_stats_kernel(%arg0: i32, %arg1: memref<128x128xf32, #tpu.memory_space<vmem>>, %arg2: memref<128x128xbf16, #tpu.memory_space<vmem>>, %arg3: memref<128x128xbf16, #tpu.memory_space<vmem>>, %arg4: memref<1x2x128xf32, #tpu.memory_space<vmem>>) attributes {dimension_semantics = [#tpu.dimension_semantics<parallel>], iteration_bounds = array<i64: 4>, scalar_prefetch = 0 : i64, scratch_operands = 0 : i64, tpu.core_type = #tpu.core_type<tc>, window_params = [{transform_indices = @transform_0, window_bounds = array<i64: 128, 128>}, {pipeline_mode = #tpu.pipeline_mode<synchronous>, transform_indices = @transform_1, window_bounds = array<i64: 128, 128>}, {transform_indices = @transform_2, window_bounds = array<i64: 128, 128>}, {transform_indices = @transform_3, window_bounds = array<i64: 1, 2, 128>}]} {
    %c0 = arith.constant 0 : index
    %c0_0 = arith.constant 0 : index
    %0 = vector.load %arg1[%c0, %c0_0] : memref<128x128xf32, #tpu.memory_space<vmem>>, vector<128x128xf32>
    %1 = arith.truncf %0 : vector<128x128xf32> to vector<128x128xbf16>
    %c0_1 = arith.constant 0 : index
    %c0_2 = arith.constant 0 : index
    %2 = vector.load %arg2[%c0_1, %c0_2] : memref<128x128xbf16, #tpu.memory_space<vmem>>, vector<128x128xbf16>
    %cst = arith.constant dense<0.000000e+00> : vector<128x128xf32>
    %3 = tpu.matmul %1, %2, %cst {dimension_numbers = #tpu.dot_dimension_numbers<[1], [0], [0], [1], [0, 0, 1, 1], [], []>} : vector<128x128xbf16>, vector<128x128xbf16>, vector<128x128xf32> -> vector<128x128xf32>
    %4 = arith.truncf %3 : vector<128x128xf32> to vector<128x128xbf16>
    %c0_3 = arith.constant 0 : index
    %c0_4 = arith.constant 0 : index
    %5 = vector.load %arg3[%c0_3, %c0_4] : memref<128x128xbf16, #tpu.memory_space<vmem>>, vector<128x128xbf16>
    tpu.vector_store %arg3[%c0_3, %c0_4], %4 {strides = array<i32>} : memref<128x128xbf16, #tpu.memory_space<vmem>>, vector<128x128xbf16>,
    %cst_5 = arith.constant dense<0.000000e+00> : vector<128xf32>
    %6 = vector.multi_reduction <add>, %3, %cst_5 [0] : vector<128x128xf32> to vector<128xf32>
    %7 = vector.shape_cast %6 : vector<128xf32> to vector<1x128xf32>
    %8 = arith.mulf %3, %3 : vector<128x128xf32>
    %cst_6 = arith.constant dense<0.000000e+00> : vector<128xf32>
    %9 = vector.multi_reduction <add>, %8, %cst_6 [0] : vector<128x128xf32> to vector<128xf32>
    %10 = vector.shape_cast %9 : vector<128xf32> to vector<1x128xf32>
    %11 = tpu.concatenate %7, %10 in 0 : vector<1x128xf32>, vector<1x128xf32> -> vector<2x128xf32>
    %12 = vector.shape_cast %11 : vector<2x128xf32> to vector<1x2x128xf32>
    %c0_7 = arith.constant 0 : index
    %c0_8 = arith.constant 0 : index
    %c0_9 = arith.constant 0 : index
    %13 = vector.load %arg4[%c0_7, %c0_8, %c0_9] : memref<1x2x128xf32, #tpu.memory_space<vmem>>, vector<1x2x128xf32>
    tpu.vector_store %arg4[%c0_7, %c0_8, %c0_9], %12 {strides = array<i32>} : memref<1x2x128xf32, #tpu.memory_space<vmem>>, vector<1x2x128xf32>,
    return
  }
  func.func @transform_0(%arg0: i32) -> (i32, i32) {
    %c0_i32 = arith.constant 0 : i32
    %c0_i32_0 = arith.constant 0 : i32
    return %arg0, %c0_i32 : i32, i32
  }
  func.func @transform_1(%arg0: i32) -> (i32, i32) {
    %c0_i32 = arith.constant 0 : i32
    %c0_i32_0 = arith.constant 0 : i32
    %c0_i32_1 = arith.constant 0 : i32
    return %c0_i32, %c0_i32_0 : i32, i32
  }
  func.func @transform_2(%arg0: i32) -> (i32, i32) {
    %c0_i32 = arith.constant 0 : i32
    %c0_i32_0 = arith.constant 0 : i32
    return %arg0, %c0_i32 : i32, i32
  }
  func.func @transform_3(%arg0: i32) -> (i32, i32, i32) {
    %c0_i32 = arith.constant 0 : i32
    %c0_i32_0 = arith.constant 0 : i32
    %c0_i32_1 = arith.constant 0 : i32
    return %arg0, %c0_i32, %c0_i32_0 : i32, i32, i32
  }
}

module attributes {stable_mosaic.version = 11 : i64} {
  func.func @_affine_relu_conv3x3_stats_kernel(%arg0: i32, %arg1: i32, %arg2: memref<1x1x16x128xbf16, #tpu.memory_space<vmem>>, %arg3: memref<1x128x128xbf16, #tpu.memory_space<vmem>>, %arg4: memref<1x1x16x128xbf16, #tpu.memory_space<vmem>>, %arg5: memref<1x128xf32, #tpu.memory_space<vmem>>, %arg6: memref<1x128xf32, #tpu.memory_space<vmem>>, %arg7: memref<9x128x128xbf16, #tpu.memory_space<vmem>>, %arg8: memref<1x128x128xbf16, #tpu.memory_space<vmem>>, %arg9: memref<1x1x2x128xf32, #tpu.memory_space<vmem>>, %arg10: memref<176x128xbf16, #tpu.memory_space<vmem>>) attributes {dimension_semantics = [#tpu.dimension_semantics<parallel>, #tpu.dimension_semantics<parallel>], iteration_bounds = array<i64: 2, 2>, scalar_prefetch = 0 : i64, scratch_operands = 1 : i64, tpu.core_type = #tpu.core_type<tc>, window_params = [{transform_indices = @transform_0, window_bounds = array<i64: 1, 1, 16, 128>}, {transform_indices = @transform_1, window_bounds = array<i64: 1, 128, 128>}, {transform_indices = @transform_2, window_bounds = array<i64: 1, 1, 16, 128>}, {pipeline_mode = #tpu.pipeline_mode<synchronous>, transform_indices = @transform_3, window_bounds = array<i64: 1, 128>}, {pipeline_mode = #tpu.pipeline_mode<synchronous>, transform_indices = @transform_4, window_bounds = array<i64: 1, 128>}, {pipeline_mode = #tpu.pipeline_mode<synchronous>, transform_indices = @transform_5, window_bounds = array<i64: 9, 128, 128>}, {transform_indices = @transform_6, window_bounds = array<i64: 1, 128, 128>}, {transform_indices = @transform_7, window_bounds = array<i64: 1, 1, 2, 128>}]} {
    %c0 = arith.constant 0 : index
    %c0_0 = arith.constant 0 : index
    %0 = vector.load %arg5[%c0, %c0_0] : memref<1x128xf32, #tpu.memory_space<vmem>>, vector<1x128xf32>
    %c0_1 = arith.constant 0 : index
    %c0_2 = arith.constant 0 : index
    %1 = vector.load %arg6[%c0_1, %c0_2] : memref<1x128xf32, #tpu.memory_space<vmem>>, vector<1x128xf32>
    %c0_3 = arith.constant 0 : index
    %c0_4 = arith.constant 0 : index
    %c0_5 = arith.constant 0 : index
    %c0_6 = arith.constant 0 : index
    %2 = vector.load %arg2[%c0_3, %c0_4, %c0_5, %c0_6] : memref<1x1x16x128xbf16, #tpu.memory_space<vmem>>, vector<1x1x16x128xbf16>
    %3 = vector.shape_cast %2 : vector<1x1x16x128xbf16> to vector<16x128xbf16>
    %4 = arith.extf %3 : vector<16x128xbf16> to vector<16x128xf32>
    %5 = vector.broadcast %0 : vector<1x128xf32> to vector<16x128xf32>
    %6 = arith.mulf %4, %5 : vector<16x128xf32>
    %7 = vector.broadcast %1 : vector<1x128xf32> to vector<16x128xf32>
    %8 = arith.addf %6, %7 : vector<16x128xf32>
    %cst = arith.constant 0.000000e+00 : f32
    %9 = vector.broadcast %cst : f32 to vector<16x128xf32>
    %10 = arith.maximumf %8, %9 : vector<16x128xf32>
    %11 = arith.truncf %10 : vector<16x128xf32> to vector<16x128xbf16>
    %c8 = arith.constant 8 : index
    %c0_7 = arith.constant 0 : index
    %12 = vector.load %arg10[%c8, %c0_7] : memref<176x128xbf16, #tpu.memory_space<vmem>>, vector<16x128xbf16>
    tpu.vector_store %arg10[%c8, %c0_7], %11 {strides = array<i32>} : memref<176x128xbf16, #tpu.memory_space<vmem>>, vector<16x128xbf16>,
    %c0_8 = arith.constant 0 : index
    %c0_9 = arith.constant 0 : index
    %c0_10 = arith.constant 0 : index
    %13 = vector.load %arg3[%c0_8, %c0_9, %c0_10] : memref<1x128x128xbf16, #tpu.memory_space<vmem>>, vector<1x128x128xbf16>
    %14 = vector.shape_cast %13 : vector<1x128x128xbf16> to vector<128x128xbf16>
    %15 = arith.extf %14 : vector<128x128xbf16> to vector<128x128xf32>
    %16 = vector.broadcast %0 : vector<1x128xf32> to vector<128x128xf32>
    %17 = arith.mulf %15, %16 : vector<128x128xf32>
    %18 = vector.broadcast %1 : vector<1x128xf32> to vector<128x128xf32>
    %19 = arith.addf %17, %18 : vector<128x128xf32>
    %cst_11 = arith.constant 0.000000e+00 : f32
    %20 = vector.broadcast %cst_11 : f32 to vector<128x128xf32>
    %21 = arith.maximumf %19, %20 : vector<128x128xf32>
    %22 = arith.truncf %21 : vector<128x128xf32> to vector<128x128xbf16>
    %c24 = arith.constant 24 : index
    %c0_12 = arith.constant 0 : index
    %23 = vector.load %arg10[%c24, %c0_12] : memref<176x128xbf16, #tpu.memory_space<vmem>>, vector<128x128xbf16>
    tpu.vector_store %arg10[%c24, %c0_12], %22 {strides = array<i32>} : memref<176x128xbf16, #tpu.memory_space<vmem>>, vector<128x128xbf16>,
    %c0_13 = arith.constant 0 : index
    %c0_14 = arith.constant 0 : index
    %c0_15 = arith.constant 0 : index
    %c0_16 = arith.constant 0 : index
    %24 = vector.load %arg4[%c0_13, %c0_14, %c0_15, %c0_16] : memref<1x1x16x128xbf16, #tpu.memory_space<vmem>>, vector<1x1x16x128xbf16>
    %25 = vector.shape_cast %24 : vector<1x1x16x128xbf16> to vector<16x128xbf16>
    %26 = arith.extf %25 : vector<16x128xbf16> to vector<16x128xf32>
    %27 = vector.broadcast %0 : vector<1x128xf32> to vector<16x128xf32>
    %28 = arith.mulf %26, %27 : vector<16x128xf32>
    %29 = vector.broadcast %1 : vector<1x128xf32> to vector<16x128xf32>
    %30 = arith.addf %28, %29 : vector<16x128xf32>
    %cst_17 = arith.constant 0.000000e+00 : f32
    %31 = vector.broadcast %cst_17 : f32 to vector<16x128xf32>
    %32 = arith.maximumf %30, %31 : vector<16x128xf32>
    %33 = arith.truncf %32 : vector<16x128xf32> to vector<16x128xbf16>
    %c152 = arith.constant 152 : index
    %c0_18 = arith.constant 0 : index
    %34 = vector.load %arg10[%c152, %c0_18] : memref<176x128xbf16, #tpu.memory_space<vmem>>, vector<16x128xbf16>
    tpu.vector_store %arg10[%c152, %c0_18], %33 {strides = array<i32>} : memref<176x128xbf16, #tpu.memory_space<vmem>>, vector<16x128xbf16>,
    %c0_i32 = arith.constant 0 : i32
    %35 = arith.cmpi eq, %arg1, %c0_i32 : i32
    %36 = arith.extui %35 : i1 to i32
    %c0_i32_19 = arith.constant 0 : i32
    %37 = arith.cmpi ne, %36, %c0_i32_19 : i32
    scf.if %37 {
      %cst_83 = arith.constant 0.000000e+00 : bf16
      %142 = vector.broadcast %cst_83 : bf16 to vector<16x128xbf16>
      %c8_84 = arith.constant 8 : index
      %c0_85 = arith.constant 0 : index
      %143 = vector.load %arg10[%c8_84, %c0_85] : memref<176x128xbf16, #tpu.memory_space<vmem>>, vector<16x128xbf16>
      tpu.vector_store %arg10[%c8_84, %c0_85], %142 {strides = array<i32>} : memref<176x128xbf16, #tpu.memory_space<vmem>>, vector<16x128xbf16>,
    } else {
    }
    %c1_i32 = arith.constant 1 : i32
    %38 = arith.cmpi eq, %arg1, %c1_i32 : i32
    %39 = arith.extui %38 : i1 to i32
    %c0_i32_20 = arith.constant 0 : i32
    %40 = arith.cmpi ne, %39, %c0_i32_20 : i32
    scf.if %40 {
      %cst_83 = arith.constant 0.000000e+00 : bf16
      %142 = vector.broadcast %cst_83 : bf16 to vector<16x128xbf16>
      %c152_84 = arith.constant 152 : index
      %c0_85 = arith.constant 0 : index
      %143 = vector.load %arg10[%c152_84, %c0_85] : memref<176x128xbf16, #tpu.memory_space<vmem>>, vector<16x128xbf16>
      tpu.vector_store %arg10[%c152_84, %c0_85], %142 {strides = array<i32>} : memref<176x128xbf16, #tpu.memory_space<vmem>>, vector<16x128xbf16>,
    } else {
    }
    %41 = tpu.iota {dimensions = array<i32: 0>} : vector<128x1xi32>
    %c16_i32 = arith.constant 16 : i32
    %c0_i32_21 = arith.constant 0 : i32
    %42 = arith.cmpi eq, %c16_i32, %c0_i32_21 : i32
    %c1_i32_22 = arith.constant 1 : i32
    %43 = arith.select %42, %c1_i32_22, %c16_i32 : i32
    %44 = vector.broadcast %43 : i32 to vector<128x1xi32>
    %45 = arith.remsi %41, %44 : vector<128x1xi32>
    %c0_i32_23 = arith.constant 0 : i32
    %46 = vector.broadcast %c0_i32_23 : i32 to vector<128x1xi32>
    %47 = arith.cmpi ne, %45, %46 : vector<128x1xi32>
    %c0_i32_24 = arith.constant 0 : i32
    %48 = vector.broadcast %c0_i32_24 : i32 to vector<128x1xi32>
    %49 = arith.cmpi slt, %45, %48 : vector<128x1xi32>
    %c0_i32_25 = arith.constant 0 : i32
    %50 = arith.cmpi slt, %43, %c0_i32_25 : i32
    %51 = vector.broadcast %50 : i1 to vector<128x1xi1>
    %52 = vector.broadcast %51 : vector<128x1xi1> to vector<128x1xi1>
    %53 = arith.xori %49, %52 : vector<128x1xi1>
    %54 = arith.andi %53, %47 : vector<128x1xi1>
    %55 = vector.broadcast %43 : i32 to vector<128x1xi32>
    %56 = arith.addi %45, %55 : vector<128x1xi32>
    %57 = arith.select %54, %56, %45 : vector<128x1xi1>, vector<128x1xi32>
    %c0_i32_26 = arith.constant 0 : i32
    %58 = vector.broadcast %c0_i32_26 : i32 to vector<128x1xi32>
    %59 = arith.cmpi eq, %57, %58 : vector<128x1xi32>
    %c15_i32 = arith.constant 15 : i32
    %60 = vector.broadcast %c15_i32 : i32 to vector<128x1xi32>
    %61 = arith.cmpi eq, %57, %60 : vector<128x1xi32>
    %c7 = arith.constant 7 : index
    %c0_27 = arith.constant 0 : index
    %62 = vector.load %arg10[%c7, %c0_27] : memref<176x128xbf16, #tpu.memory_space<vmem>>, vector<128x128xbf16>
    %cst_28 = arith.constant 0.000000e+00 : bf16
    %63 = vector.shape_cast %59 : vector<128x1xi1> to vector<128x1xi1>
    %64 = vector.broadcast %63 : vector<128x1xi1> to vector<128x128xi1>
    %65 = vector.broadcast %cst_28 : bf16 to vector<128x128xbf16>
    %66 = arith.select %64, %65, %62 : vector<128x128xi1>, vector<128x128xbf16>
    %c0_29 = arith.constant 0 : index
    %c0_30 = arith.constant 0 : index
    %c0_31 = arith.constant 0 : index
    %67 = vector.load %arg7[%c0_29, %c0_30, %c0_31] : memref<9x128x128xbf16, #tpu.memory_space<vmem>>, vector<1x128x128xbf16>
    %68 = vector.shape_cast %67 : vector<1x128x128xbf16> to vector<128x128xbf16>
    %cst_32 = arith.constant dense<0.000000e+00> : vector<128x128xf32>
    %69 = tpu.matmul %66, %68, %cst_32 {dimension_numbers = #tpu.dot_dimension_numbers<[1], [0], [0], [1], [0, 0, 1, 1], [], []>} : vector<128x128xbf16>, vector<128x128xbf16>, vector<128x128xf32> -> vector<128x128xf32>
    %c8_33 = arith.constant 8 : index
    %c0_34 = arith.constant 0 : index
    %70 = vector.load %arg10[%c8_33, %c0_34] : memref<176x128xbf16, #tpu.memory_space<vmem>>, vector<128x128xbf16>
    %c1 = arith.constant 1 : index
    %c0_35 = arith.constant 0 : index
    %c0_36 = arith.constant 0 : index
    %71 = vector.load %arg7[%c1, %c0_35, %c0_36] : memref<9x128x128xbf16, #tpu.memory_space<vmem>>, vector<1x128x128xbf16>
    %72 = vector.shape_cast %71 : vector<1x128x128xbf16> to vector<128x128xbf16>
    %cst_37 = arith.constant dense<0.000000e+00> : vector<128x128xf32>
    %73 = tpu.matmul %70, %72, %cst_37 {dimension_numbers = #tpu.dot_dimension_numbers<[1], [0], [0], [1], [0, 0, 1, 1], [], []>} : vector<128x128xbf16>, vector<128x128xbf16>, vector<128x128xf32> -> vector<128x128xf32>
    %74 = arith.addf %69, %73 : vector<128x128xf32>
    %c9 = arith.constant 9 : index
    %c0_38 = arith.constant 0 : index
    %75 = vector.load %arg10[%c9, %c0_38] : memref<176x128xbf16, #tpu.memory_space<vmem>>, vector<128x128xbf16>
    %cst_39 = arith.constant 0.000000e+00 : bf16
    %76 = vector.shape_cast %61 : vector<128x1xi1> to vector<128x1xi1>
    %77 = vector.broadcast %76 : vector<128x1xi1> to vector<128x128xi1>
    %78 = vector.broadcast %cst_39 : bf16 to vector<128x128xbf16>
    %79 = arith.select %77, %78, %75 : vector<128x128xi1>, vector<128x128xbf16>
    %c2 = arith.constant 2 : index
    %c0_40 = arith.constant 0 : index
    %c0_41 = arith.constant 0 : index
    %80 = vector.load %arg7[%c2, %c0_40, %c0_41] : memref<9x128x128xbf16, #tpu.memory_space<vmem>>, vector<1x128x128xbf16>
    %81 = vector.shape_cast %80 : vector<1x128x128xbf16> to vector<128x128xbf16>
    %cst_42 = arith.constant dense<0.000000e+00> : vector<128x128xf32>
    %82 = tpu.matmul %79, %81, %cst_42 {dimension_numbers = #tpu.dot_dimension_numbers<[1], [0], [0], [1], [0, 0, 1, 1], [], []>} : vector<128x128xbf16>, vector<128x128xbf16>, vector<128x128xf32> -> vector<128x128xf32>
    %83 = arith.addf %74, %82 : vector<128x128xf32>
    %c23 = arith.constant 23 : index
    %c0_43 = arith.constant 0 : index
    %84 = vector.load %arg10[%c23, %c0_43] : memref<176x128xbf16, #tpu.memory_space<vmem>>, vector<128x128xbf16>
    %cst_44 = arith.constant 0.000000e+00 : bf16
    %85 = vector.shape_cast %59 : vector<128x1xi1> to vector<128x1xi1>
    %86 = vector.broadcast %85 : vector<128x1xi1> to vector<128x128xi1>
    %87 = vector.broadcast %cst_44 : bf16 to vector<128x128xbf16>
    %88 = arith.select %86, %87, %84 : vector<128x128xi1>, vector<128x128xbf16>
    %c3 = arith.constant 3 : index
    %c0_45 = arith.constant 0 : index
    %c0_46 = arith.constant 0 : index
    %89 = vector.load %arg7[%c3, %c0_45, %c0_46] : memref<9x128x128xbf16, #tpu.memory_space<vmem>>, vector<1x128x128xbf16>
    %90 = vector.shape_cast %89 : vector<1x128x128xbf16> to vector<128x128xbf16>
    %cst_47 = arith.constant dense<0.000000e+00> : vector<128x128xf32>
    %91 = tpu.matmul %88, %90, %cst_47 {dimension_numbers = #tpu.dot_dimension_numbers<[1], [0], [0], [1], [0, 0, 1, 1], [], []>} : vector<128x128xbf16>, vector<128x128xbf16>, vector<128x128xf32> -> vector<128x128xf32>
    %92 = arith.addf %83, %91 : vector<128x128xf32>
    %c24_48 = arith.constant 24 : index
    %c0_49 = arith.constant 0 : index
    %93 = vector.load %arg10[%c24_48, %c0_49] : memref<176x128xbf16, #tpu.memory_space<vmem>>, vector<128x128xbf16>
    %c4 = arith.constant 4 : index
    %c0_50 = arith.constant 0 : index
    %c0_51 = arith.constant 0 : index
    %94 = vector.load %arg7[%c4, %c0_50, %c0_51] : memref<9x128x128xbf16, #tpu.memory_space<vmem>>, vector<1x128x128xbf16>
    %95 = vector.shape_cast %94 : vector<1x128x128xbf16> to vector<128x128xbf16>
    %cst_52 = arith.constant dense<0.000000e+00> : vector<128x128xf32>
    %96 = tpu.matmul %93, %95, %cst_52 {dimension_numbers = #tpu.dot_dimension_numbers<[1], [0], [0], [1], [0, 0, 1, 1], [], []>} : vector<128x128xbf16>, vector<128x128xbf16>, vector<128x128xf32> -> vector<128x128xf32>
    %97 = arith.addf %92, %96 : vector<128x128xf32>
    %c25 = arith.constant 25 : index
    %c0_53 = arith.constant 0 : index
    %98 = vector.load %arg10[%c25, %c0_53] : memref<176x128xbf16, #tpu.memory_space<vmem>>, vector<128x128xbf16>
    %cst_54 = arith.constant 0.000000e+00 : bf16
    %99 = vector.shape_cast %61 : vector<128x1xi1> to vector<128x1xi1>
    %100 = vector.broadcast %99 : vector<128x1xi1> to vector<128x128xi1>
    %101 = vector.broadcast %cst_54 : bf16 to vector<128x128xbf16>
    %102 = arith.select %100, %101, %98 : vector<128x128xi1>, vector<128x128xbf16>
    %c5 = arith.constant 5 : index
    %c0_55 = arith.constant 0 : index
    %c0_56 = arith.constant 0 : index
    %103 = vector.load %arg7[%c5, %c0_55, %c0_56] : memref<9x128x128xbf16, #tpu.memory_space<vmem>>, vector<1x128x128xbf16>
    %104 = vector.shape_cast %103 : vector<1x128x128xbf16> to vector<128x128xbf16>
    %cst_57 = arith.constant dense<0.000000e+00> : vector<128x128xf32>
    %105 = tpu.matmul %102, %104, %cst_57 {dimension_numbers = #tpu.dot_dimension_numbers<[1], [0], [0], [1], [0, 0, 1, 1], [], []>} : vector<128x128xbf16>, vector<128x128xbf16>, vector<128x128xf32> -> vector<128x128xf32>
    %106 = arith.addf %97, %105 : vector<128x128xf32>
    %c39 = arith.constant 39 : index
    %c0_58 = arith.constant 0 : index
    %107 = vector.load %arg10[%c39, %c0_58] : memref<176x128xbf16, #tpu.memory_space<vmem>>, vector<128x128xbf16>
    %cst_59 = arith.constant 0.000000e+00 : bf16
    %108 = vector.shape_cast %59 : vector<128x1xi1> to vector<128x1xi1>
    %109 = vector.broadcast %108 : vector<128x1xi1> to vector<128x128xi1>
    %110 = vector.broadcast %cst_59 : bf16 to vector<128x128xbf16>
    %111 = arith.select %109, %110, %107 : vector<128x128xi1>, vector<128x128xbf16>
    %c6 = arith.constant 6 : index
    %c0_60 = arith.constant 0 : index
    %c0_61 = arith.constant 0 : index
    %112 = vector.load %arg7[%c6, %c0_60, %c0_61] : memref<9x128x128xbf16, #tpu.memory_space<vmem>>, vector<1x128x128xbf16>
    %113 = vector.shape_cast %112 : vector<1x128x128xbf16> to vector<128x128xbf16>
    %cst_62 = arith.constant dense<0.000000e+00> : vector<128x128xf32>
    %114 = tpu.matmul %111, %113, %cst_62 {dimension_numbers = #tpu.dot_dimension_numbers<[1], [0], [0], [1], [0, 0, 1, 1], [], []>} : vector<128x128xbf16>, vector<128x128xbf16>, vector<128x128xf32> -> vector<128x128xf32>
    %115 = arith.addf %106, %114 : vector<128x128xf32>
    %c40 = arith.constant 40 : index
    %c0_63 = arith.constant 0 : index
    %116 = vector.load %arg10[%c40, %c0_63] : memref<176x128xbf16, #tpu.memory_space<vmem>>, vector<128x128xbf16>
    %c7_64 = arith.constant 7 : index
    %c0_65 = arith.constant 0 : index
    %c0_66 = arith.constant 0 : index
    %117 = vector.load %arg7[%c7_64, %c0_65, %c0_66] : memref<9x128x128xbf16, #tpu.memory_space<vmem>>, vector<1x128x128xbf16>
    %118 = vector.shape_cast %117 : vector<1x128x128xbf16> to vector<128x128xbf16>
    %cst_67 = arith.constant dense<0.000000e+00> : vector<128x128xf32>
    %119 = tpu.matmul %116, %118, %cst_67 {dimension_numbers = #tpu.dot_dimension_numbers<[1], [0], [0], [1], [0, 0, 1, 1], [], []>} : vector<128x128xbf16>, vector<128x128xbf16>, vector<128x128xf32> -> vector<128x128xf32>
    %120 = arith.addf %115, %119 : vector<128x128xf32>
    %c41 = arith.constant 41 : index
    %c0_68 = arith.constant 0 : index
    %121 = vector.load %arg10[%c41, %c0_68] : memref<176x128xbf16, #tpu.memory_space<vmem>>, vector<128x128xbf16>
    %cst_69 = arith.constant 0.000000e+00 : bf16
    %122 = vector.shape_cast %61 : vector<128x1xi1> to vector<128x1xi1>
    %123 = vector.broadcast %122 : vector<128x1xi1> to vector<128x128xi1>
    %124 = vector.broadcast %cst_69 : bf16 to vector<128x128xbf16>
    %125 = arith.select %123, %124, %121 : vector<128x128xi1>, vector<128x128xbf16>
    %c8_70 = arith.constant 8 : index
    %c0_71 = arith.constant 0 : index
    %c0_72 = arith.constant 0 : index
    %126 = vector.load %arg7[%c8_70, %c0_71, %c0_72] : memref<9x128x128xbf16, #tpu.memory_space<vmem>>, vector<1x128x128xbf16>
    %127 = vector.shape_cast %126 : vector<1x128x128xbf16> to vector<128x128xbf16>
    %cst_73 = arith.constant dense<0.000000e+00> : vector<128x128xf32>
    %128 = tpu.matmul %125, %127, %cst_73 {dimension_numbers = #tpu.dot_dimension_numbers<[1], [0], [0], [1], [0, 0, 1, 1], [], []>} : vector<128x128xbf16>, vector<128x128xbf16>, vector<128x128xf32> -> vector<128x128xf32>
    %129 = arith.addf %120, %128 : vector<128x128xf32>
    %130 = arith.truncf %129 : vector<128x128xf32> to vector<128x128xbf16>
    %c0_74 = arith.constant 0 : index
    %c0_75 = arith.constant 0 : index
    %c0_76 = arith.constant 0 : index
    %131 = vector.load %arg8[%c0_74, %c0_75, %c0_76] : memref<1x128x128xbf16, #tpu.memory_space<vmem>>, vector<1x128x128xbf16>
    %132 = vector.shape_cast %131 : vector<1x128x128xbf16> to vector<128x128xbf16>
    %133 = vector.shape_cast %130 : vector<128x128xbf16> to vector<1x128x128xbf16>
    tpu.vector_store %arg8[%c0_74, %c0_75, %c0_76], %133 {strides = array<i32>} : memref<1x128x128xbf16, #tpu.memory_space<vmem>>, vector<1x128x128xbf16>,
    %cst_77 = arith.constant dense<0.000000e+00> : vector<128xf32>
    %134 = vector.multi_reduction <add>, %129, %cst_77 [0] : vector<128x128xf32> to vector<128xf32>
    %135 = vector.shape_cast %134 : vector<128xf32> to vector<1x128xf32>
    %136 = arith.mulf %129, %129 : vector<128x128xf32>
    %cst_78 = arith.constant dense<0.000000e+00> : vector<128xf32>
    %137 = vector.multi_reduction <add>, %136, %cst_78 [0] : vector<128x128xf32> to vector<128xf32>
    %138 = vector.shape_cast %137 : vector<128xf32> to vector<1x128xf32>
    %139 = tpu.concatenate %135, %138 in 0 : vector<1x128xf32>, vector<1x128xf32> -> vector<2x128xf32>
    %140 = vector.shape_cast %139 : vector<2x128xf32> to vector<1x1x2x128xf32>
    %c0_79 = arith.constant 0 : index
    %c0_80 = arith.constant 0 : index
    %c0_81 = arith.constant 0 : index
    %c0_82 = arith.constant 0 : index
    %141 = vector.load %arg9[%c0_79, %c0_80, %c0_81, %c0_82] : memref<1x1x2x128xf32, #tpu.memory_space<vmem>>, vector<1x1x2x128xf32>
    tpu.vector_store %arg9[%c0_79, %c0_80, %c0_81, %c0_82], %140 {strides = array<i32>} : memref<1x1x2x128xf32, #tpu.memory_space<vmem>>, vector<1x1x2x128xf32>,
    return
  }
  func.func @transform_0(%arg0: i32, %arg1: i32) -> (i32, i32, i32, i32) {
    %c8_i32 = arith.constant 8 : i32
    %0 = arith.muli %arg1, %c8_i32 : i32
    %c1_i32 = arith.constant 1 : i32
    %1 = arith.subi %0, %c1_i32 : i32
    %c0_i32 = arith.constant 0 : i32
    %2 = arith.maxsi %1, %c0_i32 : i32
    %c0_i32_0 = arith.constant 0 : i32
    %c0_i32_1 = arith.constant 0 : i32
    %c0_i32_2 = arith.constant 0 : i32
    return %arg0, %2, %c0_i32_0, %c0_i32_1 : i32, i32, i32, i32
  }
  func.func @transform_1(%arg0: i32, %arg1: i32) -> (i32, i32, i32) {
    %c0_i32 = arith.constant 0 : i32
    %c0_i32_0 = arith.constant 0 : i32
    return %arg0, %arg1, %c0_i32 : i32, i32, i32
  }
  func.func @transform_2(%arg0: i32, %arg1: i32) -> (i32, i32, i32, i32) {
    %c8_i32 = arith.constant 8 : i32
    %0 = arith.muli %arg1, %c8_i32 : i32
    %c8_i32_0 = arith.constant 8 : i32
    %1 = arith.addi %0, %c8_i32_0 : i32
    %c15_i32 = arith.constant 15 : i32
    %2 = arith.minsi %1, %c15_i32 : i32
    %c0_i32 = arith.constant 0 : i32
    %c0_i32_1 = arith.constant 0 : i32
    %c0_i32_2 = arith.constant 0 : i32
    return %arg0, %2, %c0_i32, %c0_i32_1 : i32, i32, i32, i32
  }
  func.func @transform_3(%arg0: i32, %arg1: i32) -> (i32, i32) {
    %c0_i32 = arith.constant 0 : i32
    %c0_i32_0 = arith.constant 0 : i32
    %c0_i32_1 = arith.constant 0 : i32
    return %c0_i32, %c0_i32_0 : i32, i32
  }
  func.func @transform_4(%arg0: i32, %arg1: i32) -> (i32, i32) {
    %c0_i32 = arith.constant 0 : i32
    %c0_i32_0 = arith.constant 0 : i32
    %c0_i32_1 = arith.constant 0 : i32
    return %c0_i32, %c0_i32_0 : i32, i32
  }
  func.func @transform_5(%arg0: i32, %arg1: i32) -> (i32, i32, i32) {
    %c0_i32 = arith.constant 0 : i32
    %c0_i32_0 = arith.constant 0 : i32
    %c0_i32_1 = arith.constant 0 : i32
    %c0_i32_2 = arith.constant 0 : i32
    return %c0_i32, %c0_i32_0, %c0_i32_1 : i32, i32, i32
  }
  func.func @transform_6(%arg0: i32, %arg1: i32) -> (i32, i32, i32) {
    %c0_i32 = arith.constant 0 : i32
    %c0_i32_0 = arith.constant 0 : i32
    return %arg0, %arg1, %c0_i32 : i32, i32, i32
  }
  func.func @transform_7(%arg0: i32, %arg1: i32) -> (i32, i32, i32, i32) {
    %c0_i32 = arith.constant 0 : i32
    %c0_i32_0 = arith.constant 0 : i32
    %c0_i32_1 = arith.constant 0 : i32
    return %arg0, %arg1, %c0_i32, %c0_i32_0 : i32, i32, i32, i32
  }
}

module attributes {stable_mosaic.version = 11 : i64} {
  func.func @_affine_relu_conv1x1_stats_kernel(%arg0: i32, %arg1: memref<128x128xbf16, #tpu.memory_space<vmem>>, %arg2: memref<1x128xf32, #tpu.memory_space<vmem>>, %arg3: memref<1x128xf32, #tpu.memory_space<vmem>>, %arg4: memref<128x128xbf16, #tpu.memory_space<vmem>>, %arg5: memref<128x128xbf16, #tpu.memory_space<vmem>>, %arg6: memref<1x2x128xf32, #tpu.memory_space<vmem>>) attributes {dimension_semantics = [#tpu.dimension_semantics<parallel>], iteration_bounds = array<i64: 4>, scalar_prefetch = 0 : i64, scratch_operands = 0 : i64, tpu.core_type = #tpu.core_type<tc>, window_params = [{transform_indices = @transform_0, window_bounds = array<i64: 128, 128>}, {pipeline_mode = #tpu.pipeline_mode<synchronous>, transform_indices = @transform_1, window_bounds = array<i64: 1, 128>}, {pipeline_mode = #tpu.pipeline_mode<synchronous>, transform_indices = @transform_2, window_bounds = array<i64: 1, 128>}, {pipeline_mode = #tpu.pipeline_mode<synchronous>, transform_indices = @transform_3, window_bounds = array<i64: 128, 128>}, {transform_indices = @transform_4, window_bounds = array<i64: 128, 128>}, {transform_indices = @transform_5, window_bounds = array<i64: 1, 2, 128>}]} {
    %c0 = arith.constant 0 : index
    %c0_0 = arith.constant 0 : index
    %0 = vector.load %arg1[%c0, %c0_0] : memref<128x128xbf16, #tpu.memory_space<vmem>>, vector<128x128xbf16>
    %1 = arith.extf %0 : vector<128x128xbf16> to vector<128x128xf32>
    %c0_1 = arith.constant 0 : index
    %c0_2 = arith.constant 0 : index
    %2 = vector.load %arg2[%c0_1, %c0_2] : memref<1x128xf32, #tpu.memory_space<vmem>>, vector<1x128xf32>
    %3 = vector.broadcast %2 : vector<1x128xf32> to vector<128x128xf32>
    %4 = arith.mulf %1, %3 : vector<128x128xf32>
    %c0_3 = arith.constant 0 : index
    %c0_4 = arith.constant 0 : index
    %5 = vector.load %arg3[%c0_3, %c0_4] : memref<1x128xf32, #tpu.memory_space<vmem>>, vector<1x128xf32>
    %6 = vector.broadcast %5 : vector<1x128xf32> to vector<128x128xf32>
    %7 = arith.addf %4, %6 : vector<128x128xf32>
    %cst = arith.constant 0.000000e+00 : f32
    %8 = vector.broadcast %cst : f32 to vector<128x128xf32>
    %9 = arith.maximumf %7, %8 : vector<128x128xf32>
    %10 = arith.truncf %9 : vector<128x128xf32> to vector<128x128xbf16>
    %c0_5 = arith.constant 0 : index
    %c0_6 = arith.constant 0 : index
    %11 = vector.load %arg4[%c0_5, %c0_6] : memref<128x128xbf16, #tpu.memory_space<vmem>>, vector<128x128xbf16>
    %cst_7 = arith.constant dense<0.000000e+00> : vector<128x128xf32>
    %12 = tpu.matmul %10, %11, %cst_7 {dimension_numbers = #tpu.dot_dimension_numbers<[1], [0], [0], [1], [0, 0, 1, 1], [], []>} : vector<128x128xbf16>, vector<128x128xbf16>, vector<128x128xf32> -> vector<128x128xf32>
    %13 = arith.truncf %12 : vector<128x128xf32> to vector<128x128xbf16>
    %c0_8 = arith.constant 0 : index
    %c0_9 = arith.constant 0 : index
    %14 = vector.load %arg5[%c0_8, %c0_9] : memref<128x128xbf16, #tpu.memory_space<vmem>>, vector<128x128xbf16>
    tpu.vector_store %arg5[%c0_8, %c0_9], %13 {strides = array<i32>} : memref<128x128xbf16, #tpu.memory_space<vmem>>, vector<128x128xbf16>,
    %cst_10 = arith.constant dense<0.000000e+00> : vector<128xf32>
    %15 = vector.multi_reduction <add>, %12, %cst_10 [0] : vector<128x128xf32> to vector<128xf32>
    %16 = vector.shape_cast %15 : vector<128xf32> to vector<1x128xf32>
    %17 = arith.mulf %12, %12 : vector<128x128xf32>
    %cst_11 = arith.constant dense<0.000000e+00> : vector<128xf32>
    %18 = vector.multi_reduction <add>, %17, %cst_11 [0] : vector<128x128xf32> to vector<128xf32>
    %19 = vector.shape_cast %18 : vector<128xf32> to vector<1x128xf32>
    %20 = tpu.concatenate %16, %19 in 0 : vector<1x128xf32>, vector<1x128xf32> -> vector<2x128xf32>
    %21 = vector.shape_cast %20 : vector<2x128xf32> to vector<1x2x128xf32>
    %c0_12 = arith.constant 0 : index
    %c0_13 = arith.constant 0 : index
    %c0_14 = arith.constant 0 : index
    %22 = vector.load %arg6[%c0_12, %c0_13, %c0_14] : memref<1x2x128xf32, #tpu.memory_space<vmem>>, vector<1x2x128xf32>
    tpu.vector_store %arg6[%c0_12, %c0_13, %c0_14], %21 {strides = array<i32>} : memref<1x2x128xf32, #tpu.memory_space<vmem>>, vector<1x2x128xf32>,
    return
  }
  func.func @transform_0(%arg0: i32) -> (i32, i32) {
    %c0_i32 = arith.constant 0 : i32
    %c0_i32_0 = arith.constant 0 : i32
    return %arg0, %c0_i32 : i32, i32
  }
  func.func @transform_1(%arg0: i32) -> (i32, i32) {
    %c0_i32 = arith.constant 0 : i32
    %c0_i32_0 = arith.constant 0 : i32
    %c0_i32_1 = arith.constant 0 : i32
    return %c0_i32, %c0_i32_0 : i32, i32
  }
  func.func @transform_2(%arg0: i32) -> (i32, i32) {
    %c0_i32 = arith.constant 0 : i32
    %c0_i32_0 = arith.constant 0 : i32
    %c0_i32_1 = arith.constant 0 : i32
    return %c0_i32, %c0_i32_0 : i32, i32
  }
  func.func @transform_3(%arg0: i32) -> (i32, i32) {
    %c0_i32 = arith.constant 0 : i32
    %c0_i32_0 = arith.constant 0 : i32
    %c0_i32_1 = arith.constant 0 : i32
    return %c0_i32, %c0_i32_0 : i32, i32
  }
  func.func @transform_4(%arg0: i32) -> (i32, i32) {
    %c0_i32 = arith.constant 0 : i32
    %c0_i32_0 = arith.constant 0 : i32
    return %arg0, %c0_i32 : i32, i32
  }
  func.func @transform_5(%arg0: i32) -> (i32, i32, i32) {
    %c0_i32 = arith.constant 0 : i32
    %c0_i32_0 = arith.constant 0 : i32
    %c0_i32_1 = arith.constant 0 : i32
    return %arg0, %c0_i32, %c0_i32_0 : i32, i32, i32
  }
}

module attributes {stable_mosaic.version = 11 : i64} {
  func.func @_affine_residual_relu_kernel(%arg0: i32, %arg1: memref<128x128xbf16, #tpu.memory_space<vmem>>, %arg2: memref<1x128xf32, #tpu.memory_space<vmem>>, %arg3: memref<1x128xf32, #tpu.memory_space<vmem>>, %arg4: memref<128x128xf32, #tpu.memory_space<vmem>>, %arg5: memref<128x128xf32, #tpu.memory_space<vmem>>) attributes {dimension_semantics = [#tpu.dimension_semantics<parallel>], iteration_bounds = array<i64: 4>, scalar_prefetch = 0 : i64, scratch_operands = 0 : i64, tpu.core_type = #tpu.core_type<tc>, window_params = [{transform_indices = @transform_0, window_bounds = array<i64: 128, 128>}, {pipeline_mode = #tpu.pipeline_mode<synchronous>, transform_indices = @transform_1, window_bounds = array<i64: 1, 128>}, {pipeline_mode = #tpu.pipeline_mode<synchronous>, transform_indices = @transform_2, window_bounds = array<i64: 1, 128>}, {transform_indices = @transform_3, window_bounds = array<i64: 128, 128>}, {transform_indices = @transform_4, window_bounds = array<i64: 128, 128>}]} {
    %c0 = arith.constant 0 : index
    %c0_0 = arith.constant 0 : index
    %0 = vector.load %arg1[%c0, %c0_0] : memref<128x128xbf16, #tpu.memory_space<vmem>>, vector<128x128xbf16>
    %1 = arith.extf %0 : vector<128x128xbf16> to vector<128x128xf32>
    %c0_1 = arith.constant 0 : index
    %c0_2 = arith.constant 0 : index
    %2 = vector.load %arg2[%c0_1, %c0_2] : memref<1x128xf32, #tpu.memory_space<vmem>>, vector<1x128xf32>
    %3 = vector.broadcast %2 : vector<1x128xf32> to vector<128x128xf32>
    %4 = arith.mulf %1, %3 : vector<128x128xf32>
    %c0_3 = arith.constant 0 : index
    %c0_4 = arith.constant 0 : index
    %5 = vector.load %arg3[%c0_3, %c0_4] : memref<1x128xf32, #tpu.memory_space<vmem>>, vector<1x128xf32>
    %6 = vector.broadcast %5 : vector<1x128xf32> to vector<128x128xf32>
    %7 = arith.addf %4, %6 : vector<128x128xf32>
    %c0_5 = arith.constant 0 : index
    %c0_6 = arith.constant 0 : index
    %8 = vector.load %arg4[%c0_5, %c0_6] : memref<128x128xf32, #tpu.memory_space<vmem>>, vector<128x128xf32>
    %9 = arith.addf %7, %8 : vector<128x128xf32>
    %cst = arith.constant 0.000000e+00 : f32
    %10 = vector.broadcast %cst : f32 to vector<128x128xf32>
    %11 = arith.maximumf %9, %10 : vector<128x128xf32>
    %c0_7 = arith.constant 0 : index
    %c0_8 = arith.constant 0 : index
    %12 = vector.load %arg5[%c0_7, %c0_8] : memref<128x128xf32, #tpu.memory_space<vmem>>, vector<128x128xf32>
    tpu.vector_store %arg5[%c0_7, %c0_8], %11 {strides = array<i32>} : memref<128x128xf32, #tpu.memory_space<vmem>>, vector<128x128xf32>,
    return
  }
  func.func @transform_0(%arg0: i32) -> (i32, i32) {
    %c0_i32 = arith.constant 0 : i32
    %c0_i32_0 = arith.constant 0 : i32
    return %arg0, %c0_i32 : i32, i32
  }
  func.func @transform_1(%arg0: i32) -> (i32, i32) {
    %c0_i32 = arith.constant 0 : i32
    %c0_i32_0 = arith.constant 0 : i32
    %c0_i32_1 = arith.constant 0 : i32
    return %c0_i32, %c0_i32_0 : i32, i32
  }
  func.func @transform_2(%arg0: i32) -> (i32, i32) {
    %c0_i32 = arith.constant 0 : i32
    %c0_i32_0 = arith.constant 0 : i32
    %c0_i32_1 = arith.constant 0 : i32
    return %c0_i32, %c0_i32_0 : i32, i32
  }
  func.func @transform_3(%arg0: i32) -> (i32, i32) {
    %c0_i32 = arith.constant 0 : i32
    %c0_i32_0 = arith.constant 0 : i32
    return %arg0, %c0_i32 : i32, i32
  }
  func.func @transform_4(%arg0: i32) -> (i32, i32) {
    %c0_i32 = arith.constant 0 : i32
    %c0_i32_0 = arith.constant 0 : i32
    return %arg0, %c0_i32 : i32, i32
  }
}

</mosaic_0001>

<bundles_post_ra>
// kernel: bottleneck_forward.4
= control target key start
LH: loop header
LB: loop body
LE: loop exit
PB: predicated region body
PF: predicated region fallthrough
CT: control target
= control target key end

     0   :  { %s806_s12 = smov 0   ;;  %s887_s0 = inlined_call_operand.vmem [shape: f32[512,128], index: 0, kind: input, shape index: {}]   ;;  %s888_s1 = inlined_call_operand.vmem [shape: bf16[128,128], index: 1, kind: input, shape index: {}]   ;;  %s889_s2 = inlined_call_operand.vmem [shape: bf16[512,128], index: 2, kind: output, shape index: {0}]   ;;  %s890_s3 = inlined_call_operand.vmem [shape: f32[4,2,128], index: 3, kind: output, shape index: {1}]  }
   0x1 LB: > { %s812_s13 = sadd.s32 4294967295, %s784_s12   ;;  %p603_p0 = scmp.ge.s32.totalorder %s784_s12, 1  ;;  %s784_s12 = sphi %s806_s12, %s14_s12  }
   0x2   : > { %p141_p1 = scmp.lt.s32.totalorder %s784_s12, 5 }
   0x4   : > { %p142_p2 = pnand %p603_p0, %p141_p1 }
   0x5   : > { %v770_v0 = vld [vmem:[%s888_s1] sm:$0xff] (!%p142_p2)   ;;  %s604_s16 = sshll.u32 (!%p142_p2), %s812_s13, 4  ;;  %v771_v1 = vld [vmem:[%s888_s1 + $0x8] sm:$0xff] (!%p142_p2)   ;;  %v772_v2 = vld [vmem:[%s888_s1 + $0x10] sm:$0xff] (!%p142_p2)   ;;  %p181_p4 = scmp.lt.s32.totalorder (!%p142_p2), %s812_s13, 3  ;;  %vm509_vm0 = vcmask (!%p142_p2), 1040384  }
   0x6   : > { %145 = sbr.rel (%p142_p2) target bundleno = 300 (0x12c), region = 28  ;;  %p170_p3 = scmp.lt.s32.totalorder (!%p142_p2), %s604_s16, 63  ;;  %714 = vmatprep.subr.bf16.mxu0 (!%p142_p2), %v770_v0  ;;  %746 = vmatprep.subr.bf16.mxu1 (!%p142_p2), %v770_v0  ;;  %v773_v3 = vld [vmem:[%s888_s1 + $0x18] sm:$0xff] (!%p142_p2)   ;;  %v774_v9 = vld [vmem:[%s888_s1 + $0x20] sm:$0xff] (!%p142_p2)   ;;  %v775_v11 = vld [vmem:[%s888_s1 + $0x28] sm:$0xff] (!%p142_p2)  }
   0x7   : > { %715 = vmatpush3.bf16.msra.mxu0 (!%p142_p2), %v770_v0  ;;  %754 = vmatpush3.bf16.msra.mxu1 (!%p142_p2), %v770_v0  ;;  %v776_v12 = vld [vmem:[%s888_s1 + $0x30] sm:$0xff] (!%p142_p2)   ;;  %v777_v13 = vld [vmem:[%s888_s1 + $0x38] sm:$0xff] (!%p142_p2)  }
   0x8   : > { %716 = vmatprep.subr.bf16.mxu0 (!%p142_p2), %v771_v1  ;;  %747 = vmatprep.subr.bf16.mxu1 (!%p142_p2), %v771_v1 }
   0xb   : > { %717 = vmatpush3.bf16.msra.mxu0 (!%p142_p2), %v771_v1  ;;  %755 = vmatpush3.bf16.msra.mxu1 (!%p142_p2), %v771_v1 }
   0xc   : > { %718 = vmatprep.subr.bf16.mxu0 (!%p142_p2), %v772_v2  ;;  %748 = vmatprep.subr.bf16.mxu1 (!%p142_p2), %v772_v2 }
   0xd   : > { %s892_s16 = smov (!%p170_p3, %s604_s16), 63  ;;  %s894_s13 = smov (!%p181_p4, %s812_s13), 3 }
   0xe   : > { %s605_s21 = sshll.u32 %s892_s16, 3  ;;  %s607_s8 = sshll.u32 %s892_s16, 2 }
   0xf   : > { %s832_s24 = scalar_lea.vmem %s887_s0, %s605_s21  ;;  %719 = vmatpush3.bf16.msra.mxu0 %v772_v2  ;;  %756 = vmatpush3.bf16.msra.mxu1 %v772_v2  ;;  %s869_s11 = scalar_lea.vmem %s889_s2, %s607_s8 }
  0x10   : > { %v186_v4 = vld [vmem:[%s832_s24] sm:$0xff]  ;;  %v187_v5 = vld [vmem:[%s832_s24 + $0x8] sm:$0xff]  ;;  %720 = vmatprep.subr.bf16.mxu0 %v773_v3  ;;  %749 = vmatprep.subr.bf16.mxu1 %v773_v3  ;;  %v188_v14 = vld [vmem:[%s832_s24 + $0x10] sm:$0xff]  ;;  %s608_s14 = sshll.u32 %s894_s13, 1 }
  0x11   : > { %v202_v6 = vpack.c.bf16 %v187_v5, %v186_v4  ;;  %v194_v7 = vld [vmem:[%s832_s24 + $0x40] sm:$0xff]  ;;  %v195_v8 = vld [vmem:[%s832_s24 + $0x48] sm:$0xff]  ;;  %v189_v15 = vld [vmem:[%s832_s24 + $0x18] sm:$0xff]  ;;  %s184_s17 = scalar_lea.vmem %s890_s3, %s608_s14 }
  0x12   : > { %v206_v10 = vpack.c.bf16 %v195_v8, %v194_v7  ;;  %v190_v16 = vld [vmem:[%s832_s24 + $0x20] sm:$0xff]  ;;  %v196_v17 = vld [vmem:[%s832_s24 + $0x50] sm:$0xff]  ;;  %v197_v18 = vld [vmem:[%s832_s24 + $0x58] sm:$0xff]  ;;  %v203_v22 = vpack.c.bf16 %v189_v15, %v188_v14 }
  0x13   : > { %730 = vmatprep.mubr.bf16.mxu0 %v202_v6  ;;  %721 = vmatpush3.bf16.msra.mxu0 %v773_v3  ;;  %v191_v19 = vld [vmem:[%s832_s24 + $0x28] sm:$0xff]  ;;  %v198_v20 = vld [vmem:[%s832_s24 + $0x60] sm:$0xff]  ;;  %v207_v23 = vpack.c.bf16 %v197_v18, %v196_v17  ;;  %v192_v26 = vld [vmem:[%s832_s24 + $0x30] sm:$0xff] }
  0x14   : > { %738 = vmatprep.mubr.bf16.mxu1 %v206_v10  ;;  %757 = vmatpush3.bf16.msra.mxu1 %v773_v3  ;;  %v199_v21 = vld [vmem:[%s832_s24 + $0x68] sm:$0xff]  ;;  %v204_v24 = vpack.c.bf16 %v191_v19, %v190_v16  ;;  %v193_v27 = vld [vmem:[%s832_s24 + $0x38] sm:$0xff]  ;;  %v200_v28 = vld [vmem:[%s832_s24 + $0x70] sm:$0xff] }
  0x15   : > { %722 = vmatprep.subr.bf16.mxu0 %v774_v9  ;;  %750 = vmatprep.subr.bf16.mxu1 %v774_v9  ;;  %v208_v25 = vpack.c.bf16 %v199_v21, %v198_v20  ;;  %v201_v29 = vld [vmem:[%s832_s24 + $0x78] sm:$0xff]  ;;  %v205_v30 = vpack.c.bf16 %v193_v27, %v192_v26 }
  0x16   : > { %v209_v31 = vpack.c.bf16 %v201_v29, %v200_v28 }
  0x17   : > { %723 = vmatpush3.bf16.msra.mxu0 %v774_v9 }
  0x18   : > { %758 = vmatpush3.bf16.msra.mxu1 %v774_v9  ;;  %724 = vmatprep.subr.bf16.mxu0 %v775_v11 }
  0x19   : > { %751 = vmatprep.subr.bf16.mxu1 %v775_v11 }
  0x1b   : > { %725 = vmatpush3.bf16.msra.mxu0 %v775_v11 }
  0x1c   : > { %759 = vmatpush3.bf16.msra.mxu1 %v775_v11  ;;  %726 = vmatprep.subr.bf16.mxu0 %v776_v12 }
  0x1d   : > { %752 = vmatprep.subr.bf16.mxu1 %v776_v12 }
  0x1f   : > { %727 = vmatpush3.bf16.msra.mxu0 %v776_v12 }
  0x20   : > { %760 = vmatpush3.bf16.msra.mxu1 %v776_v12  ;;  %728 = vmatprep.subr.bf16.mxu0 %v777_v13 }
  0x21   : > { %753 = vmatprep.subr.bf16.mxu1 %v777_v13 }
  0x23   : > { %729 = vmatpush3.bf16.msra.mxu0 %v777_v13 }
  0x24   : > { %761 = vmatpush3.bf16.msra.mxu1 %v777_v13 }
  0x26   : > { %731 = vmatmul.mubr.bf16.vlgmr.msra.gmra.mrb[0].mxu0 %v203_v22 }
  0x27   : > { %739 = vmatmul.mubr.bf16.vlgmr.msra.gmra.mrb[0].mxu1 %v207_v23  ;;  %734 = vmatprep.mubr.bf16.mxu0 %v204_v24 }
  0x28   : > { %742 = vmatprep.mubr.bf16.mxu1 %v208_v25 }
  0x2e   : > { %735 = vmatmul.mubr.bf16.gmra.mrb[4].mxu0 %v205_v30 }
  0x2f   : > { %743 = vmatmul.mubr.bf16.gmra.mrb[4].mxu1 %v209_v31 }
  0xf9   : > { %v732_v32 = vpop.f32.mrb[0].mxu0 }
  0xfa   : > { %v740_v33 = vpop.f32.mrb[0].mxu1  ;;  %v308_v34 = vpop.f32.mrb[1].mxu0  ;;  %v474_v47 = vmul.f32 %v732_v32, %v732_v32 }
  0xfb   : > { %v340_v35 = vpop.f32.mrb[1].mxu1  ;;  %v733_v36 = vpop.f32.mrb[2].mxu0  ;;  %v472_v38 = vmul.f32 %v308_v34, %v308_v34  ;;  %v482_v19 = vmul.f32 %v740_v33, %v740_v33 }
  0xfc   : > { %v741_v37 = vpop.f32.mrb[2].mxu1  ;;  %v659_v39 = vpack.c.bf16 %v733_v36, %v732_v32  ;;  %v311_v40 = vpop.f32.mrb[3].mxu0  ;;  %v475_v50 = vmul.f32 %v733_v36, %v733_v36  ;;  %v480_v13 = vmul.f32 %v340_v35, %v340_v35 }
  0xfd   : > { %v679_v41 = vpack.c.bf16 %v741_v37, %v740_v33  ;;  %v343_v42 = vpop.f32.mrb[3].mxu1  ;;  %v654_v43 = vpack.c.bf16 %v311_v40, %v308_v34  ;;  %v451_v44 = vadd.f32 %v311_v40, %v308_v34  ;;  %v473_v45 = vmul.f32 %v311_v40, %v311_v40 }
  0xfe   : > { %v674_v46 = vpack.c.bf16 %v343_v42, %v340_v35  ;;  %691 = vst [vmem:[%s869_s11 + $0x8] sm:$0xff] %v659_v39   ;;  %v481_v18 = vmul.f32 %v343_v42, %v343_v42  ;;  %v483_v22 = vmul.f32 %v741_v37, %v741_v37 }
  0xff   : > { %695 = vst [vmem:[%s869_s11 + $0x28] sm:$0xff] %v679_v41   ;;  %655 = vst [vmem:[%s869_s11] sm:$0xff] %v654_v43   ;;  %v452_v48 = vadd.f32 %v732_v32, %v451_v44  ;;  %v488_v49 = vadd.f32 %v473_v45, %v472_v38 }
 0x100   : > { %694 = vst [vmem:[%s869_s11 + $0x20] sm:$0xff] %v674_v46  }
 0x101   : > { %v489_v51 = vadd.f32 %v488_v49, %v474_v47  ;;  %v736_v52 = vpop.f32.mrb[4].mxu0  ;;  %v453_v53 = vadd.f32 %v733_v36, %v452_v48 }
 0x102   : > { %v744_v54 = vpop.f32.mrb[4].mxu1  ;;  %v324_v55 = vpop.f32.mrb[5].mxu0  ;;  %v478_v7 = vmul.f32 %v736_v52, %v736_v52 }
 0x103   : > { %v356_v56 = vpop.f32.mrb[5].mxu1  ;;  %v454_v57 = vadd.f32 %v453_v53, %v324_v55  ;;  %v476_v58 = vmul.f32 %v324_v55, %v324_v55  ;;  %v490_v59 = vadd.f32 %v489_v51, %v475_v50  ;;  %v737_v60 = vpop.f32.mrb[6].mxu0  ;;  %v486_v31 = vmul.f32 %v744_v54, %v744_v54 }
 0x104   : > { %v745_v61 = vpop.f32.mrb[6].mxu1  ;;  %v669_v62 = vpack.c.bf16 %v737_v60, %v736_v52  ;;  %v327_v63 = vpop.f32.mrb[7].mxu0  ;;  %v479_v10 = vmul.f32 %v737_v60, %v737_v60  ;;  %v484_v25 = vmul.f32 %v356_v56, %v356_v56 }
 0x105   : > { %v689_v0 = vpack.c.bf16 %v745_v61, %v744_v54  ;;  %v359_v1 = vpop.f32.mrb[7].mxu1  ;;  %v491_v2 = vadd.f32 %v490_v59, %v476_v58  ;;  %v664_v3 = vpack.c.bf16 %v327_v63, %v324_v55  ;;  %v455_v4 = vadd.f32 %v454_v57, %v327_v63 }
 0x106   : > { %v477_v5 = vmul.f32 %v327_v63, %v327_v63  ;;  %693 = vst [vmem:[%s869_s11 + $0x18] sm:$0xff] %v669_v62   ;;  %v684_v6 = vpack.c.bf16 %v359_v1, %v356_v56  ;;  %v485_v30 = vmul.f32 %v359_v1, %v359_v1 }
 0x107   : > { %697 = vst [vmem:[%s869_s11 + $0x38] sm:$0xff] %v689_v0   ;;  %692 = vst [vmem:[%s869_s11 + $0x10] sm:$0xff] %v664_v3   ;;  %v456_v8 = vadd.f32 %v736_v52, %v455_v4 }
 0x108   : > { %v492_v9 = vadd.f32 %v491_v2, %v477_v5  ;;  %696 = vst [vmem:[%s869_s11 + $0x30] sm:$0xff] %v684_v6  }
 0x109   : > { %v457_v12 = vadd.f32 %v737_v60, %v456_v8 }
 0x10a   : > { %v493_v11 = vadd.f32 %v492_v9, %v478_v7 }
 0x10b   : > { %v458_v14 = vadd.f32 %v457_v12, %v340_v35  ;;  %v487_v35 = vmul.f32 %v745_v61, %v745_v61 }
 0x10c   : > { %v494_v15 = vadd.f32 %v493_v11, %v479_v10 }
 0x10d   : > { %v459_v17 = vadd.f32 %v458_v14, %v343_v42 }
 0x10e   : > { %v495_v16 = vadd.f32 %v494_v15, %v480_v13 }
 0x10f   : > { %v460_v20 = vadd.f32 %v740_v33, %v459_v17 }
 0x110   : > { %v496_v21 = vadd.f32 %v495_v16, %v481_v18 }
 0x111   : > { %v461_v24 = vadd.f32 %v741_v37, %v460_v20 }
 0x112   : > { %v497_v23 = vadd.f32 %v496_v21, %v482_v19 }
 0x113   : > { %v462_v26 = vadd.f32 %v461_v24, %v356_v56 }
 0x114   : > { %v498_v27 = vadd.f32 %v497_v23, %v483_v22 }
 0x115   : > { %v463_v29 = vadd.f32 %v462_v26, %v359_v1 }
 0x116   : > { %v499_v28 = vadd.f32 %v498_v27, %v484_v25 }
 0x117   : > { %v464_v32 = vadd.f32 %v744_v54, %v463_v29 }
 0x118   : > { %v500_v34 = vadd.f32 %v499_v28, %v485_v30 }
 0x119   : > { %v465_v36 = vadd.f32 %v745_v61, %v464_v32 }
 0x11a   : > { %v501_v38 = vadd.f32 %v500_v34, %v486_v31 }
 0x11b   : > { %v466_v39 = vrot.slane %v465_v36, 4 }
 0x11c   : > { %v502_v33 = vadd.f32 %v501_v38, %v487_v35 }
 0x11d   : > { %v467_v40 = vadd.f32 %v466_v39, %v465_v36 }
 0x11e   : > { %v503_v41 = vrot.slane %v502_v33, 4 }
 0x11f   : > { %v468_v42 = vrot.slane %v467_v40, 2 }
 0x120   : > { %v504_v37 = vadd.f32 %v503_v41, %v502_v33 }
 0x121   : > { %v469_v43 = vadd.f32 %v468_v42, %v467_v40 }
 0x122   : > { %v505_v44 = vrot.slane %v504_v37, 2 }
 0x123   : > { %v470_v45 = vrot.slane %v469_v43, 1 }
 0x124   : > { %v506_v46 = vadd.f32 %v505_v44, %v504_v37 }
 0x125   : > { %v471_v48 = vadd.f32 %v470_v45, %v469_v43 }
 0x126   : > { %v507_v47 = vrot.slane %v506_v46, 1 }
 0x128   : > { %v508_v49 = vadd.f32 %v507_v47, %v506_v46 }
 0x12a   : > { %v510_v50 = vsel %vm509_vm0, %v471_v48, %v508_v49 }
 0x12b   : > { %511 = vst [vmem:[%s184_s17] sm:$0x3] %v510_v50 }
 0x12c PF: > { %s14_s12 = sadd.s32 1, %s784_s12  }
 0x12d   : > { %p11_p5 = scmp.ge.s32.totalorder %s14_s12, 6  }
 0x12f   :  { %13 = sbr.rel (!%p11_p5) target bundleno = 1 (0x1), region = 70 }

// kernel: bottleneck_forward.6
= control target key start
LH: loop header
LB: loop body
LE: loop exit
PB: predicated region body
PF: predicated region fallthrough
CT: control target
= control target key end

     0   :  { %s989_s18 = smov 0   ;;  %s1107_s0 = inlined_call_operand.vmem [shape: bf16[512,128], index: 0, kind: input, shape index: {}]   ;;  %s1108_s1 = inlined_call_operand.vmem [shape: f32[1,128], index: 1, kind: input, shape index: {}]   ;;  %s1109_s2 = inlined_call_operand.vmem [shape: f32[1,128], index: 2, kind: input, shape index: {}]   ;;  %s1110_s3 = inlined_call_operand.vmem [shape: bf16[128,128], index: 3, kind: input, shape index: {}]   ;;  %s1111_s4 = inlined_call_operand.vmem [shape: bf16[512,128], index: 4, kind: output, shape index: {0}]   ;;  %s1112_s5 = inlined_call_operand.vmem [shape: f32[4,2,128], index: 5, kind: output, shape index: {1}]  }
   0x1 LB: > { %s995_s19 = sadd.s32 4294967295, %s957_s18   ;;  %p735_p0 = scmp.ge.s32.totalorder %s957_s18, 1  ;;  %s957_s18 = sphi %s989_s18, %s16_s18  }
   0x2   : > { %p191_p1 = scmp.lt.s32.totalorder %s957_s18, 5 }
   0x4   : > { %p192_p2 = pnand %p735_p0, %p191_p1 }
   0x5   : > { %v943_v0 = vld [vmem:[%s1110_s3] sm:$0xff] (!%p192_p2)   ;;  %s736_s22 = sshll.u32 (!%p192_p2), %s995_s19, 4  ;;  %v944_v1 = vld [vmem:[%s1110_s3 + $0x8] sm:$0xff] (!%p192_p2)   ;;  %v945_v2 = vld [vmem:[%s1110_s3 + $0x10] sm:$0xff] (!%p192_p2)   ;;  %p235_p4 = scmp.lt.s32.totalorder (!%p192_p2), %s995_s19, 3  ;;  %vm641_vm0 = vcmask (!%p192_p2), 1040384  }
   0x6   : > { %195 = sbr.rel (%p192_p2) target bundleno = 300 (0x12c), region = 36  ;;  %p224_p3 = scmp.lt.s32.totalorder (!%p192_p2), %s736_s22, 63  ;;  %887 = vmatprep.subr.bf16.mxu0 (!%p192_p2), %v943_v0  ;;  %919 = vmatprep.subr.bf16.mxu1 (!%p192_p2), %v943_v0  ;;  %v946_v3 = vld [vmem:[%s1110_s3 + $0x18] sm:$0xff] (!%p192_p2)   ;;  %v1026_v5 = vld [vmem:[%s1108_s1] ss:$0 sm:$0xff] (!%p192_p2)  ;;  %v948_v28 = vld [vmem:[%s1110_s3 + $0x28] sm:$0xff] (!%p192_p2)  }
   0x7   : > { %888 = vmatpush3.bf16.msra.mxu0 (!%p192_p2), %v943_v0  ;;  %927 = vmatpush3.bf16.msra.mxu1 (!%p192_p2), %v943_v0  ;;  %v1033_v10 = vld [vmem:[%s1109_s2] ss:$0 sm:$0xff] (!%p192_p2)  ;;  %v949_v44 = vld [vmem:[%s1110_s3 + $0x30] sm:$0xff] (!%p192_p2)   ;;  %v950_v61 = vld [vmem:[%s1110_s3 + $0x38] sm:$0xff] (!%p192_p2)  }
   0x8   : > { %889 = vmatprep.subr.bf16.mxu0 (!%p192_p2), %v944_v1  ;;  %920 = vmatprep.subr.bf16.mxu1 (!%p192_p2), %v944_v1  ;;  %v947_v16 = vld [vmem:[%s1110_s3 + $0x20] sm:$0xff] (!%p192_p2)  }
   0xb   : > { %890 = vmatpush3.bf16.msra.mxu0 (!%p192_p2), %v944_v1  ;;  %928 = vmatpush3.bf16.msra.mxu1 (!%p192_p2), %v944_v1 }
   0xc   : > { %891 = vmatprep.subr.bf16.mxu0 (!%p192_p2), %v945_v2  ;;  %921 = vmatprep.subr.bf16.mxu1 (!%p192_p2), %v945_v2 }
   0xd   : > { %s1114_s22 = smov (!%p224_p3, %s736_s22), 63  ;;  %s1116_s19 = smov (!%p235_p4, %s995_s19), 3 }
   0xe   : > { %s737_s27 = sshll.u32 %s1114_s22, 2  ;;  %s740_s22 = sshll.u32 %s1116_s19, 1 }
   0xf   : > { %s1017_s30 = scalar_lea.vmem %s1107_s0, %s737_s27  ;;  %892 = vmatpush3.bf16.msra.mxu0 %v945_v2  ;;  %929 = vmatpush3.bf16.msra.mxu1 %v945_v2  ;;  %s1089_s25 = scalar_lea.vmem %s1111_s4, %s737_s27 }
  0x10   : > { %v786_v4 = vld [vmem:[%s1017_s30] sm:$0xff]   ;;  %v857_v8 = vld [vmem:[%s1017_s30 + $0x8] sm:$0xff]   ;;  %v858_v9 = vld [vmem:[%s1017_s30 + $0x10] sm:$0xff]   ;;  %893 = vmatprep.subr.bf16.mxu0 %v946_v3  ;;  %922 = vmatprep.subr.bf16.mxu1 %v946_v3  ;;  %s238_s28 = scalar_lea.vmem %s1112_s5, %s740_s22 }
  0x11   : > { %v787_v6 = vunpack.c.l.bf16 %v786_v4  ;;  %v788_v7 = vunpack.c.h.bf16 %v786_v4  ;;  %v791_v11 = vunpack.c.l.bf16 %v857_v8  ;;  %v792_v14 = vunpack.c.h.bf16 %v857_v8  ;;  %v860_v15 = vld [vmem:[%s1017_s30 + $0x20] sm:$0xff]   ;;  %v859_v22 = vld [vmem:[%s1017_s30 + $0x18] sm:$0xff]   ;;  %v861_v27 = vld [vmem:[%s1017_s30 + $0x28] sm:$0xff]  }
  0x12   : > { %v795_v17 = vunpack.c.l.bf16 %v858_v9  ;;  %v796_v21 = vunpack.c.h.bf16 %v858_v9  ;;  %v803_v23 = vunpack.c.l.bf16 %v860_v15  ;;  %v862_v30 = vld [vmem:[%s1017_s30 + $0x30] sm:$0xff]   ;;  %v799_v32 = vunpack.c.l.bf16 %v859_v22  ;;  %v863_v39 = vld [vmem:[%s1017_s30 + $0x38] sm:$0xff]  }
  0x13   : > { %v279_v12 = vmul.f32 %v787_v6, %v1026_v5  ;;  %v280_v13 = vmul.f32 %v788_v7, %v1026_v5  ;;  %v281_v20 = vmul.f32 %v791_v11, %v1026_v5  ;;  %894 = vmatpush3.bf16.msra.mxu0 %v946_v3  ;;  %930 = vmatpush3.bf16.msra.mxu1 %v946_v3  ;;  %v800_v33 = vunpack.c.h.bf16 %v859_v22 }
  0x14   : > { %v282_v26 = vmul.f32 %v792_v14, %v1026_v5  ;;  %895 = vmatprep.subr.bf16.mxu0 %v947_v16  ;;  %923 = vmatprep.subr.bf16.mxu1 %v947_v16  ;;  %v283_v29 = vmul.f32 %v795_v17, %v1026_v5  ;;  %v804_v34 = vunpack.c.h.bf16 %v860_v15  ;;  %v284_v36 = vmul.f32 %v796_v21, %v1026_v5 }
  0x15   : > { %v302_v18 = vadd.f32 %v1033_v10, %v279_v12  ;;  %v303_v19 = vadd.f32 %v1033_v10, %v280_v13  ;;  %v304_v35 = vadd.f32 %v1033_v10, %v281_v20  ;;  %v287_v37 = vmul.f32 %v803_v23, %v1026_v5 }
  0x16   : > { %v807_v38 = vunpack.c.l.bf16 %v861_v27  ;;  %v305_v40 = vadd.f32 %v1033_v10, %v282_v26  ;;  %v288_v41 = vmul.f32 %v804_v34, %v1026_v5  ;;  %v808_v42 = vunpack.c.h.bf16 %v861_v27 }
  0x17   : > { %v318_v24 = vmax.f32 %v302_v18, 0.0  ;;  %v319_v25 = vmax.f32 %v303_v19, 0.0  ;;  %896 = vmatpush3.bf16.msra.mxu0 %v947_v16  ;;  %931 = vmatpush3.bf16.msra.mxu1 %v947_v16  ;;  %v811_v43 = vunpack.c.l.bf16 %v862_v30  ;;  %v306_v45 = vadd.f32 %v1033_v10, %v283_v29 }
  0x18   : > { %897 = vmatprep.subr.bf16.mxu0 %v948_v28  ;;  %v310_v46 = vadd.f32 %v1033_v10, %v287_v37  ;;  %v289_v47 = vmul.f32 %v807_v38, %v1026_v5  ;;  %v812_v48 = vunpack.c.h.bf16 %v862_v30  ;;  %924 = vmatprep.subr.bf16.mxu1 %v948_v28  ;;  %v311_v49 = vadd.f32 %v1033_v10, %v288_v41 }
  0x19   : > { %v334_v31 = vpack.c.bf16 %v319_v25, %v318_v24  ;;  %v290_v50 = vmul.f32 %v808_v42, %v1026_v5  ;;  %v291_v51 = vmul.f32 %v811_v43, %v1026_v5  ;;  %v815_v52 = vunpack.c.l.bf16 %v863_v39 }
  0x1a   : > { %v326_v53 = vmax.f32 %v310_v46, 0.0  ;;  %v312_v54 = vadd.f32 %v1033_v10, %v289_v47  ;;  %v292_v55 = vmul.f32 %v812_v48, %v1026_v5  ;;  %v816_v56 = vunpack.c.h.bf16 %v863_v39 }
  0x1b   : > { %903 = vmatprep.mubr.bf16.mxu0 %v334_v31  ;;  %898 = vmatpush3.bf16.msra.mxu0 %v948_v28  ;;  %v307_v57 = vadd.f32 %v1033_v10, %v284_v36  ;;  %v327_v58 = vmax.f32 %v311_v49, 0.0  ;;  %v313_v59 = vadd.f32 %v1033_v10, %v290_v50  ;;  %v314_v60 = vadd.f32 %v1033_v10, %v291_v51 }
  0x1c   : > { %932 = vmatpush3.bf16.msra.mxu1 %v948_v28  ;;  %899 = vmatprep.subr.bf16.mxu0 %v949_v44  ;;  %v285_v62 = vmul.f32 %v799_v32, %v1026_v5  ;;  %v315_v63 = vadd.f32 %v1033_v10, %v292_v55  ;;  %v320_v0 = vmax.f32 %v304_v35, 0.0  ;;  %v321_v1 = vmax.f32 %v305_v40, 0.0 }
  0x1d   : > { %925 = vmatprep.subr.bf16.mxu1 %v949_v44  ;;  %v286_v2 = vmul.f32 %v800_v33, %v1026_v5  ;;  %v338_v3 = vpack.c.bf16 %v327_v58, %v326_v53  ;;  %v328_v4 = vmax.f32 %v312_v54, 0.0  ;;  %v329_v6 = vmax.f32 %v313_v59, 0.0 }
  0x1e   : > { %v293_v7 = vmul.f32 %v815_v52, %v1026_v5  ;;  %v294_v8 = vmul.f32 %v816_v56, %v1026_v5  ;;  %v322_v9 = vmax.f32 %v306_v45, 0.0  ;;  %v323_v11 = vmax.f32 %v307_v57, 0.0 }
  0x1f   : > { %900 = vmatpush3.bf16.msra.mxu0 %v949_v44  ;;  %v330_v12 = vmax.f32 %v314_v60, 0.0  ;;  %v331_v13 = vmax.f32 %v315_v63, 0.0  ;;  %v308_v14 = vadd.f32 %v1033_v10, %v285_v62  ;;  %v309_v15 = vadd.f32 %v1033_v10, %v286_v2  ;;  %911 = vmatprep.mubr.bf16.mxu1 %v338_v3 }
  0x20   : > { %933 = vmatpush3.bf16.msra.mxu1 %v949_v44  ;;  %901 = vmatprep.subr.bf16.mxu0 %v950_v61  ;;  %v335_v16 = vpack.c.bf16 %v321_v1, %v320_v0  ;;  %v339_v17 = vpack.c.bf16 %v329_v6, %v328_v4  ;;  %v316_v18 = vadd.f32 %v1033_v10, %v293_v7 }
  0x21   : > { %926 = vmatprep.subr.bf16.mxu1 %v950_v61  ;;  %v317_v19 = vadd.f32 %v1033_v10, %v294_v8  ;;  %v336_v5 = vpack.c.bf16 %v323_v11, %v322_v9  ;;  %v340_v20 = vpack.c.bf16 %v331_v13, %v330_v12  ;;  %v324_v21 = vmax.f32 %v308_v14, 0.0 }
  0x22   : > { %v325_v22 = vmax.f32 %v309_v15, 0.0  ;;  %v332_v23 = vmax.f32 %v316_v18, 0.0 }
  0x23   : > { %902 = vmatpush3.bf16.msra.mxu0 %v950_v61  ;;  %v333_v24 = vmax.f32 %v317_v19, 0.0 }
  0x24   : > { %934 = vmatpush3.bf16.msra.mxu1 %v950_v61  ;;  %v337_v25 = vpack.c.bf16 %v325_v22, %v324_v21 }
  0x25   : > { %v341_v26 = vpack.c.bf16 %v333_v24, %v332_v23 }
  0x26   : > { %904 = vmatmul.mubr.bf16.vlgmr.msra.gmra.mrb[0].mxu0 %v335_v16 }
  0x27   : > { %912 = vmatmul.mubr.bf16.vlgmr.msra.gmra.mrb[0].mxu1 %v339_v17  ;;  %907 = vmatprep.mubr.bf16.mxu0 %v336_v5 }
  0x28   : > { %915 = vmatprep.mubr.bf16.mxu1 %v340_v20 }
  0x2e   : > { %908 = vmatmul.mubr.bf16.gmra.mrb[4].mxu0 %v337_v25 }
  0x2f   : > { %916 = vmatmul.mubr.bf16.gmra.mrb[4].mxu1 %v341_v26 }
  0xf9   : > { %v905_v27 = vpop.f32.mrb[0].mxu0 }
  0xfa   : > { %v913_v28 = vpop.f32.mrb[0].mxu1  ;;  %v440_v10 = vpop.f32.mrb[1].mxu0  ;;  %v606_v41 = vmul.f32 %v905_v27, %v905_v27 }
  0xfb   : > { %v472_v29 = vpop.f32.mrb[1].mxu1  ;;  %v906_v30 = vpop.f32.mrb[2].mxu0  ;;  %v604_v32 = vmul.f32 %v440_v10, %v440_v10  ;;  %v614_v15 = vmul.f32 %v913_v28, %v913_v28 }
  0xfc   : > { %v914_v31 = vpop.f32.mrb[2].mxu1  ;;  %v825_v33 = vpack.c.bf16 %v906_v30, %v905_v27  ;;  %v443_v34 = vpop.f32.mrb[3].mxu0  ;;  %v607_v44 = vmul.f32 %v906_v30, %v906_v30  ;;  %v612_v8 = vmul.f32 %v472_v29, %v472_v29 }
  0xfd   : > { %v845_v35 = vpack.c.bf16 %v914_v31, %v913_v28  ;;  %v475_v36 = vpop.f32.mrb[3].mxu1  ;;  %v820_v37 = vpack.c.bf16 %v443_v34, %v440_v10  ;;  %v583_v38 = vadd.f32 %v443_v34, %v440_v10  ;;  %v605_v39 = vmul.f32 %v443_v34, %v443_v34 }
  0xfe   : > { %v840_v40 = vpack.c.bf16 %v475_v36, %v472_v29  ;;  %864 = vst [vmem:[%s1089_s25 + $0x8] sm:$0xff] %v825_v33   ;;  %v613_v14 = vmul.f32 %v475_v36, %v475_v36  ;;  %v615_v18 = vmul.f32 %v914_v31, %v914_v31 }
  0xff   : > { %868 = vst [vmem:[%s1089_s25 + $0x28] sm:$0xff] %v845_v35   ;;  %821 = vst [vmem:[%s1089_s25] sm:$0xff] %v820_v37   ;;  %v584_v42 = vadd.f32 %v905_v27, %v583_v38  ;;  %v620_v43 = vadd.f32 %v605_v39, %v604_v32 }
 0x100   : > { %867 = vst [vmem:[%s1089_s25 + $0x20] sm:$0xff] %v840_v40  }
 0x101   : > { %v621_v45 = vadd.f32 %v620_v43, %v606_v41  ;;  %v909_v46 = vpop.f32.mrb[4].mxu0  ;;  %v585_v47 = vadd.f32 %v906_v30, %v584_v42 }
 0x102   : > { %v917_v48 = vpop.f32.mrb[4].mxu1  ;;  %v456_v49 = vpop.f32.mrb[5].mxu0  ;;  %v610_v1 = vmul.f32 %v909_v46, %v909_v46 }
 0x103   : > { %v488_v50 = vpop.f32.mrb[5].mxu1  ;;  %v586_v51 = vadd.f32 %v585_v47, %v456_v49  ;;  %v608_v52 = vmul.f32 %v456_v49, %v456_v49  ;;  %v622_v53 = vadd.f32 %v621_v45, %v607_v44  ;;  %v910_v54 = vpop.f32.mrb[6].mxu0  ;;  %v618_v26 = vmul.f32 %v917_v48, %v917_v48 }
 0x104   : > { %v918_v55 = vpop.f32.mrb[6].mxu1  ;;  %v835_v56 = vpack.c.bf16 %v910_v54, %v909_v46  ;;  %v459_v57 = vpop.f32.mrb[7].mxu0  ;;  %v611_v4 = vmul.f32 %v910_v54, %v910_v54  ;;  %v616_v20 = vmul.f32 %v488_v50, %v488_v50 }
 0x105   : > { %v855_v58 = vpack.c.bf16 %v918_v55, %v917_v48  ;;  %v491_v59 = vpop.f32.mrb[7].mxu1  ;;  %v623_v60 = vadd.f32 %v622_v53, %v608_v52  ;;  %v830_v61 = vpack.c.bf16 %v459_v57, %v456_v49  ;;  %v587_v62 = vadd.f32 %v586_v51, %v459_v57 }
 0x106   : > { %v609_v63 = vmul.f32 %v459_v57, %v459_v57  ;;  %866 = vst [vmem:[%s1089_s25 + $0x18] sm:$0xff] %v835_v56   ;;  %v850_v0 = vpack.c.bf16 %v491_v59, %v488_v50  ;;  %v617_v25 = vmul.f32 %v491_v59, %v491_v59 }
 0x107   : > { %870 = vst [vmem:[%s1089_s25 + $0x38] sm:$0xff] %v855_v58   ;;  %865 = vst [vmem:[%s1089_s25 + $0x10] sm:$0xff] %v830_v61   ;;  %v588_v2 = vadd.f32 %v909_v46, %v587_v62 }
 0x108   : > { %v624_v3 = vadd.f32 %v623_v60, %v609_v63  ;;  %869 = vst [vmem:[%s1089_s25 + $0x30] sm:$0xff] %v850_v0  }
 0x109   : > { %v589_v7 = vadd.f32 %v910_v54, %v588_v2 }
 0x10a   : > { %v625_v6 = vadd.f32 %v624_v3, %v610_v1 }
 0x10b   : > { %v590_v9 = vadd.f32 %v589_v7, %v472_v29  ;;  %v619_v29 = vmul.f32 %v918_v55, %v918_v55 }
 0x10c   : > { %v626_v11 = vadd.f32 %v625_v6, %v611_v4 }
 0x10d   : > { %v591_v13 = vadd.f32 %v590_v9, %v475_v36 }
 0x10e   : > { %v627_v12 = vadd.f32 %v626_v11, %v612_v8 }
 0x10f   : > { %v592_v16 = vadd.f32 %v913_v28, %v591_v13 }
 0x110   : > { %v628_v17 = vadd.f32 %v627_v12, %v613_v14 }
 0x111   : > { %v593_v5 = vadd.f32 %v914_v31, %v592_v16 }
 0x112   : > { %v629_v19 = vadd.f32 %v628_v17, %v614_v15 }
 0x113   : > { %v594_v21 = vadd.f32 %v593_v5, %v488_v50 }
 0x114   : > { %v630_v22 = vadd.f32 %v629_v19, %v615_v18 }
 0x115   : > { %v595_v24 = vadd.f32 %v594_v21, %v491_v59 }
 0x116   : > { %v631_v23 = vadd.f32 %v630_v22, %v616_v20 }
 0x117   : > { %v596_v27 = vadd.f32 %v917_v48, %v595_v24 }
 0x118   : > { %v632_v10 = vadd.f32 %v631_v23, %v617_v25 }
 0x119   : > { %v597_v30 = vadd.f32 %v918_v55, %v596_v27 }
 0x11a   : > { %v633_v32 = vadd.f32 %v632_v10, %v618_v26 }
 0x11b   : > { %v598_v33 = vrot.slane %v597_v30, 4 }
 0x11c   : > { %v634_v28 = vadd.f32 %v633_v32, %v619_v29 }
 0x11d   : > { %v599_v34 = vadd.f32 %v598_v33, %v597_v30 }
 0x11e   : > { %v635_v35 = vrot.slane %v634_v28, 4 }
 0x11f   : > { %v600_v36 = vrot.slane %v599_v34, 2 }
 0x120   : > { %v636_v31 = vadd.f32 %v635_v35, %v634_v28 }
 0x121   : > { %v601_v37 = vadd.f32 %v600_v36, %v599_v34 }
 0x122   : > { %v637_v38 = vrot.slane %v636_v31, 2 }
 0x123   : > { %v602_v39 = vrot.slane %v601_v37, 1 }
 0x124   : > { %v638_v40 = vadd.f32 %v637_v38, %v636_v31 }
 0x125   : > { %v603_v42 = vadd.f32 %v602_v39, %v601_v37 }
 0x126   : > { %v639_v41 = vrot.slane %v638_v40, 1 }
 0x128   : > { %v640_v43 = vadd.f32 %v639_v41, %v638_v40 }
 0x12a   : > { %v642_v44 = vsel %vm641_vm0, %v603_v42, %v640_v43 }
 0x12b   : > { %643 = vst [vmem:[%s238_s28] sm:$0x3] %v642_v44 }
 0x12c PF: > { %s16_s18 = sadd.s32 1, %s957_s18  }
 0x12d   : > { %p13_p5 = scmp.ge.s32.totalorder %s16_s18, 6  }
 0x12f   :  { %15 = sbr.rel (!%p13_p5) target bundleno = 1 (0x1), region = 78 }

// kernel: bottleneck_forward.7
= control target key start
LH: loop header
LB: loop body
LE: loop exit
PB: predicated region body
PF: predicated region fallthrough
CT: control target
= control target key end

     0   :  { %s528_s15 = smov 0   ;;  %s598_s0 = inlined_call_operand.vmem [shape: bf16[512,128], index: 0, kind: input, shape index: {}]   ;;  %s599_s1 = inlined_call_operand.vmem [shape: f32[1,128], index: 1, kind: input, shape index: {}]   ;;  %s600_s2 = inlined_call_operand.vmem [shape: f32[1,128], index: 2, kind: input, shape index: {}]   ;;  %s601_s3 = inlined_call_operand.vmem [shape: f32[512,128], index: 3, kind: input, shape index: {}, may-alias: {3,4}]   ;;  %s602_s4 = inlined_call_operand.vmem [shape: f32[512,128], index: 4, kind: output, shape index: {}, may-alias: {3,4}]  }
   0x1 LB: > { %s433_s16 = sadd.s32 4294967295, %s501_s15   ;;  %p437_p0 = scmp.ge.s32.totalorder %s501_s15, 1  ;;  %s501_s15 = sphi %s528_s15, %s14_s15  }
   0x2   : > { %p174_p1 = scmp.lt.s32.totalorder %s501_s15, 5 }
   0x4   : > { %p175_p2 = pnand %p437_p0, %p174_p1 }
   0x5   : > { %s438_s17 = sshll.u32 (!%p175_p2), %s433_s16, 4  ;;  %v444_v16 = vld [vmem:[%s599_s1] ss:$0 sm:$0xff] (!%p175_p2) }
   0x6   : > { %178 = sbr.rel (%p175_p2) target bundleno = 43 (0x2b), region = 36  ;;  %p206_p3 = scmp.lt.s32.totalorder (!%p175_p2), %s438_s17, 63  ;;  %v445_v33 = vld [vmem:[%s600_s2] ss:$0 sm:$0xff] (!%p175_p2) }
   0xd   : > { %s604_s17 = smov (!%p206_p3, %s438_s17), 63 }
   0xe   : > { %s439_s18 = sshll.u32 %s604_s17, 2  ;;  %s441_s22 = sshll.u32 %s604_s17, 3 }
   0xf   : > { %s209_s21 = scalar_lea.vmem %s598_s0, %s439_s18  ;;  %s551_s27 = scalar_lea.vmem %s601_s3, %s441_s22 }
  0x10   : > { %v449_v0 = vld [vmem:[%s209_s21] sm:$0xff]   ;;  %v480_v1 = vld [vmem:[%s209_s21 + $0x8] sm:$0xff]   ;;  %v481_v2 = vld [vmem:[%s209_s21 + $0x10] sm:$0xff]   ;;  %s577_s6 = scalar_lea.vmem %s602_s4, %s441_s22 }
  0x11   : > { %v450_v3 = vunpack.c.l.bf16 %v449_v0  ;;  %v451_v4 = vunpack.c.h.bf16 %v449_v0  ;;  %v454_v5 = vunpack.c.l.bf16 %v480_v1  ;;  %v455_v6 = vunpack.c.h.bf16 %v480_v1  ;;  %v482_v7 = vld [vmem:[%s209_s21 + $0x18] sm:$0xff]   ;;  %v483_v8 = vld [vmem:[%s209_s21 + $0x20] sm:$0xff]   ;;  %v484_v9 = vld [vmem:[%s209_s21 + $0x28] sm:$0xff]  }
  0x12   : > { %v458_v10 = vunpack.c.l.bf16 %v481_v2  ;;  %v459_v11 = vunpack.c.h.bf16 %v481_v2  ;;  %v462_v12 = vunpack.c.l.bf16 %v482_v7  ;;  %v463_v13 = vunpack.c.h.bf16 %v482_v7  ;;  %v485_v14 = vld [vmem:[%s209_s21 + $0x30] sm:$0xff]   ;;  %v486_v15 = vld [vmem:[%s209_s21 + $0x38] sm:$0xff]   ;;  %v301_v42 = vld [vmem:[%s551_s27] sm:$0xff] }
  0x13   : > { %v466_v17 = vunpack.c.l.bf16 %v483_v8  ;;  %v467_v18 = vunpack.c.h.bf16 %v483_v8  ;;  %v470_v19 = vunpack.c.l.bf16 %v484_v9  ;;  %v471_v20 = vunpack.c.h.bf16 %v484_v9  ;;  %v302_v47 = vld [vmem:[%s551_s27 + $0x8] sm:$0xff]  ;;  %v303_v48 = vld [vmem:[%s551_s27 + $0x10] sm:$0xff]  ;;  %v304_v49 = vld [vmem:[%s551_s27 + $0x18] sm:$0xff] }
  0x14   : > { %v474_v21 = vunpack.c.l.bf16 %v485_v14  ;;  %v475_v22 = vunpack.c.h.bf16 %v485_v14  ;;  %v478_v23 = vunpack.c.l.bf16 %v486_v15  ;;  %v479_v24 = vunpack.c.h.bf16 %v486_v15  ;;  %v305_v54 = vld [vmem:[%s551_s27 + $0x20] sm:$0xff]  ;;  %v306_v55 = vld [vmem:[%s551_s27 + $0x28] sm:$0xff]  ;;  %v307_v56 = vld [vmem:[%s551_s27 + $0x30] sm:$0xff] }
  0x15   : > { %v262_v25 = vmul.f32 %v450_v3, %v444_v16  ;;  %v263_v26 = vmul.f32 %v451_v4, %v444_v16  ;;  %v264_v27 = vmul.f32 %v454_v5, %v444_v16  ;;  %v265_v28 = vmul.f32 %v455_v6, %v444_v16  ;;  %v308_v61 = vld [vmem:[%s551_s27 + $0x38] sm:$0xff]  ;;  %v309_v62 = vld [vmem:[%s551_s27 + $0x40] sm:$0xff]  ;;  %v310_v63 = vld [vmem:[%s551_s27 + $0x48] sm:$0xff] }
  0x16   : > { %v266_v29 = vmul.f32 %v458_v10, %v444_v16  ;;  %v267_v30 = vmul.f32 %v459_v11, %v444_v16  ;;  %v268_v31 = vmul.f32 %v462_v12, %v444_v16  ;;  %v269_v32 = vmul.f32 %v463_v13, %v444_v16  ;;  %v311_v4 = vld [vmem:[%s551_s27 + $0x50] sm:$0xff]  ;;  %v312_v5 = vld [vmem:[%s551_s27 + $0x58] sm:$0xff]  ;;  %v313_v6 = vld [vmem:[%s551_s27 + $0x60] sm:$0xff] }
  0x17   : > { %v270_v34 = vmul.f32 %v466_v17, %v444_v16  ;;  %v271_v35 = vmul.f32 %v467_v18, %v444_v16  ;;  %v272_v36 = vmul.f32 %v470_v19, %v444_v16  ;;  %v273_v37 = vmul.f32 %v471_v20, %v444_v16  ;;  %v314_v7 = vld [vmem:[%s551_s27 + $0x68] sm:$0xff]  ;;  %v315_v8 = vld [vmem:[%s551_s27 + $0x70] sm:$0xff]  ;;  %v316_v9 = vld [vmem:[%s551_s27 + $0x78] sm:$0xff] }
  0x18   : > { %v274_v38 = vmul.f32 %v474_v21, %v444_v16  ;;  %v275_v39 = vmul.f32 %v475_v22, %v444_v16  ;;  %v276_v40 = vmul.f32 %v478_v23, %v444_v16  ;;  %v277_v41 = vmul.f32 %v479_v24, %v444_v16 }
  0x19   : > { %v285_v43 = vadd.f32 %v445_v33, %v262_v25  ;;  %v286_v44 = vadd.f32 %v445_v33, %v263_v26  ;;  %v287_v45 = vadd.f32 %v445_v33, %v264_v27  ;;  %v288_v46 = vadd.f32 %v445_v33, %v265_v28 }
  0x1a   : > { %v289_v50 = vadd.f32 %v445_v33, %v266_v29  ;;  %v290_v51 = vadd.f32 %v445_v33, %v267_v30  ;;  %v291_v52 = vadd.f32 %v445_v33, %v268_v31  ;;  %v292_v53 = vadd.f32 %v445_v33, %v269_v32 }
  0x1b   : > { %v293_v57 = vadd.f32 %v445_v33, %v270_v34  ;;  %v294_v58 = vadd.f32 %v445_v33, %v271_v35  ;;  %v295_v59 = vadd.f32 %v445_v33, %v272_v36  ;;  %v296_v60 = vadd.f32 %v445_v33, %v273_v37 }
  0x1c   : > { %v297_v0 = vadd.f32 %v445_v33, %v274_v38  ;;  %v298_v1 = vadd.f32 %v445_v33, %v275_v39  ;;  %v299_v2 = vadd.f32 %v445_v33, %v276_v40  ;;  %v300_v3 = vadd.f32 %v445_v33, %v277_v41 }
  0x1d   : > { %v317_v10 = vadd.f32 %v301_v42, %v285_v43  ;;  %v318_v11 = vadd.f32 %v302_v47, %v286_v44  ;;  %v319_v12 = vadd.f32 %v303_v48, %v287_v45  ;;  %v320_v13 = vadd.f32 %v304_v49, %v288_v46 }
  0x1e   : > { %v321_v14 = vadd.f32 %v305_v54, %v289_v50  ;;  %v322_v15 = vadd.f32 %v306_v55, %v290_v51  ;;  %v323_v16 = vadd.f32 %v307_v56, %v291_v52  ;;  %v324_v17 = vadd.f32 %v308_v61, %v292_v53 }
  0x1f   : > { %v325_v18 = vadd.f32 %v309_v62, %v293_v57  ;;  %v326_v19 = vadd.f32 %v310_v63, %v294_v58  ;;  %v327_v20 = vadd.f32 %v311_v4, %v295_v59  ;;  %v328_v21 = vadd.f32 %v312_v5, %v296_v60 }
  0x20   : > { %v329_v22 = vadd.f32 %v313_v6, %v297_v0  ;;  %v330_v23 = vadd.f32 %v314_v7, %v298_v1  ;;  %v331_v24 = vadd.f32 %v315_v8, %v299_v2  ;;  %v332_v25 = vadd.f32 %v316_v9, %v300_v3 }
  0x21   : > { %v333_v26 = vmax.f32 %v317_v10, 0.0  ;;  %v334_v27 = vmax.f32 %v318_v11, 0.0  ;;  %v335_v28 = vmax.f32 %v319_v12, 0.0  ;;  %v336_v29 = vmax.f32 %v320_v13, 0.0 }
  0x22   : > { %v337_v30 = vmax.f32 %v321_v14, 0.0  ;;  %v338_v31 = vmax.f32 %v322_v15, 0.0  ;;  %v339_v32 = vmax.f32 %v323_v16, 0.0  ;;  %v340_v33 = vmax.f32 %v324_v17, 0.0 }
  0x23   : > { %v341_v34 = vmax.f32 %v325_v18, 0.0  ;;  %v342_v35 = vmax.f32 %v326_v19, 0.0  ;;  %v343_v36 = vmax.f32 %v327_v20, 0.0  ;;  %v344_v37 = vmax.f32 %v328_v21, 0.0  ;;  %349 = vst [vmem:[%s577_s6] sm:$0xff] %v333_v26  ;;  %350 = vst [vmem:[%s577_s6 + $0x8] sm:$0xff] %v334_v27 }
  0x24   : > { %351 = vst [vmem:[%s577_s6 + $0x10] sm:$0xff] %v335_v28  ;;  %352 = vst [vmem:[%s577_s6 + $0x18] sm:$0xff] %v336_v29  ;;  %v345_v38 = vmax.f32 %v329_v22, 0.0  ;;  %v346_v39 = vmax.f32 %v330_v23, 0.0  ;;  %v347_v40 = vmax.f32 %v331_v24, 0.0  ;;  %v348_v41 = vmax.f32 %v332_v25, 0.0 }
  0x25   : > { %353 = vst [vmem:[%s577_s6 + $0x20] sm:$0xff] %v337_v30  ;;  %354 = vst [vmem:[%s577_s6 + $0x28] sm:$0xff] %v338_v31 }
  0x26   : > { %355 = vst [vmem:[%s577_s6 + $0x30] sm:$0xff] %v339_v32  ;;  %356 = vst [vmem:[%s577_s6 + $0x38] sm:$0xff] %v340_v33 }
  0x27   : > { %357 = vst [vmem:[%s577_s6 + $0x40] sm:$0xff] %v341_v34  ;;  %358 = vst [vmem:[%s577_s6 + $0x48] sm:$0xff] %v342_v35 }
  0x28   : > { %359 = vst [vmem:[%s577_s6 + $0x50] sm:$0xff] %v343_v36  ;;  %360 = vst [vmem:[%s577_s6 + $0x58] sm:$0xff] %v344_v37 }
  0x29   : > { %361 = vst [vmem:[%s577_s6 + $0x60] sm:$0xff] %v345_v38  ;;  %362 = vst [vmem:[%s577_s6 + $0x68] sm:$0xff] %v346_v39 }
  0x2a   : > { %363 = vst [vmem:[%s577_s6 + $0x70] sm:$0xff] %v347_v40  ;;  %364 = vst [vmem:[%s577_s6 + $0x78] sm:$0xff] %v348_v41 }
  0x2b PF: > { %s14_s15 = sadd.s32 1, %s501_s15  }
  0x2c   : > { %p11_p4 = scmp.ge.s32.totalorder %s14_s15, 6  }
  0x2e   :  { %13 = sbr.rel (!%p11_p4) target bundleno = 1 (0x1), region = 69 }

// kernel: bottleneck_forward.5
= control target key start
LH: loop header
LB: loop body
LE: loop exit
PB: predicated region body
PF: predicated region fallthrough
CT: control target
= control target key end

     0   :  { %s5007_s24 = smov 0   ;;  %s5009_s25 = smov 0   ;;  %s6150_s0 = inlined_call_operand.vmem [shape: bf16[2,16,16,128], index: 0, kind: input, shape index: {}, may-alias: {0,1,2}]   ;;  %s6151_s1 = inlined_call_operand.vmem [shape: bf16[2,256,128], index: 1, kind: input, shape index: {}, may-alias: {0,1,2}]   ;;  %s6152_s2 = inlined_call_operand.vmem [shape: bf16[2,16,16,128], index: 2, kind: input, shape index: {}, may-alias: {0,1,2}]   ;;  %s6153_s3 = inlined_call_operand.vmem [shape: f32[1,128], index: 3, kind: input, shape index: {}]   ;;  %s6154_s4 = inlined_call_operand.vmem [shape: f32[1,128], index: 4, kind: input, shape index: {}]   ;;  %s6155_s5 = inlined_call_operand.vmem [shape: bf16[9,128,128], index: 5, kind: input, shape index: {}]   ;;  %s6156_s6 = inlined_call_operand.vmem [shape: bf16[2,256,128], index: 6, kind: output, shape index: {0}]   ;;  %s6157_s7 = inlined_call_operand.vmem [shape: f32[2,2,2,128], index: 7, kind: output, shape index: {1}]  }
   0x1   :  { %s5011_s26 = smov 0   ;;  %s5013_s27 = smov 0  }
   0x2   :  { %s5015_s28 = smov 0  }
   0x3 LB: > { %s27_s29 = sadd.s32 1, %s4953_s26  ;;  %s30_s30 = sadd.s32 1, %s4957_s27  ;;  %s4961_s28 = sphi %s5015_s28, %s18_s28   ;;  %s4957_s27 = sphi %s5013_s27, %s6210_s27   ;;  %s4953_s26 = sphi %s5011_s26, %s6209_s26   ;;  %s4949_s25 = sphi %s5009_s25, %s6208_s25   ;;  %s4945_s24 = sphi %s5007_s24, %s6207_s24  }
   0x4   : > { %p28_p0 = scmp.ge.s32.totalorder %s27_s29, 2  ;;  %p3849_p1 = scmp.ge.s32.totalorder %s4961_s28, 1 }
   0x5   : > { %p327_p2 = scmp.lt.s32.totalorder %s4961_s28, 5 }
   0x6   : > { %s6212_s29 = smov (%p28_p0, %s27_s29), 0  ;;  %s6214_s30 = smov (!%p28_p0, %s30_s30), %s4957_s27 }
   0x7   : > { %p328_p3 = pnand %p3849_p1, %p327_p2  ;;  %p32_p4 = scmp.ge.s32.totalorder %s6214_s30, 2 }
   0x9   : > { %s6216_s30 = smov (%p32_p4, %s6214_s30), 0  ;;  %331 = sbr.rel (%p328_p3) target bundleno = 516 (0x204), region = 44 }
  0x10   : > { %s6158_s8 = sshll.u32 %s4945_s24, 3  ;;  %p405_p5 = scmp.lt.s32.totalorder %s4949_s25, 1  ;;  %v5062_v0 = vld [vmem:[%s6153_s3] ss:$0 sm:$0xff]  ;;  %vm592_vm0 = vcmask 1043456  }
  0x11   : > { %s3851_s9 = sadd.s32 4294967295, %s6158_s8  ;;  %s3860_s10 = sshll.u32 %s4945_s24, 4  ;;  %v5077_v9 = vld [vmem:[%s6154_s4] ss:$0 sm:$0xff] }
  0x12   : > { %p403_p6 = scmp.gt.s32.totalorder %s3851_s9, 0  ;;  %p3852_p7 = scmp.lt.s32.totalorder %s3851_s9, 15 }
  0x13   : > { %s6218_s25 = smov (!%p405_p5, %s4949_s25), 1  ;;  %p421_p8 = scmp.lt.s32.totalorder %s3860_s10, 31 }
  0x14   : > { %s6220_s9 = smov (!%p403_p6, %s3851_s9), 0  ;;  %s5046_s11 = sshll.u32 %s6218_s25, 5 }
  0x15   : > { %s6222_s9 = smov (!%p3852_p7, %s6220_s9), 15  ;;  %s6224_s10 = smov (!%p421_p8, %s3860_s10), 31 }
  0x16   : > { %s3857_s12 = sshll.u32 %s6222_s9, 1  ;;  %p457_p9 = scmp.lt.s32.totalorder %s4945_s24, 1 }
  0x17   : > { %s411_s13 = sadd.s32 %s5046_s11, %s3857_s12  ;;  %s424_s14 = sadd.s32 %s5046_s11, %s6224_s10 }
  0x18   : > { %s3859_s15 = sshll.u32 %s411_s13, 2  ;;  %s3862_s16 = sshll.u32 %s424_s14, 2 }
  0x19   : > { %s413_s19 = scalar_lea.vmem %s6150_s0, %s3859_s15  ;;  %s5057_s22 = scalar_lea.vmem %s6151_s1, %s3862_s16 }
  0x1a   : > { %s5067_s12 = scalar_lea.vmem %s6156_s6, %s3862_s16  ;;  %s3873_s13 = sshll.u32 %s6218_s25, 1  ;;  %v4132_v1 = vld [vmem:[%s413_s19] sm:$0xff]   ;;  %v4211_v3 = vld [vmem:[%s5057_s22 + $0x8] sm:$0xff]   ;;  %v4212_v8 = vld [vmem:[%s5057_s22 + $0x10] sm:$0xff]  }
  0x1b   : > { %v4136_v2 = vld [vmem:[%s5057_s22] sm:$0xff]   ;;  %s458_s14 = scalar_select %p457_p9, %s4945_s24, 1  ;;  %v4133_v4 = vunpack.c.l.bf16 %v4132_v1  ;;  %v4134_v5 = vunpack.c.h.bf16 %v4132_v1  ;;  %v4141_v10 = vunpack.c.l.bf16 %v4211_v3  ;;  %v4142_v11 = vunpack.c.h.bf16 %v4211_v3  ;;  %v4213_v30 = vld [vmem:[%s5057_s22 + $0x18] sm:$0xff]   ;;  %v4215_v48 = vld [vmem:[%s5057_s22 + $0x28] sm:$0xff]  }
  0x1c   : > { %v4137_v6 = vunpack.c.l.bf16 %v4136_v2  ;;  %v4138_v7 = vunpack.c.h.bf16 %v4136_v2  ;;  %v4145_v12 = vunpack.c.l.bf16 %v4212_v8  ;;  %v4146_v13 = vunpack.c.h.bf16 %v4212_v8  ;;  %s6168_s16 = sshll.u32 %s4945_s24, 3  ;;  %v4214_v35 = vld [vmem:[%s5057_s22 + $0x20] sm:$0xff]   ;;  %v4216_v61 = vld [vmem:[%s5057_s22 + $0x30] sm:$0xff]   ;;  %v4217_v3 = vld [vmem:[%s5057_s22 + $0x38] sm:$0xff]   ;;  %p3877_p11 = scmp.ne.s32.totalorder %s4945_s24, 0 }
  0x1d   : > { %s5081_s25 = sadd.s32 8, %s6168_s16  ;;  %s460_s17 = sadd.s32 %s3873_s13, %s458_s14  ;;  %v478_v14 = vmul.f32 %v4133_v4, %v5062_v0  ;;  %v479_v15 = vmul.f32 %v4134_v5, %v5062_v0  ;;  %v530_v18 = vmul.f32 %v4141_v10, %v5062_v0  ;;  %v531_v19 = vmul.f32 %v4142_v11, %v5062_v0 }
  0x1e   : > { %v528_v16 = vmul.f32 %v4137_v6, %v5062_v0  ;;  %v529_v17 = vmul.f32 %v4138_v7, %v5062_v0  ;;  %p430_p10 = scmp.lt.s32.totalorder %s5081_s25, 15  ;;  %s3874_s18 = sshll.u32 %s460_s17, 1  ;;  %v532_v20 = vmul.f32 %v4145_v12, %v5062_v0  ;;  %v533_v21 = vmul.f32 %v4146_v13, %v5062_v0 }
  0x1f   : > { %s5095_s21 = scalar_lea.vmem %s6157_s7, %s3874_s18  ;;  %v486_v22 = vadd.f32 %v5077_v9, %v478_v14  ;;  %v487_v23 = vadd.f32 %v5077_v9, %v479_v15  ;;  %v546_v26 = vadd.f32 %v5077_v9, %v530_v18  ;;  %v547_v27 = vadd.f32 %v5077_v9, %v531_v19 }
  0x20   : > { %v544_v24 = vadd.f32 %v5077_v9, %v528_v16  ;;  %v545_v25 = vadd.f32 %v5077_v9, %v529_v17  ;;  %v548_v28 = vadd.f32 %v5077_v9, %v532_v20  ;;  %v549_v29 = vadd.f32 %v5077_v9, %v533_v21  ;;  %s431_s23 = scalar_select %p430_p10, %s5081_s25, 15 }
  0x21   : > { %v488_v31 = vmax.f32 %v486_v22, 0.0  ;;  %v489_v32 = vmax.f32 %v487_v23, 0.0  ;;  %v562_v36 = vmax.f32 %v546_v26, 0.0  ;;  %v563_v37 = vmax.f32 %v547_v27, 0.0 }
  0x22   : > { %v560_v33 = vmax.f32 %v544_v24, 0.0  ;;  %v561_v34 = vmax.f32 %v545_v25, 0.0  ;;  %v564_v38 = vmax.f32 %v548_v28, 0.0  ;;  %v565_v39 = vmax.f32 %v549_v29, 0.0  ;;  %s6226_s23 = smov (!%p430_p10, %s431_s23), 15 }
  0x23   : > { %v490_v40 = vpack.c.bf16 %v489_v32, %v488_v31  ;;  %v4149_v42 = vunpack.c.l.bf16 %v4213_v30  ;;  %v4150_v43 = vunpack.c.h.bf16 %v4213_v30  ;;  %v577_v44 = vpack.c.bf16 %v563_v37, %v562_v36  ;;  %s3867_s9 = sshll.u32 %s6226_s23, 1 }
  0x24   : > { %v576_v41 = vpack.c.bf16 %v561_v34, %v560_v33  ;;  %v578_v45 = vpack.c.bf16 %v565_v39, %v564_v38  ;;  %v4153_v46 = vunpack.c.l.bf16 %v4214_v35  ;;  %v4154_v47 = vunpack.c.h.bf16 %v4214_v35  ;;  %s438_s10 = sadd.s32 %s3867_s9, %s5046_s11 }
  0x25   : > { %v492_v49 = vrot.slane %v490_v40, 4  ;;  %v534_v51 = vmul.f32 %v4149_v42, %v5062_v0  ;;  %v535_v52 = vmul.f32 %v4150_v43, %v5062_v0  ;;  %v594_v53 = vrot.slane %v577_v44, 4  ;;  %s3869_s13 = sshll.u32 %s438_s10, 2 }
  0x26   : > { %v593_v50 = vrot.slane %v576_v41, 4  ;;  %v596_v54 = vrot.slane %v578_v45, 4  ;;  %v536_v55 = vmul.f32 %v4153_v46, %v5062_v0  ;;  %v537_v56 = vmul.f32 %v4154_v47, %v5062_v0  ;;  %s440_s8 = scalar_lea.vmem %s6152_s2, %s3869_s13 }
  0x27   : > { %494 = vst [vmem:[#allocation2 + $0x8] ss:$-4 sps:$4 sm:$0xff] %v492_v49   ;;  %v550_v57 = vadd.f32 %v5077_v9, %v534_v51  ;;  %v551_v58 = vadd.f32 %v5077_v9, %v535_v52  ;;  %v4157_v59 = vunpack.c.l.bf16 %v4215_v48  ;;  %v4158_v60 = vunpack.c.h.bf16 %v4215_v48  ;;  %v4168_v21 = vld [vmem:[%s440_s8] sm:$0xff]  }
  0x28   : > { %617 = vst [vmem:[#allocation2 + $0x8] sm:$0xf0] %v593_v50  ;;  %v595_v62 = vsel %vm592_vm0, %v593_v50, %v594_v53  ;;  %v597_v63 = vsel %vm592_vm0, %v594_v53, %v596_v54  ;;  %v552_v1 = vadd.f32 %v5077_v9, %v536_v55  ;;  %v553_v2 = vadd.f32 %v5077_v9, %v537_v56 }
  0x29   : > { %618 = vst [vmem:[#allocation2 + $0x10] sm:$0xff] %v595_v62  ;;  %619 = vst [vmem:[#allocation2 + $0x18] sm:$0xff] %v597_v63  ;;  %v566_v4 = vmax.f32 %v550_v57, 0.0  ;;  %v567_v5 = vmax.f32 %v551_v58, 0.0  ;;  %v538_v6 = vmul.f32 %v4157_v59, %v5062_v0  ;;  %v539_v7 = vmul.f32 %v4158_v60, %v5062_v0 }
  0x2a   : > { %v568_v8 = vmax.f32 %v552_v1, 0.0  ;;  %v569_v10 = vmax.f32 %v553_v2, 0.0  ;;  %v4161_v11 = vunpack.c.l.bf16 %v4216_v61  ;;  %v4162_v12 = vunpack.c.h.bf16 %v4216_v61 }
  0x2b   : > { %v579_v13 = vpack.c.bf16 %v567_v5, %v566_v4  ;;  %v554_v14 = vadd.f32 %v5077_v9, %v538_v6  ;;  %v555_v15 = vadd.f32 %v5077_v9, %v539_v7  ;;  %v4165_v16 = vunpack.c.l.bf16 %v4217_v3 }
  0x2c   : > { %v580_v17 = vpack.c.bf16 %v569_v10, %v568_v8  ;;  %v540_v18 = vmul.f32 %v4161_v11, %v5062_v0  ;;  %v541_v19 = vmul.f32 %v4162_v12, %v5062_v0  ;;  %v4166_v20 = vunpack.c.h.bf16 %v4217_v3 }
  0x2d   : > { %v598_v22 = vrot.slane %v579_v13, 4  ;;  %v570_v23 = vmax.f32 %v554_v14, 0.0  ;;  %v571_v24 = vmax.f32 %v555_v15, 0.0  ;;  %v542_v25 = vmul.f32 %v4165_v16, %v5062_v0 }
  0x2e   : > { %v600_v26 = vrot.slane %v580_v17, 4  ;;  %v556_v27 = vadd.f32 %v5077_v9, %v540_v18  ;;  %v557_v28 = vadd.f32 %v5077_v9, %v541_v19  ;;  %v543_v29 = vmul.f32 %v4166_v20, %v5062_v0 }
  0x2f   : > { %v599_v30 = vsel %vm592_vm0, %v596_v54, %v598_v22  ;;  %v581_v31 = vpack.c.bf16 %v571_v24, %v570_v23  ;;  %v558_v32 = vadd.f32 %v5077_v9, %v542_v25  ;;  %v4169_v33 = vunpack.c.l.bf16 %v4168_v21 }
  0x30   : > { %620 = vst [vmem:[#allocation2 + $0x20] sm:$0xff] %v599_v30  ;;  %v601_v34 = vsel %vm592_vm0, %v598_v22, %v600_v26  ;;  %v572_v35 = vmax.f32 %v556_v27, 0.0  ;;  %v573_v36 = vmax.f32 %v557_v28, 0.0  ;;  %v559_v37 = vadd.f32 %v5077_v9, %v543_v29 }
  0x31   : > { %621 = vst [vmem:[#allocation2 + $0x28] sm:$0xff] %v601_v34  ;;  %v602_v38 = vrot.slane %v581_v31, 4  ;;  %v574_v39 = vmax.f32 %v558_v32, 0.0  ;;  %v4170_v40 = vunpack.c.h.bf16 %v4168_v21  ;;  %v630_v41 = vmul.f32 %v4169_v33, %v5062_v0 }
  0x32   : > { %v582_v42 = vpack.c.bf16 %v573_v36, %v572_v35  ;;  %v575_v43 = vmax.f32 %v559_v37, 0.0 }
  0x33   : > { %v603_v44 = vsel %vm592_vm0, %v600_v26, %v602_v38  ;;  %v631_v45 = vmul.f32 %v4170_v40, %v5062_v0  ;;  %v632_v46 = vadd.f32 %v5077_v9, %v630_v41  ;;  %v4963_v0 = vmov (!%p3877_p11), 0  }
  0x34   : > { %622 = vst [vmem:[#allocation2 + $0x30] sm:$0xff] %v603_v44  ;;  %v604_v47 = vrot.slane %v582_v42, 4  ;;  %v583_v48 = vpack.c.bf16 %v575_v43, %v574_v39  ;;  %646 = vst [vmem:[#allocation2] sm:$0xf0] (!%p3877_p11), %v4963_v0 }
  0x35   : > { %v633_v49 = vadd.f32 %v5077_v9, %v631_v45  ;;  %v634_v50 = vmax.f32 %v632_v46, 0.0  ;;  %647 = vst [vmem:[#allocation2 + $0x8] sm:$0xf] (!%p3877_p11), %v4963_v0 }
  0x36   : > { %v605_v51 = vsel %vm592_vm0, %v602_v38, %v604_v47  ;;  %v606_v52 = vrot.slane %v583_v48, 4 }
  0x37   : > { %623 = vst [vmem:[#allocation2 + $0x38] sm:$0xff] %v605_v51  ;;  %v635_v53 = vmax.f32 %v633_v49, 0.0  ;;  %645 = sbr.rel (%p3877_p11) target bundleno = 62 (0x3e), region = 48 }
  0x38   : > { %v607_v54 = vsel %vm592_vm0, %v604_v47, %v606_v52  ;;  %625 = vst [vmem:[#allocation2 + $0x48] sm:$0xf] %v606_v52 }
  0x39   : > { %624 = vst [vmem:[#allocation2 + $0x40] sm:$0xff] %v607_v54  ;;  %v636_v55 = vpack.c.bf16 %v635_v53, %v634_v50 }
  0x3b   : > { %v638_v56 = vrot.slane %v636_v55, 4 }
  0x3d   : > { %640 = vst [vmem:[#allocation2 + $0x50] ss:$-4 sps:$4 sm:$0xff] %v638_v56  }
  0x3e PF: > { %p3878_p12 = scmp.ne.s32.totalorder %s4945_s24, 1 }
  0x3f   : > { %v4964_v9 = vmov (!%p3878_p12), 0  }
  0x40   : > { %651 = sbr.rel (%p3878_p12) target bundleno = 71 (0x47), region = 52  ;;  %652 = vst [vmem:[#allocation2 + $0x48] sm:$0xf0] (!%p3878_p12), %v4964_v9  ;;  %653 = vst [vmem:[#allocation2 + $0x50] sm:$0xf] (!%p3878_p12), %v4964_v9 }
  0x47 PF: > { %v4845_v57 = vld [vmem:[%s6155_s5 + $0x40] sm:$0xff]   ;;  %v654_v58 = vlaneseq  ;;  %v4847_v60 = vld [vmem:[%s6155_s5 + $0x48] sm:$0xff]   ;;  %v4849_v63 = vld [vmem:[%s6155_s5 + $0x50] sm:$0xff]   ;;  %vm4965_vm6 = vmmov 0   ;;  %v4966_v24 = vmov 0  }
  0x48   : > { %v4846_v59 = vld [vmem:[%s6155_s5 + $0x100] sm:$0xff]   ;;  %4369 = vmatprep.subr.bf16.mxu1 %v4845_v57  ;;  %v4848_v61 = vld [vmem:[%s6155_s5 + $0x108] sm:$0xff]   ;;  %v4850_v1 = vld [vmem:[%s6155_s5 + $0x110] sm:$0xff]   ;;  %vm992_vm8 = vsmask.f32 3328 }
  0x49   : > { %4497 = vmatprep.subr.bf16.mxu0 %v4846_v59  ;;  %4370 = vmatpush3.bf16.msra.mxu1 %v4845_v57  ;;  %v5164_v62 = vshrl.u32 %v654_v58, 7  ;;  %v4851_v4 = vld [vmem:[%s6155_s5 + $0x58] sm:$0xff]   ;;  %v4853_v8 = vld [vmem:[%s6155_s5 + $0x60] sm:$0xff]   ;;  %v4855_v15 = vld [vmem:[%s6155_s5 + $0x68] sm:$0xff]   ;;  %vm1295_vm15 = vsmask.f32 4352 }
  0x4a   : > { %4498 = vmatpush3.bf16.msra.mxu0 %v4846_v59  ;;  %4371 = vmatprep.subr.bf16.mxu1 %v4847_v60  ;;  %v4852_v6 = vld [vmem:[%s6155_s5 + $0x118] sm:$0xff]   ;;  %v4854_v13 = vld [vmem:[%s6155_s5 + $0x120] sm:$0xff]   ;;  %v4856_v16 = vld [vmem:[%s6155_s5 + $0x128] sm:$0xff]  }
  0x4b   : > { %4499 = vmatprep.subr.bf16.mxu0 %v4848_v61  ;;  %v656_v2 = vadd.s32 8, %v5164_v62  ;;  %v657_v3 = vadd.s32 16, %v5164_v62  ;;  %v658_v5 = vadd.s32 24, %v5164_v62  ;;  %v675_v7 = vand.u32 15, %v5164_v62  ;;  %v5211_v21 = vld [vmem:[#allocation2 + $0x8] sm:$0xff]  ;;  %vm937_vm7 = vmpackc.low %vm4965_vm6, %vm4965_vm6  ;;  %v5222_v28 = vld [vmem:[#allocation2 + $0x10] sm:$0xff] }
  0x4c   : > { %v659_v18 = vadd.s32 32, %v5164_v62  ;;  %v5216_v22 = vld [vmem:[#allocation2] sm:$0xf0]  ;;  %v660_v23 = vadd.s32 40, %v5164_v62  ;;  %v1126_v27 = vrot.slane %v5211_v21, 4  ;;  %v5228_v29 = vsel %vm937_vm7, 65537, %v4966_v24 }
  0x4d   : > { %4372 = vmatpush3.bf16.msra.mxu1 %v4847_v60  ;;  %v689_v10 = vand.u32 15, %v657_v3  ;;  %v682_v11 = vand.u32 15, %v656_v2  ;;  %v696_v12 = vand.u32 15, %v658_v5  ;;  %vm5188_vm1 = vcmp.eq.s32.totalorder %v675_v7, 0  ;;  %v5230_v30 = vld [vmem:[#allocation2 + $0x8] sm:$0xf0] }
  0x4e   : > { %4500 = vmatpush3.bf16.msra.mxu0 %v4848_v61  ;;  %4373 = vmatprep.subr.bf16.mxu1 %v4849_v63  ;;  %vm936_vm5 = vmpackc.low %vm5188_vm1, %vm5188_vm1  ;;  %v1125_v26 = vrot.slane %v5216_v22, 4  ;;  %v5233_v31 = vrot.slane %v5222_v28, 4  ;;  %v703_v32 = vand.u32 15, %v659_v18  ;;  %v710_v33 = vand.u32 15, %v660_v23  ;;  %v4857_v38 = vld [vmem:[%s6155_s5 + $0x70] sm:$0xff]   ;;  %v4859_v48 = vld [vmem:[%s6155_s5 + $0x78] sm:$0xff]  }
  0x4f   : > { %4501 = vmatprep.subr.bf16.mxu0 %v4850_v1  ;;  %vm5198_vm2 = vcmp.eq.s32.totalorder %v689_v10, 0  ;;  %vm5203_vm3 = vcmp.eq.s32.totalorder %v682_v11, 15  ;;  %vm5207_vm4 = vcmp.eq.s32.totalorder %v696_v12, 15  ;;  %v952_v25 = vsel %vm936_vm5, 65537, %v4966_v24  ;;  %v4858_v43 = vld [vmem:[%s6155_s5 + $0x130] sm:$0xff]   ;;  %v4860_v53 = vld [vmem:[%s6155_s5 + $0x138] sm:$0xff]  }
  0x50   : > { %vm938_vm9 = vmpackc.low %vm5198_vm2, %vm5198_vm2  ;;  %v3879_v35 = vcombine.low %v952_v25, %v5228_v29  ;;  %v1127_v36 = vsel %vm592_vm0, %v1125_v26, %v1126_v27  ;;  %v2284_v37 = vrot.slane %v5230_v30, 4  ;;  %vm5252_vm12 = vcmp.eq.s32.totalorder %v703_v32, 0  ;;  %v5285_v2 = vld [vmem:[#allocation2 + $0x18] sm:$0xff]  ;;  %v4861_v11 = vld [vmem:[%s6155_s5] sm:$0xff]  }
  0x51   : > { %4374 = vmatpush3.bf16.msra.mxu1 %v4849_v63  ;;  %v954_v34 = vsel %vm938_vm9, 65537, %v4966_v24  ;;  %vm1563_vm10 = vmpackc.low %vm5203_vm3, %vm5203_vm3  ;;  %vm5256_vm13 = vcmp.eq.s32.totalorder %v710_v33, 15  ;;  %4385 = vmatprep.mubr.bf16.mxu1 %v1127_v36  ;;  %v2287_v12 = vrot.slane %v5285_v2, 4  ;;  %v1129_v19 = vsel %vm592_vm0, %v1126_v27, %v5233_v31  ;;  %v4865_v41 = vld [vmem:[%s6155_s5 + $0x10] sm:$0xff]  }
  0x52   : > { %4502 = vmatpush3.bf16.msra.mxu0 %v4850_v1  ;;  %4375 = vmatprep.subr.bf16.mxu1 %v4851_v4  ;;  %v3880_v39 = vcombine.low %v954_v34, %v5228_v29  ;;  %vm1565_vm11 = vmpackc.low %vm5207_vm4, %vm5207_vm4  ;;  %v1579_v40 = vsel %vm1563_vm10, 65537, %v4966_v24  ;;  %v994_v44 = vshrl.u32 %v3879_v35, 16  ;;  %v997_v45 = vshll.u32 %v3879_v35, 16  ;;  %v4866_v42 = vld [vmem:[%s6155_s5 + $0x150] sm:$0xff]  }
  0x53   : > { %4503 = vmatprep.subr.bf16.mxu0 %v4852_v6  ;;  %v1581_v46 = vsel %vm1565_vm11, 65537, %v4966_v24  ;;  %v3919_v47 = vcombine.low %v5228_v29, %v1579_v40  ;;  %v2286_v52 = vsel %vm592_vm0, %v2284_v37, %v5233_v31  ;;  %vm940_vm14 = vmpackc.low %vm5252_vm12, %vm5252_vm12  ;;  %v2288_v23 = vsel %vm592_vm0, %v5233_v31, %v2287_v12  ;;  %v4864_v31 = vld [vmem:[%s6155_s5 + $0x148] sm:$0xff]   ;;  %v5347_v37 = vld [vmem:[#allocation2 + $0x20] sm:$0xff] }
  0x54   : > { %v1002_v49 = vshrl.u32 %v3880_v39, 16  ;;  %v1005_v50 = vshll.u32 %v3880_v39, 16  ;;  %v3920_v51 = vcombine.low %v5228_v29, %v1581_v46  ;;  %v996_v54 = vrot.slane %v994_v44, 4  ;;  %4513 = vmatprep.mubr.bf16.mxu0 %v2286_v52  ;;  %vm1567_vm1 = vmpackc.low %vm5256_vm13, %vm5256_vm13 }
  0x55   : > { %4376 = vmatpush3.bf16.msra.mxu1 %v4851_v4  ;;  %v999_v55 = vrot.slane %v997_v45, 5  ;;  %v1619_v56 = vshrl.u32 %v3919_v47, 16  ;;  %v1622_v0 = vshll.u32 %v3919_v47, 16  ;;  %v956_v1 = vsel %vm940_vm14, 65537, %v4966_v24 }
  0x56   : > { %4504 = vmatpush3.bf16.msra.mxu0 %v4852_v6  ;;  %4377 = vmatprep.subr.bf16.mxu1 %v4853_v8  ;;  %v1004_v9 = vrot.slane %v1002_v49, 4  ;;  %v1007_v57 = vrot.slane %v1005_v50, 5  ;;  %v1627_v58 = vshrl.u32 %v3920_v51, 16  ;;  %v1630_v59 = vshll.u32 %v3920_v51, 16 }
  0x57   : > { %4505 = vmatprep.subr.bf16.mxu0 %v4854_v13  ;;  %v5277_v60 = vor.u32 %v999_v55, %v996_v54  ;;  %v1621_v61 = vrot.slane %v1619_v56, 3  ;;  %v1624_v63 = vrot.slane %v1622_v0, 4  ;;  %v3881_v7 = vcombine.low %v956_v1, %v5228_v29 }
  0x58   : > { %v5287_v3 = vor.u32 %v1007_v57, %v1004_v9  ;;  %v1629_v4 = vrot.slane %v1627_v58, 3  ;;  %v1632_v5 = vrot.slane %v1630_v59, 4  ;;  %v661_v50 = vadd.s32 48, %v5164_v62 }
  0x59   : > { %4378 = vmatpush3.bf16.msra.mxu1 %v4853_v8  ;;  %v5289_v6 = vor.u32 %v1624_v63, %v1621_v61  ;;  %v1011_v18 = vshrl.u32 %v3881_v7, 16  ;;  %v1014_v27 = vshll.u32 %v3881_v7, 16  ;;  %v662_v55 = vadd.s32 56, %v5164_v62  ;;  %v4867_v61 = vld [vmem:[%s6155_s5 + $0x18] sm:$0xff]  }
  0x5a   : > { %4506 = vmatpush3.bf16.msra.mxu0 %v4854_v13  ;;  %4379 = vmatprep.subr.bf16.mxu1 %v4855_v15  ;;  %v5298_v8 = vsel %vm992_vm8, %v5277_v60, %v5287_v3  ;;  %v5300_v10 = vor.u32 %v1632_v5, %v1629_v4  ;;  %v4862_v13 = vld [vmem:[%s6155_s5 + $0x140] sm:$0xff]   ;;  %v717_v56 = vand.u32 15, %v661_v50  ;;  %v2289_v0 = vrot.slane %v5347_v37, 4  ;;  %v4868_v63 = vld [vmem:[%s6155_s5 + $0x158] sm:$0xff]  }
  0x5b   : > { %4507 = vmatprep.subr.bf16.mxu0 %v4856_v16  ;;  %vm1065_vm2 = vcmp.ne.s16.totalorder %v5298_v8, 0  ;;  %vm6163_vm3 = vcmp.ne.s16.totalorder %v5289_v6, 0  ;;  %v1013_v36 = vrot.slane %v1011_v18, 4  ;;  %v1016_v44 = vrot.slane %v1014_v27, 5  ;;  %v4869_v18 = vld [vmem:[%s6155_s5 + $0x20] sm:$0xff]  }
  0x5c   : > { %v1074_v14 = vsel %vm1065_vm2, 0, %v5211_v21  ;;  %v1698_v17 = vsel %vm6163_vm3, 0, %v5216_v22  ;;  %v4863_v22 = vld [vmem:[%s6155_s5 + $0x8] sm:$0xff]   ;;  %v5341_v26 = vsel %vm1065_vm2, 0, %v5222_v28  ;;  %vm5392_vm6 = vcmp.eq.s32.totalorder %v717_v56, 0 }
  0x5d   : > { %4380 = vmatpush3.bf16.msra.mxu1 %v4855_v15  ;;  %v5316_v15 = vsel %vm1295_vm15, %v5289_v6, %v5300_v10  ;;  %v1305_v20 = vshrl.u32 %v1074_v14, 16  ;;  %v1308_v33 = vshll.u32 %v1074_v14, 16  ;;  %v1725_v34 = vshrl.u32 %v1698_v17, 16  ;;  %v5409_v14 = vld [vmem:[#allocation2 + $0x28] sm:$0xff]  ;;  %vm942_vm9 = vmpackc.low %vm5392_vm6, %vm5392_vm6 }
  0x5e   : > { %4508 = vmatpush3.bf16.msra.mxu0 %v4856_v16  ;;  %4381 = vmatprep.subr.bf16.mxu1 %v4857_v38  ;;  %v1583_v16 = vsel %vm1567_vm1, 65537, %v4966_v24  ;;  %vm6162_vm4 = vcmp.ne.s16.totalorder %v5316_v15, 0  ;;  %v1728_v35 = vshll.u32 %v1698_v17, 16  ;;  %v5370_v52 = vor.u32 %v1016_v44, %v1013_v36 }
  0x5f   : > { %4509 = vmatprep.subr.bf16.mxu0 %v4858_v43  ;;  %v1699_v25 = vsel %vm6162_vm4, 0, %v5211_v21  ;;  %v3921_v32 = vcombine.low %v5228_v29, %v1583_v16  ;;  %v5349_v21 = vrot.slane %v1305_v20, 3  ;;  %v5362_v47 = vrot.slane %v1308_v33, 4  ;;  %v4870_v20 = vld [vmem:[%s6155_s5 + $0x160] sm:$0xff]  }
  0x60   : > { %v1736_v49 = vshll.u32 %v1699_v25, 16  ;;  %v2472_v51 = vsel %vm6162_vm4, 0, %v5222_v28  ;;  %v5374_v9 = vrot.slane %v1728_v35, 5  ;;  %v5381_v58 = vsel %vm992_vm8, %v5287_v3, %v5370_v52 }
  0x61   : > { %4382 = vmatpush3.bf16.msra.mxu1 %v4857_v38  ;;  %v1733_v38 = vshrl.u32 %v1699_v25, 16  ;;  %v1636_v45 = vshrl.u32 %v3921_v32, 16  ;;  %v1639_v46 = vshll.u32 %v3921_v32, 16  ;;  %vm1066_vm5 = vcmp.ne.s16.totalorder %v5381_v58, 0 }
  0x62   : > { %4510 = vmatpush3.bf16.msra.mxu0 %v4858_v43  ;;  %4383 = vmatprep.subr.bf16.mxu1 %v4859_v48  ;;  %v2471_v43 = vsel %vm6163_vm3, 0, %v5230_v30  ;;  %v2290_v3 = vsel %vm592_vm0, %v2287_v12, %v2289_v0  ;;  %v2506_v5 = vshrl.u32 %v2472_v51, 16  ;;  %v2509_v7 = vshll.u32 %v2472_v51, 16 }
  0x63   : > { %4511 = vmatprep.subr.bf16.mxu0 %v4860_v53  ;;  %v1641_v30 = vrot.slane %v1639_v46, 4  ;;  %v2498_v54 = vshrl.u32 %v2471_v43, 16  ;;  %v5376_v57 = vrot.slane %v1733_v38, 4  ;;  %v2501_v1 = vshll.u32 %v2471_v43, 16 }
  0x64   : > { %v5411_v16 = vrot.slane %v1736_v49, 5  ;;  %v724_v12 = vand.u32 15, %v662_v55  ;;  %v664_v25 = vadd.s32 72, %v5164_v62  ;;  %v2291_v27 = vrot.slane %v5409_v14, 4 }
  0x65   : > { %4384 = vmatpush3.bf16.msra.mxu1 %v4859_v48  ;;  %v5364_v48 = vrot.slane %v1725_v34, 4  ;;  %v5413_v17 = vrot.slane %v2498_v54, 4  ;;  %v5436_v32 = vrot.slane %v2506_v5, 4  ;;  %v5443_v33 = vsel %vm1066_vm5, 0, %v5347_v37  ;;  %v5445_v34 = vld [vmem:[#allocation2 + $0x30] sm:$0xff] }
  0x66   : > { %4512 = vmatpush3.bf16.msra.mxu0 %v4860_v53  ;;  %4401 = vmatprep.subr.bf16.mxu1 %v4861_v11  ;;  %v1638_v53 = vrot.slane %v1636_v45, 3  ;;  %vm886_vm10 = vcmp.eq.s32.totalorder %v724_v12, 15  ;;  %v958_v38 = vsel %vm942_vm9, 65537, %v4966_v24  ;;  %v4872_v45 = vld [vmem:[%s6155_s5 + $0x168] sm:$0xff]   ;;  %v738_v49 = vand.u32 15, %v664_v25 }
  0x67   : > { %4529 = vmatprep.subr.bf16.mxu0 %v4862_v13  ;;  %v3882_v43 = vcombine.low %v958_v38, %v5228_v29  ;;  %vm1569_vm11 = vmpackc.low %vm886_vm10, %vm886_vm10  ;;  %v2292_v50 = vsel %vm592_vm0, %v2289_v0, %v2291_v27  ;;  %v665_v51 = vadd.s32 80, %v5164_v62  ;;  %v666_v0 = vadd.s32 88, %v5164_v62 }
  0x68   : > { %4386 = vmatmul.mubr.bf16.vlgmr.msra.gmra.mrb[0].mxu1 %v1129_v19  ;;  %v5383_v59 = vor.u32 %v1641_v30, %v1638_v53  ;;  %v1585_v46 = vsel %vm1569_vm11, 65537, %v4966_v24  ;;  %vm5477_vm13 = vcmp.eq.s32.totalorder %v738_v49, 15 }
  0x69   : > { %4514 = vmatmul.mubr.bf16.vlgmr.msra.gmra.mrb[0].mxu0 %v2288_v23  ;;  %4402 = vmatpush3.bf16.msra.mxu1 %v4861_v11  ;;  %v5402_v11 = vsel %vm1066_vm5, 0, %v5222_v28  ;;  %v1020_v53 = vshrl.u32 %v3882_v43, 16  ;;  %v1023_v30 = vshll.u32 %v3882_v43, 16  ;;  %v3922_v54 = vcombine.low %v5228_v29, %v1585_v46  ;;  %vm1571_vm1 = vmpackc.low %vm5477_vm13, %vm5477_vm13 }
  0x6a   : > { %4530 = vmatpush3.bf16.msra.mxu0 %v4862_v13  ;;  %4403 = vmatprep.subr.bf16.mxu1 %v4863_v22  ;;  %v5407_v13 = vsel %vm1295_vm15, %v5300_v10, %v5383_v59  ;;  %v1314_v19 = vshrl.u32 %v5402_v11, 16  ;;  %v663_v10 = vadd.s32 64, %v5164_v62  ;;  %v1317_v35 = vshll.u32 %v5402_v11, 16  ;;  %v4874_v11 = vld [vmem:[%s6155_s5 + $0x170] sm:$0xff]  }
  0x6b   : > { %4531 = vmatprep.subr.bf16.mxu0 %v4864_v31  ;;  %4389 = vmatprep.mubr.bf16.mxu1 %v2288_v23  ;;  %6183 = vst [vmem:[#allocation3_spill] sm:$0xff] %v5407_v13  ;;  %vm6161_vm7 = vcmp.ne.s16.totalorder %v5407_v13, 0  ;;  %v5427_v23 = vrot.slane %v2501_v1, 5  ;;  %v1022_v1 = vrot.slane %v1020_v53, 4  ;;  %v1025_v4 = vrot.slane %v1023_v30, 5  ;;  %v4875_v30 = vld [vmem:[%s6155_s5 + $0x38] sm:$0xff]  }
  0x6c   : > { %4517 = vmatprep.mubr.bf16.mxu0 %v2290_v3  ;;  %v5454_v36 = vsel %vm6161_vm7, 0, %v5285_v2  ;;  %v731_v44 = vand.u32 15, %v663_v10  ;;  %v1648_v5 = vshll.u32 %v3922_v54, 16  ;;  %v5517_v55 = vrot.slane %v1317_v35, 4 }
  0x6d   : > { %4404 = vmatpush3.bf16.msra.mxu1 %v4863_v22  ;;  %v5432_v22 = vsel %vm6161_vm7, 0, %v5222_v28  ;;  %v4871_v28 = vld [vmem:[%s6155_s5 + $0x28] sm:$0xff]   ;;  %v5497_v10 = vor.u32 %v1025_v4, %v1022_v1  ;;  %v2518_v4 = vshll.u32 %v5454_v36, 16 }
  0x6e   : > { %4532 = vmatpush3.bf16.msra.mxu0 %v4864_v31  ;;  %4405 = vmatprep.subr.bf16.mxu1 %v4865_v41  ;;  %v5438_v31 = vrot.slane %v2509_v7, 5  ;;  %vm5473_vm12 = vcmp.eq.s32.totalorder %v731_v44, 0  ;;  %v4873_v7 = vld [vmem:[%s6155_s5 + $0x30] sm:$0xff]   ;;  %v1650_v25 = vrot.slane %v1648_v5, 4  ;;  %v1745_v56 = vshll.u32 %v5432_v22, 16 }
  0x6f   : > { %4533 = vmatprep.subr.bf16.mxu0 %v4866_v42  ;;  %vm944_vm14 = vmpackc.low %vm5473_vm12, %vm5473_vm12 }
  0x70   : > { %4390 = vmatmul.mubr.bf16.gmra.mrb[4].mxu1 %v2290_v3  ;;  %v1645_v3 = vshrl.u32 %v3922_v54, 16  ;;  %v960_v12 = vsel %vm944_vm14, 65537, %v4966_v24  ;;  %v4876_v54 = vld [vmem:[%s6155_s5 + $0x178] sm:$0xff]  }
  0x71   : > { %4406 = vmatpush3.bf16.msra.mxu1 %v4865_v41  ;;  %v5462_v41 = vrot.slane %v1314_v19, 3  ;;  %4518 = vmatmul.mubr.bf16.gmra.mrb[4].mxu0 %v2292_v50  ;;  %v752_v19 = vand.u32 15, %v666_v0  ;;  %v3883_v38 = vcombine.low %v960_v12, %v5228_v29  ;;  %v2515_v0 = vshrl.u32 %v5454_v36, 16 }
  0x72   : > { %4534 = vmatpush3.bf16.msra.mxu0 %v4866_v42  ;;  %4407 = vmatprep.subr.bf16.mxu1 %v4867_v61  ;;  %v1742_v42 = vshrl.u32 %v5432_v22, 16 }
  0x73   : > { %4535 = vmatprep.subr.bf16.mxu0 %v4868_v63  ;;  %4393 = vmatprep.mubr.bf16.mxu1 %v2292_v50  ;;  %vm5501_vm10 = vcmp.eq.s32.totalorder %v752_v19, 15  ;;  %v1032_v53 = vshll.u32 %v3883_v38, 16 }
  0x74   : > { %vm1573_vm11 = vmpackc.low %vm5501_vm10, %vm5501_vm10  ;;  %v5539_v1 = vrot.slane %v1742_v42, 4 }
  0x75   : > { %4408 = vmatpush3.bf16.msra.mxu1 %v4867_v61  ;;  %v745_v61 = vand.u32 15, %v665_v51  ;;  %v1029_v51 = vshrl.u32 %v3883_v38, 16  ;;  %v1034_v42 = vrot.slane %v1032_v53, 5  ;;  %v5572_v53 = vrot.slane %v2518_v4, 5 }
  0x76   : > { %4536 = vmatpush3.bf16.msra.mxu0 %v4868_v63  ;;  %4409 = vmatprep.subr.bf16.mxu1 %v4869_v18  ;;  %v2293_v63 = vrot.slane %v5445_v34, 4 }
  0x77   : > { %4537 = vmatprep.subr.bf16.mxu0 %v4870_v20  ;;  %vm873_vm6 = vcmp.eq.s32.totalorder %v745_v61, 0  ;;  %v1031_v22 = vrot.slane %v1029_v51, 4  ;;  %v5568_v51 = vld [vmem:[#allocation2 + $0x40] sm:$0xff] }
  0x78   : > { %vm946_vm9 = vmpackc.low %vm873_vm6, %vm873_vm6  ;;  %v2294_v49 = vsel %vm592_vm0, %v2291_v27, %v2293_v63  ;;  %v5522_v27 = vsel %vm992_vm8, %v5370_v52, %v5497_v10  ;;  %v5535_v52 = vld [vmem:[#allocation2 + $0x38] sm:$0xff] }
  0x79   : > { %4410 = vmatpush3.bf16.msra.mxu1 %v4869_v18  ;;  %v1587_v18 = vsel %vm1571_vm1, 65537, %v4966_v24  ;;  %v962_v46 = vsel %vm946_vm9, 65537, %v4966_v24  ;;  %4521 = vmatprep.mubr.bf16.mxu0 %v2294_v49  ;;  %vm1067_vm12 = vcmp.ne.s16.totalorder %v5522_v27, 0  ;;  %v2295_v38 = vrot.slane %v5535_v52, 4 }
  0x7a   : > { %4538 = vmatpush3.bf16.msra.mxu0 %v4870_v20  ;;  %4411 = vmatprep.subr.bf16.mxu1 %v4871_v28  ;;  %v1647_v20 = vrot.slane %v1645_v3, 3  ;;  %v3923_v43 = vcombine.low %v5228_v29, %v1587_v18  ;;  %v3884_v35 = vcombine.low %v962_v46, %v5228_v29  ;;  %v5550_v3 = vld [vmem:[%s6155_s5 + $0x180] sm:$0xff]   ;;  %v5566_v46 = vrot.slane %v2515_v0, 4 }
  0x7b   : > { %4539 = vmatprep.subr.bf16.mxu0 %v4872_v45  ;;  %4394 = vmatmul.mubr.bf16.gmra.mrb[8].mxu1 %v2294_v49  ;;  %v1035_v44 = vor.u32 %v1034_v42, %v1031_v22  ;;  %v2296_v22 = vsel %vm592_vm0, %v2293_v63, %v2295_v38  ;;  %v669_v42 = vadd.s32 112, %v5164_v62 }
  0x7c   : > { %v5509_v50 = vor.u32 %v1650_v25, %v1647_v20  ;;  %v1038_v12 = vshrl.u32 %v3884_v35, 16  ;;  %v1041_v18 = vshll.u32 %v3884_v35, 16  ;;  %v668_v20 = vadd.s32 104, %v5164_v62  ;;  %4522 = vmatmul.mubr.bf16.gmra.mrb[8].mxu0 %v2296_v22  ;;  %4397 = vmatprep.mubr.bf16.mxu1 %v2296_v22 }
  0x7d   : > { %4412 = vmatpush3.bf16.msra.mxu1 %v4871_v28  ;;  %v1654_v28 = vshrl.u32 %v3923_v43, 16  ;;  %v773_v63 = vand.u32 15, %v669_v42 }
  0x7e   : > { %4540 = vmatpush3.bf16.msra.mxu0 %v4872_v45  ;;  %v1657_v45 = vshll.u32 %v3923_v43, 16  ;;  %4413 = vmatprep.subr.bf16.mxu1 %v4873_v7  ;;  %v5529_v61 = vsel %vm1295_vm15, %v5383_v59, %v5509_v50  ;;  %v5545_v59 = vld [vmem:[%s6155_s5 + $0x80] sm:$0xff]   ;;  %v5564_v43 = vrot.slane %v1745_v56, 5  ;;  %v1043_v56 = vrot.slane %v1041_v18, 5 }
  0x7f   : > { %4541 = vmatprep.subr.bf16.mxu0 %v4874_v11  ;;  %6190 = vst [vmem:[#allocation4_spill] sm:$0xff] %v5529_v61  ;;  %vm6160_vm13 = vcmp.ne.s16.totalorder %v5529_v61, 0  ;;  %v1656_v36 = vrot.slane %v1654_v28, 3  ;;  %v5577_v28 = vsel %vm1067_vm12, 0, %v5285_v2  ;;  %v766_v35 = vand.u32 15, %v668_v20 }
  0x80   : > { %v1659_v5 = vrot.slane %v1657_v45, 4  ;;  %v1040_v45 = vrot.slane %v1038_v12, 4  ;;  %v2297_v12 = vrot.slane %v5568_v51, 4  ;;  %vm5606_vm10 = vcmp.eq.s32.totalorder %v773_v63, 0 }
  0x81   : > { %4414 = vmatpush3.bf16.msra.mxu1 %v4873_v7  ;;  %v1589_v7 = vsel %vm1573_vm11, 65537, %v4966_v24  ;;  %vm892_vm1 = vcmp.eq.s32.totalorder %v766_v35, 15  ;;  %vm950_vm11 = vmpackc.low %vm5606_vm10, %vm5606_vm10 }
  0x82   : > { %4542 = vmatpush3.bf16.msra.mxu0 %v4874_v11  ;;  %4415 = vmatprep.subr.bf16.mxu1 %v4875_v30  ;;  %v667_v11 = vadd.s32 96, %v5164_v62  ;;  %v3924_v19 = vcombine.low %v5228_v29, %v1589_v7  ;;  %v1660_v4 = vor.u32 %v1659_v5, %v1656_v36  ;;  %v5593_v7 = vld [vmem:[#allocation2 + $0x40] sm:$0xf]  ;;  %vm1575_vm9 = vmpackc.low %vm892_vm1, %vm892_vm1  ;;  %v670_v5 = vadd.s32 120, %v5164_v62  ;;  %v5611_v62 = vld [vmem:[#allocation2 + $0x48] sm:$0xf] }
  0x83   : > { %4543 = vmatprep.subr.bf16.mxu0 %v4876_v54  ;;  %v1044_v18 = vor.u32 %v1043_v56, %v1040_v45  ;;  %v1140_v20 = vrot.slane %v5593_v7, 4  ;;  %v2298_v35 = vsel %vm592_vm0, %v2295_v38, %v2297_v12  ;;  %v966_v61 = vsel %vm950_vm11, 65537, %v4966_v24 }
  0x84   : > { %v759_v25 = vand.u32 15, %v667_v11  ;;  %v1663_v49 = vshrl.u32 %v3924_v19, 16  ;;  %v1666_v0 = vshll.u32 %v3924_v19, 16  ;;  %v5615_v45 = vsel %vm1295_vm15, %v5509_v50, %v1660_v4  ;;  %4525 = vmatprep.mubr.bf16.mxu0 %v2298_v35 }
  0x85   : > { %4416 = vmatpush3.bf16.msra.mxu1 %v4875_v30  ;;  %v5582_v30 = vsel %vm6160_vm13, 0, %v5285_v2  ;;  %v5597_v2 = vsel %vm992_vm8, %v5497_v10, %v1035_v44  ;;  %v1591_v10 = vsel %vm1575_vm9, 65537, %v4966_v24  ;;  %6193 = vst [vmem:[#allocation5_spill] sm:$0xff] %v5615_v45  ;;  %v1141_v42 = vsel %vm592_vm0, %v2295_v38, %v1140_v20 }
  0x86   : > { %4544 = vmatpush3.bf16.msra.mxu0 %v4876_v54  ;;  %4433 = vmatprep.subr.bf16.mxu1 %v5545_v59  ;;  %v5587_v54 = vsel %vm6160_vm13, 0, %v5347_v37  ;;  %vm875_vm14 = vcmp.eq.s32.totalorder %v759_v25, 0  ;;  %v1665_v11 = vrot.slane %v1663_v49, 3  ;;  %v1668_v40 = vrot.slane %v1666_v0, 4 }
  0x87   : > { %4561 = vmatprep.subr.bf16.mxu0 %v5550_v3  ;;  %vm948_vm6 = vmpackc.low %vm875_vm14, %vm875_vm14  ;;  %v3925_v25 = vcombine.low %v5228_v29, %v1591_v10  ;;  %v780_v49 = vand.u32 15, %v670_v5  ;;  %4398 = vmatmul.mubr.bf16.gmra.mrb[12].mxu1 %v1141_v42  ;;  %vm1068_vm1 = vcmp.ne.s16.totalorder %v5597_v2, 0  ;;  %v5623_v10 = vsel %vm992_vm8, %v1035_v44, %v1044_v18 }
  0x88   : > { %v964_v36 = vsel %vm948_vm6, 65537, %v4966_v24  ;;  %vm1693_vm9 = vcmp.ne.s16.totalorder %v5615_v45, 0  ;;  %v3886_v38 = vcombine.low %v966_v61, %v5228_v29  ;;  %v2299_v20 = vrot.slane %v5611_v62, 4 }
  0x89   : > { %v3885_v19 = vcombine.low %v964_v36, %v5228_v29  ;;  %v1669_v36 = vor.u32 %v1668_v40, %v1665_v11  ;;  %v1672_v5 = vshrl.u32 %v3925_v25, 16  ;;  %v1675_v63 = vshll.u32 %v3925_v25, 16 }
  0x8a   : > { %vm894_vm14 = vcmp.eq.s32.totalorder %v780_v49, 15  ;;  %v5634_v44 = vsel %vm1068_vm1, 0, %v5347_v37  ;;  %vm1069_vm10 = vcmp.ne.s16.totalorder %v5623_v10, 0  ;;  %v895_v49 = vld [vmem:[#allocation2] sm:$0xf8]  ;;  %v1056_v61 = vshrl.u32 %v3886_v38, 16 }
  0x8b   : > { %v1047_v56 = vshrl.u32 %v3885_v19, 16  ;;  %v1050_v22 = vshll.u32 %v3885_v19, 16  ;;  %vm1577_vm6 = vmpackc.low %vm894_vm14, %vm894_vm14  ;;  %v1674_v19 = vrot.slane %v1672_v5, 3  ;;  %v1677_v0 = vrot.slane %v1675_v63, 4 }
  0x8c   : > { %v1593_v35 = vsel %vm1577_vm6, 65537, %v4966_v24  ;;  %v5638_v25 = vsel %vm1295_vm15, %v1660_v4, %v1669_v36  ;;  %v2300_v5 = vsel %vm592_vm0, %v2297_v12, %v2299_v20  ;;  %vm1064_vm11 = vcmp.ne.s16.totalorder %v5277_v60, 0 }
  0x8d   : > { %v1049_v50 = vrot.slane %v1047_v56, 4  ;;  %v1052_v39 = vrot.slane %v1050_v22, 5  ;;  %v3926_v11 = vcombine.low %v5228_v29, %v1593_v35  ;;  %6194 = vst [vmem:[#allocation6_spill] sm:$0xff] %v5638_v25  ;;  %v1678_v24 = vor.u32 %v1677_v0, %v1674_v19  ;;  %4526 = vmatmul.mubr.bf16.gmra.mrb[12].mxu0 %v2300_v5 }
  0x8e   : > { %v1059_v56 = vshll.u32 %v3886_v38, 16  ;;  %vm6167_vm14 = vcmp.ne.s16.totalorder %v5638_v25, 0  ;;  %v1058_v4 = vrot.slane %v1056_v61, 4  ;;  %v1311_v63 = vor.u32 %v5362_v47, %v5349_v21 }
  0x8f   : > { %v1053_v40 = vor.u32 %v1052_v39, %v1049_v50  ;;  %v1681_v29 = vshrl.u32 %v3926_v11, 16  ;;  %v5644_v22 = vsel %vm1295_vm15, %v1669_v36, %v1678_v24  ;;  %v1684_v42 = vshll.u32 %v3926_v11, 16 }
  0x90   : > { %vm1695_vm13 = vcmp.ne.s16.totalorder %v5644_v22, 0  ;;  %v1061_v36 = vrot.slane %v1059_v56, 5  ;;  %v1073_v12 = vsel %vm1064_vm11, 0, %v895_v49  ;;  %v2512_v0 = vor.u32 %v5438_v31, %v5436_v32  ;;  %v4880_v49 = vld [vmem:[%s6155_s5 + $0x188] sm:$0xff]  }
  0x91   : > { %v5641_v39 = vsel %vm992_vm8, %v1044_v18, %v1053_v40  ;;  %v2504_v18 = vor.u32 %v5427_v23, %v5413_v17  ;;  %v1683_v50 = vrot.slane %v1681_v29, 3  ;;  %v1686_v19 = vrot.slane %v1684_v42, 4 }
  0x92   : > { %vm1070_vm6 = vcmp.ne.s16.totalorder %v5641_v39, 0  ;;  %v5661_v35 = vor.u32 %v5517_v55, %v5462_v41  ;;  %v5663_v21 = vor.u32 %v1061_v36, %v1058_v4  ;;  %v1297_v47 = vshrl.u32 %v1073_v12, 16  ;;  %v4879_v36 = vld [vmem:[%s6155_s5 + $0x88] sm:$0xff]  }
  0x93   : > { %v1300_v17 = vshll.u32 %v1073_v12, 16  ;;  %v5667_v23 = vor.u32 %v5572_v53, %v5566_v46  ;;  %v5669_v38 = vor.u32 %v1686_v19, %v1683_v50  ;;  %v2513_v11 = vsel %vm992_vm8, %v2504_v18, %v2512_v0 }
  0x94   : > { %v1321_v20 = vsel %vm1295_vm15, %v1311_v63, %v5661_v35  ;;  %v1323_v32 = vshrl.u32 %v5577_v28, 16  ;;  %v5677_v31 = vsel %vm992_vm8, %v1053_v40, %v5663_v21  ;;  %vm1072_vm7 = vcmp.ne.s16.totalorder %v5663_v21, 0  ;;  %4545 = vmatprep.mubr.bf16.mxu0 %v2513_v11 }
  0x95   : > { %v1299_v41 = vrot.slane %v1297_v47, 3  ;;  %v1302_v55 = vrot.slane %v1300_v17, 4  ;;  %vm1071_vm4 = vcmp.ne.s16.totalorder %v5677_v31, 0  ;;  %v5683_v46 = vsel %vm1295_vm15, %v1678_v24, %v5669_v38 }
  0x96   : > { %v5688_v53 = vsel %vm1072_vm7, 0, %v5593_v7  ;;  %v5693_v40 = vsel %vm1072_vm7, 0, %v5611_v62  ;;  %v5701_v61 = vsel %vm1693_vm9, 0, %v5347_v37  ;;  %v2475_v24 = vsel %vm1693_vm9, 0, %v5409_v14 }
  0x97   : > { %vm1696_vm3 = vcmp.ne.s16.totalorder %v5683_v46, 0  ;;  %v1368_v7 = vshrl.u32 %v5688_v53, 16  ;;  %v1078_v62 = vsel %vm1069_vm10, 0, %v5409_v14  ;;  %v5714_v56 = vsel %vm6167_vm14, 0, %v5409_v14 }
  0x98   : > { %v2476_v37 = vsel %vm6167_vm14, 0, %v5445_v34  ;;  %v5722_v29 = vsel %vm1070_vm6, 0, %v5445_v34  ;;  %v5727_v42 = vsel %vm1695_vm13, 0, %v5535_v52  ;;  %v5732_v5 = vsel %vm1071_vm4, 0, %v5535_v52 }
  0x99   : > { %v1303_v4 = vor.u32 %v1302_v55, %v1299_v41  ;;  %v2522_v18 = vsel %vm992_vm8, %v2512_v0, %v5667_v23  ;;  %v5742_v50 = vsel %vm1696_vm3, 0, %v5568_v51  ;;  %v1325_v12 = vrot.slane %v1323_v32, 3  ;;  %v4882_v55 = vld [vmem:[%s6155_s5 + $0x190] sm:$0xff]  }
  0x9a   : > { %4546 = vmatmul.mubr.bf16.vlgmr.msra.gmra.mrb[0].mxu0 %v2522_v18  ;;  %v1326_v47 = vshll.u32 %v5577_v28, 16  ;;  %v5746_v17 = vrot.slane %v1368_v7, 3  ;;  %v2524_v0 = vshrl.u32 %v5587_v54, 16  ;;  %v2527_v41 = vshll.u32 %v5587_v54, 16 }
  0x9b   : > { %v1312_v11 = vsel %vm1295_vm15, %v1303_v4, %v1311_v63  ;;  %4562 = vmatpush3.bf16.msra.mxu0 %v5550_v3  ;;  %v1332_v32 = vshrl.u32 %v5634_v44, 16  ;;  %v1335_v28 = vshll.u32 %v5634_v44, 16  ;;  %v2533_v7 = vshrl.u32 %v2475_v24, 16 }
  0x9c   : > { %4417 = vmatprep.mubr.bf16.mxu1 %v1312_v11  ;;  %4563 = vmatprep.subr.bf16.mxu0 %v4880_v49  ;;  %v1328_v18 = vrot.slane %v1326_v47, 4  ;;  %v2526_v63 = vrot.slane %v2524_v0, 4  ;;  %v2529_v4 = vrot.slane %v2527_v41, 5  ;;  %v2536_v3 = vshll.u32 %v2475_v24, 16  ;;  %v4881_v11 = vld [vmem:[%s6155_s5 + $0x90] sm:$0xff]  }
  0x9d   : > { %4418 = vmatmul.mubr.bf16.vlgmr.msra.gmra.mrb[0].mxu1 %v1321_v20  ;;  %v1341_v19 = vshrl.u32 %v1078_v62, 16  ;;  %v1334_v13 = vrot.slane %v1332_v32, 3  ;;  %v1337_v25 = vrot.slane %v1335_v28, 4  ;;  %v2535_v47 = vrot.slane %v2533_v7, 4  ;;  %v4884_v20 = vld [vmem:[%s6155_s5 + $0x198] sm:$0xff]  }
  0x9e   : > { %4434 = vmatpush3.bf16.msra.mxu1 %v5545_v59  ;;  %v1329_v54 = vor.u32 %v1328_v18, %v1325_v12  ;;  %v2530_v45 = vor.u32 %v2529_v4, %v2526_v63  ;;  %v2538_v44 = vrot.slane %v2536_v3, 5  ;;  %v1344_v0 = vshll.u32 %v1078_v62, 16 }
  0x9f   : > { %4435 = vmatprep.subr.bf16.mxu1 %v4879_v36  ;;  %4564 = vmatpush3.bf16.msra.mxu0 %v4880_v49  ;;  %v1343_v24 = vrot.slane %v1341_v19, 3  ;;  %v1338_v12 = vor.u32 %v1337_v25, %v1334_v13  ;;  %v2542_v41 = vshrl.u32 %v2476_v37, 16  ;;  %v2545_v18 = vshll.u32 %v2476_v37, 16 }
  0xa0   : > { %v1330_v59 = vsel %vm1295_vm15, %v5661_v35, %v1329_v54  ;;  %4565 = vmatprep.subr.bf16.mxu0 %v4882_v55  ;;  %v2531_v32 = vsel %vm992_vm8, %v5667_v23, %v2530_v45  ;;  %v2539_v49 = vor.u32 %v2538_v44, %v2535_v47  ;;  %v1346_v28 = vrot.slane %v1344_v0, 4  ;;  %v4883_v35 = vld [vmem:[%s6155_s5 + $0x98] sm:$0xff]   ;;  %v4886_v47 = vld [vmem:[%s6155_s5 + $0x1a0] sm:$0xff]   ;;  %v2470_v44 = vld [vmem:[#allocation2 + $0x48] sm:$0x1f] }
  0xa1   : > { %4421 = vmatprep.mubr.bf16.mxu1 %v1330_v59  ;;  %v1350_v7 = vshrl.u32 %v5722_v29, 16  ;;  %4549 = vmatprep.mubr.bf16.mxu0 %v2531_v32  ;;  %v1339_v19 = vsel %vm1295_vm15, %v1329_v54, %v1338_v12  ;;  %v2544_v13 = vrot.slane %v2542_v41, 4  ;;  %v2547_v25 = vrot.slane %v2545_v18, 5 }
  0xa2   : > { %4436 = vmatpush3.bf16.msra.mxu1 %v4879_v36  ;;  %v1353_v62 = vshll.u32 %v5722_v29, 16  ;;  %v2540_v37 = vsel %vm992_vm8, %v2530_v45, %v2539_v49  ;;  %v1347_v23 = vor.u32 %v1346_v28, %v1343_v24  ;;  %v2551_v4 = vshrl.u32 %v5727_v42, 16  ;;  %v2746_v28 = vld [vmem:[#allocation2 + $0x10] sm:$0xf8] }
  0xa3   : > { %4437 = vmatprep.subr.bf16.mxu1 %v4881_v11  ;;  %4566 = vmatpush3.bf16.msra.mxu0 %v4882_v55  ;;  %v1352_v63 = vrot.slane %v1350_v7, 3  ;;  %v2548_v36 = vor.u32 %v2547_v25, %v2544_v13  ;;  %v2554_v54 = vshll.u32 %v5727_v42, 16  ;;  %v1359_v29 = vshrl.u32 %v5732_v5, 16  ;;  %v4885_v55 = vld [vmem:[%s6155_s5 + $0xa0] sm:$0xff]  }
  0xa4   : > { %4550 = vmatmul.mubr.bf16.gmra.mrb[4].mxu0 %v2540_v37  ;;  %4567 = vmatprep.subr.bf16.mxu0 %v4884_v20  ;;  %v1355_v3 = vrot.slane %v1353_v62, 4  ;;  %v1348_v45 = vsel %vm1295_vm15, %v1338_v12, %v1347_v23  ;;  %v2553_v24 = vrot.slane %v2551_v4, 4  ;;  %v1362_v0 = vshll.u32 %v5732_v5, 16 }
  0xa5   : > { %4422 = vmatmul.mubr.bf16.gmra.mrb[4].mxu1 %v1339_v19  ;;  %v2560_v59 = vshrl.u32 %v5742_v50, 16  ;;  %v2549_v42 = vsel %vm992_vm8, %v2539_v49, %v2548_v36  ;;  %v2556_v18 = vrot.slane %v2554_v54, 5  ;;  %v1361_v32 = vrot.slane %v1359_v29, 3  ;;  %v4888_v49 = vld [vmem:[%s6155_s5 + $0x1a8] sm:$0xff]   ;;  %v4890_v29 = vld [vmem:[%s6155_s5 + $0x1b0] sm:$0xff]  }
  0xa6   : > { %4438 = vmatpush3.bf16.msra.mxu1 %v4881_v11  ;;  %4425 = vmatprep.mubr.bf16.mxu1 %v1348_v45  ;;  %v1356_v41 = vor.u32 %v1355_v3, %v1352_v63  ;;  %v6195_v7 = vshll.u32 %v5688_v53, 16  ;;  %v1364_v19 = vrot.slane %v1362_v0, 4  ;;  %v2563_v5 = vshll.u32 %v5742_v50, 16 }
  0xa7   : > { %4439 = vmatprep.subr.bf16.mxu1 %v4883_v35  ;;  %4568 = vmatpush3.bf16.msra.mxu0 %v4884_v20  ;;  %v2562_v13 = vrot.slane %v2560_v59, 4  ;;  %v2557_v25 = vor.u32 %v2556_v18, %v2553_v24  ;;  %vm1697_vm14 = vcmp.ne.s16.totalorder %v5669_v38, 0  ;;  %v1731_v53 = vor.u32 %v5374_v9, %v5364_v48  ;;  %v4887_v48 = vld [vmem:[%s6155_s5 + $0xa8] sm:$0xff]   ;;  %v4889_v24 = vld [vmem:[%s6155_s5 + $0xb0] sm:$0xff]  }
  0xa8   : > { %v5790_v12 = vrot.slane %v6195_v7, 4  ;;  %4553 = vmatprep.mubr.bf16.mxu0 %v2549_v42  ;;  %v1357_v11 = vsel %vm1295_vm15, %v1347_v23, %v1356_v41  ;;  %4569 = vmatprep.subr.bf16.mxu0 %v4886_v47  ;;  %v1365_v62 = vor.u32 %v1364_v19, %v1361_v32  ;;  %v2565_v20 = vrot.slane %v2563_v5, 5 }
  0xa9   : > { %v2479_v37 = vsel %vm1697_vm14, 0, %v2470_v44  ;;  %v1739_v50 = vor.u32 %v5411_v16, %v5376_v57  ;;  %v2558_v23 = vsel %vm992_vm8, %v2548_v36, %v2557_v25  ;;  %v2755_v3 = vsel %vm1064_vm11, 0, %v2746_v28  ;;  %v5813_v16 = vld [vmem:[#allocation2 + $0x18] sm:$0xff] }
  0xaa   : > { %4440 = vmatpush3.bf16.msra.mxu1 %v4883_v35  ;;  %v2569_v63 = vshrl.u32 %v2479_v37, 16  ;;  %v2572_v4 = vshll.u32 %v2479_v37, 16  ;;  %v1366_v9 = vsel %vm1295_vm15, %v1356_v41, %v1365_v62  ;;  %v2566_v54 = vor.u32 %v2565_v20, %v2562_v13  ;;  %v4892_v41 = vld [vmem:[%s6155_s5 + $0x1b8] sm:$0xff]  }
  0xab   : > { %4441 = vmatprep.subr.bf16.mxu1 %v4885_v55  ;;  %4570 = vmatpush3.bf16.msra.mxu0 %v4886_v47  ;;  %v1374_v57 = vor.u32 %v5790_v12, %v5746_v17  ;;  %v2756_v35 = vsel %vm1065_vm2, 0, %v5813_v16  ;;  %v1740_v44 = vsel %vm992_vm8, %v1731_v53, %v1739_v50  ;;  %v2782_v45 = vshrl.u32 %v2755_v3, 16 }
  0xac   : > { %4554 = vmatmul.mubr.bf16.gmra.mrb[8].mxu0 %v2558_v23  ;;  %4571 = vmatprep.subr.bf16.mxu0 %v4888_v49  ;;  %v2571_v36 = vrot.slane %v2569_v63, 4  ;;  %v2574_v47 = vrot.slane %v2572_v4, 5  ;;  %v2567_v17 = vsel %vm992_vm8, %v2557_v25, %v2566_v54  ;;  %v2785_v8 = vshll.u32 %v2755_v3, 16  ;;  %v4894_v3 = vld [vmem:[%s6155_s5 + $0x1c0] sm:$0xff]  }
  0xad   : > { %4426 = vmatmul.mubr.bf16.gmra.mrb[8].mxu1 %v1357_v11  ;;  %v2790_v0 = vshrl.u32 %v2756_v35, 16  ;;  %v2793_v59 = vshll.u32 %v2756_v35, 16  ;;  %v2784_v18 = vrot.slane %v2782_v45, 3  ;;  %v5831_v32 = vor.u32 %v5564_v43, %v5539_v1  ;;  %4557 = vmatprep.mubr.bf16.mxu0 %v2567_v17 }
  0xae   : > { %4442 = vmatpush3.bf16.msra.mxu1 %v4885_v55  ;;  %4429 = vmatprep.mubr.bf16.mxu1 %v1366_v9  ;;  %v2575_v42 = vor.u32 %v2574_v47, %v2571_v36  ;;  %v2799_v28 = vshrl.u32 %v5443_v33, 16  ;;  %v2787_v7 = vrot.slane %v2785_v8, 4  ;;  %v2802_v55 = vshll.u32 %v5443_v33, 16  ;;  %v4891_v33 = vld [vmem:[%s6155_s5 + $0xb8] sm:$0xff]  }
  0xaf   : > { %4443 = vmatprep.subr.bf16.mxu1 %v4887_v48  ;;  %4572 = vmatpush3.bf16.msra.mxu0 %v4888_v49  ;;  %v2792_v12 = vrot.slane %v2790_v0, 3  ;;  %v2795_v19 = vrot.slane %v2793_v59, 4  ;;  %v5838_v5 = vsel %vm992_vm8, %v1739_v50, %v5831_v32  ;;  %v1751_v1 = vshrl.u32 %v5582_v30, 16 }
  0xb0   : > { %v2576_v13 = vsel %vm992_vm8, %v2566_v54, %v2575_v42  ;;  %4573 = vmatprep.subr.bf16.mxu0 %v4890_v29  ;;  %v2801_v11 = vrot.slane %v2799_v28, 3  ;;  %v2788_v43 = vor.u32 %v2787_v7, %v2784_v18  ;;  %v2804_v53 = vrot.slane %v2802_v55, 4 }
  0xb1   : > { %v2796_v25 = vor.u32 %v2795_v19, %v2792_v12  ;;  %v1754_v49 = vshll.u32 %v5582_v30, 16  ;;  %v1375_v20 = vsel %vm1295_vm15, %v1365_v62, %v1374_v57  ;;  %v1753_v37 = vrot.slane %v1751_v1, 4 }
  0xb2   : > { %4444 = vmatpush3.bf16.msra.mxu1 %v4887_v48  ;;  %v2758_v50 = vsel %vm1067_vm12, 0, %v5409_v14  ;;  %v1760_v23 = vshrl.u32 %v5701_v61, 16  ;;  %v1763_v30 = vshll.u32 %v5701_v61, 16  ;;  %v2805_v62 = vor.u32 %v2804_v53, %v2801_v11 }
  0xb3   : > { %4445 = vmatprep.subr.bf16.mxu1 %v4889_v24  ;;  %4574 = vmatpush3.bf16.msra.mxu0 %v4890_v29  ;;  %v2797_v63 = vsel %vm1295_vm15, %v2788_v43, %v2796_v25  ;;  %v2808_v4 = vshrl.u32 %v2758_v50, 16  ;;  %v1756_v48 = vrot.slane %v1754_v49, 5  ;;  %v2811_v9 = vshll.u32 %v2758_v50, 16  ;;  %v5890_v49 = vld [vmem:[#allocation2 + $0x48] sm:$0xff] }
  0xb4   : > { %4558 = vmatmul.mubr.bf16.gmra.mrb[12].mxu0 %v2576_v13  ;;  %4575 = vmatprep.subr.bf16.mxu0 %v4892_v41  ;;  %v2759_v14 = vsel %vm1068_vm1, 0, %v5445_v34  ;;  %v6196_v54 = vshrl.u32 %v5341_v26, 16  ;;  %v6197_v35 = vshll.u32 %v5341_v26, 16  ;;  %v1984_v29 = vsel %vm1066_vm5, 0, %v5813_v16  ;;  %v4893_v26 = vld [vmem:[%s6155_s5 + $0xc0] sm:$0xff]  }
  0xb5   : > { %4430 = vmatmul.mubr.bf16.gmra.mrb[12].mxu1 %v1375_v20  ;;  %4577 = vmatprep.mubr.bf16.mxu0 %v2797_v63  ;;  %v2810_v36 = vrot.slane %v2808_v4, 3  ;;  %v2817_v47 = vshrl.u32 %v2759_v14, 16  ;;  %v2813_v45 = vrot.slane %v2811_v9, 4  ;;  %v2820_v17 = vshll.u32 %v2759_v14, 16 }
  0xb6   : > { %v5860_v57 = vrot.slane %v6196_v54, 3  ;;  %v5864_v61 = vrot.slane %v6197_v35, 4  ;;  %4446 = vmatpush3.bf16.msra.mxu1 %v4889_v24  ;;  %4449 = vmatprep.mubr.bf16.mxu1 %v1740_v44  ;;  %v1769_v8 = vshrl.u32 %v5714_v56, 16  ;;  %v1762_v0 = vrot.slane %v1760_v23, 4 }
  0xb7   : > { %4447 = vmatprep.subr.bf16.mxu1 %v4891_v33  ;;  %4576 = vmatpush3.bf16.msra.mxu0 %v4892_v41  ;;  %v1772_v59 = vshll.u32 %v5714_v56, 16  ;;  %v2760_v58 = vsel %vm1069_vm10, 0, %v5535_v52  ;;  %v2806_v24 = vsel %vm1295_vm15, %v2796_v25, %v2805_v62  ;;  %v1757_v44 = vor.u32 %v1756_v48, %v1753_v37  ;;  %v4896_v56 = vld [vmem:[%s6155_s5 + $0x1c8] sm:$0xff]   ;;  %v4897_v48 = vld [vmem:[%s6155_s5 + $0xd0] sm:$0xff]  }
  0xb8   : > { %4593 = vmatprep.subr.bf16.mxu0 %v4894_v3  ;;  %v1765_v42 = vrot.slane %v1763_v30, 5  ;;  %v2819_v18 = vrot.slane %v2817_v47, 3  ;;  %v2814_v28 = vor.u32 %v2813_v45, %v2810_v36  ;;  %v2822_v7 = vrot.slane %v2820_v17, 4  ;;  %v4895_v25 = vld [vmem:[%s6155_s5 + $0xc8] sm:$0xff]  }
  0xb9   : > { %v2826_v41 = vshrl.u32 %v2760_v58, 16  ;;  %v2829_v12 = vshll.u32 %v2760_v58, 16  ;;  %v1704_v19 = vsel %vm1695_vm13, 0, %v5445_v34  ;;  %v1771_v55 = vrot.slane %v1769_v8, 4  ;;  %v5914_v8 = vld [vmem:[#allocation2 + $0x20] sm:$0xff] }
  0xba   : > { %4448 = vmatpush3.bf16.msra.mxu1 %v4891_v33  ;;  %v1774_v13 = vrot.slane %v1772_v59, 5  ;;  %v2761_v11 = vsel %vm1070_vm6, 0, %v5568_v51  ;;  %v2026_v1 = vshrl.u32 %v1984_v29, 16  ;;  %v2029_v43 = vshll.u32 %v1984_v29, 16  ;;  %v5912_v29 = vld [vmem:[#allocation2 + $0x50] sm:$0xf] }
  0xbb   : > { %4465 = vmatprep.subr.bf16.mxu1 %v4893_v26  ;;  %v2828_v53 = vrot.slane %v2826_v41, 3  ;;  %v2831_v34 = vrot.slane %v2829_v12, 4  ;;  %v1705_v20 = vsel %vm1696_vm3, 0, %v5535_v52  ;;  %v1758_v33 = vsel %vm992_vm8, %v5831_v32, %v1757_v44  ;;  %v4898_v32 = vld [vmem:[%s6155_s5 + $0x1d0] sm:$0xff]  }
  0xbc   : > { %4578 = vmatmul.mubr.bf16.vlgmr.msra.gmra.mrb[0].mxu0 %v2806_v24  ;;  %v2835_v37 = vshrl.u32 %v2761_v11, 16  ;;  %v2838_v50 = vshll.u32 %v2761_v11, 16  ;;  %v2815_v23 = vsel %vm1295_vm15, %v2805_v62, %v2814_v28  ;;  %v1766_v63 = vor.u32 %v1765_v42, %v1762_v0 }
  0xbd   : > { %4450 = vmatmul.mubr.bf16.vlgmr.msra.gmra.mrb[0].mxu1 %v5838_v5  ;;  %4594 = vmatpush3.bf16.msra.mxu0 %v4894_v3  ;;  %v2823_v4 = vor.u32 %v2822_v7, %v2819_v18  ;;  %v1778_v30 = vshrl.u32 %v1704_v19, 16  ;;  %v5905_v9 = vor.u32 %v1774_v13, %v1771_v55  ;;  %v5907_v14 = vor.u32 %v2831_v34, %v2828_v53  ;;  %v1529_v3 = vld [vmem:[#allocation2 + $0x40] sm:$0x1f]  ;;  %v1973_v18 = vld [vmem:[#allocation2 + $0x8] sm:$0xf8]  ;;  %v4900_v7 = vld [vmem:[%s6155_s5 + $0x1d8] sm:$0xff]  }
  0xbe   : > { %4466 = vmatpush3.bf16.msra.mxu1 %v4893_v26  ;;  %4595 = vmatprep.subr.bf16.mxu0 %v4896_v56  ;;  %v1781_v5 = vshll.u32 %v1704_v19, 16  ;;  %v2762_v62 = vsel %vm1071_vm4, 0, %v5890_v49  ;;  %v2837_v54 = vrot.slane %v2835_v37, 3  ;;  %v2840_v35 = vrot.slane %v2838_v50, 4 }
  0xbf   : > { %4467 = vmatprep.subr.bf16.mxu1 %v4895_v25  ;;  %4453 = vmatprep.mubr.bf16.mxu1 %v1758_v33  ;;  %v1787_v36 = vshrl.u32 %v1705_v20, 16  ;;  %v1790_v47 = vshll.u32 %v1705_v20, 16  ;;  %v2028_v45 = vrot.slane %v2026_v1, 3  ;;  %v2031_v17 = vrot.slane %v2029_v43, 4  ;;  %v5944_v33 = vld [vmem:[#allocation2 + $0x28] sm:$0xff] }
  0xc0   : > { %v5919_v26 = vsel %vm1067_vm12, 0, %v5914_v8  ;;  %4581 = vmatprep.mubr.bf16.mxu0 %v2815_v23  ;;  %v2844_v0 = vshrl.u32 %v2762_v62, 16  ;;  %v1767_v59 = vsel %vm992_vm8, %v1757_v44, %v1766_v63  ;;  %v2824_v58 = vsel %vm1295_vm15, %v2814_v28, %v2823_v4  ;;  %v4899_v28 = vld [vmem:[%s6155_s5 + $0xd8] sm:$0xff]  }
  0xc1   : > { %4596 = vmatpush3.bf16.msra.mxu0 %v4896_v56  ;;  %v1780_v24 = vrot.slane %v1778_v30, 4  ;;  %v2847_v42 = vshll.u32 %v2762_v62, 16  ;;  %v1776_v27 = vsel %vm992_vm8, %v1766_v63, %v5905_v9  ;;  %v1783_v41 = vrot.slane %v1781_v5, 5  ;;  %v4902_v63 = vld [vmem:[%s6155_s5 + $0x1e0] sm:$0xff]  }
  0xc2   : > { %4468 = vmatpush3.bf16.msra.mxu1 %v4895_v25  ;;  %4597 = vmatprep.subr.bf16.mxu0 %v4898_v32  ;;  %v1706_v12 = vsel %vm1697_vm14, 0, %v1529_v3  ;;  %v2763_v44 = vsel %vm1072_vm7, 0, %v5912_v29  ;;  %v2833_v19 = vsel %vm1295_vm15, %v2823_v4, %v5907_v14  ;;  %v2841_v56 = vor.u32 %v2840_v35, %v2837_v54 }
  0xc3   : > { %4469 = vmatprep.subr.bf16.mxu1 %v4897_v48  ;;  %v1789_v55 = vrot.slane %v1787_v36, 4  ;;  %v1792_v13 = vrot.slane %v1790_v47, 5  ;;  %v2846_v11 = vrot.slane %v2844_v0, 3  ;;  %v2853_v1 = vshrl.u32 %v2763_v44, 16  ;;  %v5986_v0 = vld [vmem:[#allocation2 + $0x10] sm:$0xf0] }
  0xc4   : > { %4582 = vmatmul.mubr.bf16.gmra.mrb[4].mxu0 %v2824_v58  ;;  %v2856_v43 = vshll.u32 %v2763_v44, 16  ;;  %v1982_v25 = vsel %vm1064_vm11, 0, %v1973_v18  ;;  %v2849_v21 = vrot.slane %v2847_v42, 4  ;;  %v1796_v53 = vshrl.u32 %v1706_v12, 16 }
  0xc5   : > { %4454 = vmatmul.mubr.bf16.gmra.mrb[4].mxu1 %v1767_v59  ;;  %4598 = vmatpush3.bf16.msra.mxu0 %v4898_v32  ;;  %v1799_v34 = vshll.u32 %v1706_v12, 16  ;;  %v5942_v20 = vor.u32 %v5864_v61, %v5860_v57  ;;  %v1986_v37 = vsel %vm1068_vm1, 0, %v5944_v33  ;;  %v2080_v50 = vshrl.u32 %v5693_v40, 16  ;;  %v4901_v57 = vld [vmem:[%s6155_s5 + $0xe0] sm:$0xff]   ;;  %v4906_v12 = vld [vmem:[%s6155_s5 + $0x1f0] sm:$0xff]  }
  0xc6   : > { %v2083_v60 = vshll.u32 %v5693_v40, 16  ;;  %4470 = vmatpush3.bf16.msra.mxu1 %v4897_v48  ;;  %4599 = vmatprep.subr.bf16.mxu0 %v4900_v7  ;;  %v1784_v23 = vor.u32 %v1783_v41, %v1780_v24  ;;  %v5957_v61 = vor.u32 %v1792_v13, %v1789_v55  ;;  %v2009_v2 = vshrl.u32 %v1982_v25, 16  ;;  %v5961_v40 = vld [vmem:[#allocation2 + $0x30] sm:$0xff] }
  0xc7   : > { %4471 = vmatprep.subr.bf16.mxu1 %v4899_v28  ;;  %4457 = vmatprep.mubr.bf16.mxu1 %v1776_v27  ;;  %v2012_v4 = vshll.u32 %v1982_v25, 16  ;;  %v5959_v30 = vor.u32 %v2031_v17, %v2028_v45  ;;  %v1987_v48 = vsel %vm1069_vm10, 0, %v5961_v40  ;;  %v2842_v32 = vsel %vm1295_vm15, %v5907_v14, %v2841_v56  ;;  %v4904_v17 = vld [vmem:[%s6155_s5 + $0x1e8] sm:$0xff]  }
  0xc8   : > { %4585 = vmatprep.mubr.bf16.mxu0 %v2833_v19  ;;  %v2855_v5 = vrot.slane %v2853_v1, 3  ;;  %v2858_v62 = vrot.slane %v2856_v43, 4  ;;  %v2850_v3 = vor.u32 %v2849_v21, %v2846_v11  ;;  %v1798_v54 = vrot.slane %v1796_v53, 4 }
  0xc9   : > { %4600 = vmatpush3.bf16.msra.mxu0 %v4900_v7  ;;  %v1801_v35 = vrot.slane %v1799_v34, 5  ;;  %v5971_v36 = vsel %vm1295_vm15, %v5942_v20, %v5959_v30  ;;  %v1988_v10 = vsel %vm1070_vm6, 0, %v5535_v52  ;;  %v1989_v47 = vsel %vm1071_vm4, 0, %v5568_v51  ;;  %v4903_v52 = vld [vmem:[%s6155_s5 + $0xe8] sm:$0xff]  }
  0xca   : > { %v5979_v14 = vrot.slane %v2080_v50, 3  ;;  %4472 = vmatpush3.bf16.msra.mxu1 %v4899_v28  ;;  %v1785_v45 = vsel %vm992_vm8, %v5905_v9, %v1784_v23  ;;  %4601 = vmatprep.subr.bf16.mxu0 %v4902_v63  ;;  %v5988_v59 = vrot.slane %v2083_v60, 4  ;;  %v1794_v51 = vsel %vm992_vm8, %v1784_v23, %v5957_v61 }
  0xcb   : > { %4473 = vmatprep.subr.bf16.mxu1 %v4901_v57  ;;  %v2011_v39 = vrot.slane %v2009_v2, 3  ;;  %v2014_v31 = vrot.slane %v2012_v4, 4  ;;  %v2859_v9 = vor.u32 %v2858_v62, %v2855_v5  ;;  %v2044_v58 = vshrl.u32 %v1986_v37, 16 }
  0xcc   : > { %4586 = vmatmul.mubr.bf16.gmra.mrb[8].mxu0 %v2842_v32  ;;  %v2047_v24 = vshll.u32 %v1986_v37, 16  ;;  %v2053_v42 = vshrl.u32 %v1987_v48, 16  ;;  %v2851_v18 = vsel %vm1295_vm15, %v2841_v56, %v2850_v3  ;;  %v1802_v7 = vor.u32 %v1801_v35, %v1798_v54  ;;  %v4905_v56 = vld [vmem:[%s6155_s5 + $0xf0] sm:$0xff]  }
  0xcd   : > { %4458 = vmatmul.mubr.bf16.gmra.mrb[8].mxu1 %v1785_v45  ;;  %4602 = vmatpush3.bf16.msra.mxu0 %v4902_v63  ;;  %v3057_v27 = vrot.slane %v5986_v0, 4  ;;  %v2056_v41 = vshll.u32 %v1987_v48, 16  ;;  %v3058_v44 = vrot.slane %v5813_v16, 4  ;;  %v2046_v28 = vrot.slane %v2044_v58, 3 }
  0xce   : > { %4474 = vmatpush3.bf16.msra.mxu1 %v4901_v57  ;;  %4603 = vmatprep.subr.bf16.mxu0 %v4904_v17  ;;  %v2049_v19 = vrot.slane %v2047_v24, 4  ;;  %v2055_v55 = vrot.slane %v2053_v42, 3  ;;  %v2015_v13 = vor.u32 %v2014_v31, %v2011_v39  ;;  %v2035_v11 = vshrl.u32 %v5919_v26, 16  ;;  %v4908_v57 = vld [vmem:[%s6155_s5 + $0x1f8] sm:$0xff]   ;;  %v4910_v39 = vld [vmem:[%s6155_s5 + $0x208] sm:$0xff]   ;;  %v4911_v24 = vld [vmem:[%s6155_s5 + $0x210] sm:$0xff]  }
  0xcf   : > { %4475 = vmatprep.subr.bf16.mxu1 %v4903_v52  ;;  %4461 = vmatprep.mubr.bf16.mxu1 %v1794_v51  ;;  %v2058_v1 = vrot.slane %v2056_v41, 4  ;;  %v2062_v43 = vshrl.u32 %v1988_v10, 16  ;;  %v2860_v25 = vsel %vm1295_vm15, %v2850_v3, %v2859_v9  ;;  %v2038_v21 = vshll.u32 %v5919_v26, 16  ;;  %v4907_v26 = vld [vmem:[%s6155_s5 + $0xf8] sm:$0xff]   ;;  %v4922_v41 = vld [vmem:[#allocation2 + $0x40] sm:$0xff] }
  0xd0   : > { %4589 = vmatprep.mubr.bf16.mxu0 %v2851_v18  ;;  %v2065_v53 = vshll.u32 %v1988_v10, 16  ;;  %v2071_v34 = vshrl.u32 %v1989_v47, 16  ;;  %v2050_v37 = vor.u32 %v2049_v19, %v2046_v28  ;;  %v2074_v23 = vshll.u32 %v1989_v47, 16 }
  0xd1   : > { %4604 = vmatpush3.bf16.msra.mxu0 %v4904_v17  ;;  %v2059_v50 = vor.u32 %v2058_v1, %v2055_v55  ;;  %v2064_v60 = vrot.slane %v2062_v43, 3  ;;  %v1803_v63 = vsel %vm992_vm8, %v5957_v61, %v1802_v7  ;;  %v2086_v5 = vor.u32 %v5988_v59, %v5979_v14  ;;  %v4909_v14 = vld [vmem:[%s6155_s5 + $0x200] sm:$0xff]   ;;  %v4912_v7 = vld [vmem:[%s6155_s5 + $0x218] sm:$0xff]  }
  0xd2   : > { %4476 = vmatpush3.bf16.msra.mxu1 %v4903_v52  ;;  %4605 = vmatprep.subr.bf16.mxu0 %v4906_v12  ;;  %v2067_v2 = vrot.slane %v2065_v53, 4  ;;  %v2073_v4 = vrot.slane %v2071_v34, 3  ;;  %v2076_v32 = vrot.slane %v2074_v23, 4  ;;  %v2024_v61 = vsel %vm1295_vm15, %v2015_v13, %v5942_v20  ;;  %v6201_v13 = vld [vmem:[#allocation6_spill] sm:$0xff]  ;;  %v6203_v1 = vld [vmem:[#allocation3_spill] sm:$0xff]  ;;  %v4914_v23 = vld [vmem:[%s6155_s5 + $0x228] sm:$0xff]  }
  0xd3   : > { %4477 = vmatprep.subr.bf16.mxu1 %v4905_v56  ;;  %v6016_v48 = vsel %vm1295_vm15, %v2050_v37, %v2059_v50  ;;  %v2037_v62 = vrot.slane %v2035_v11, 3  ;;  %v2040_v3 = vrot.slane %v2038_v21, 4  ;;  %v3059_v35 = vsel %vm592_vm0, %v3057_v27, %v3058_v44 }
  0xd4   : > { %4590 = vmatmul.mubr.bf16.gmra.mrb[12].mxu0 %v2860_v25  ;;  %v2068_v54 = vor.u32 %v2067_v2, %v2064_v60  ;;  %v3060_v10 = vrot.slane %v5914_v8, 4  ;;  %v2077_v47 = vor.u32 %v2076_v32, %v2073_v4  ;;  %v3062_v51 = vrot.slane %v5944_v33, 4  ;;  %v6205_v4 = vld [vmem:[#allocation4_spill] sm:$0xff] }
  0xd5   : > { %4462 = vmatmul.mubr.bf16.gmra.mrb[12].mxu1 %v1803_v63  ;;  %4606 = vmatpush3.bf16.msra.mxu0 %v4906_v12  ;;  %v2041_v59 = vor.u32 %v2040_v3, %v2037_v62  ;;  %v3064_v58 = vrot.slane %v5961_v40, 4  ;;  %vm6198_vm2 = vcmp.ne.s16.totalorder %v5289_v6, 0  ;;  %v3068_v12 = vrot.slane %v4922_v41, 4  ;;  %v4913_v6 = vld [vmem:[%s6155_s5 + $0x220] sm:$0xff]  }
  0xd6   : > { %4478 = vmatpush3.bf16.msra.mxu1 %v4905_v56  ;;  %4607 = vmatprep.subr.bf16.mxu0 %v4908_v57  ;;  %v6028_v45 = vsel %vm1295_vm15, %v2059_v50, %v2068_v54  ;;  %v6031_v20 = vsel %vm1295_vm15, %v2068_v54, %v2077_v47  ;;  %v6034_v17 = vsel %vm1295_vm15, %v2077_v47, %v2086_v5  ;;  %v3244_v27 = vsel %vm6198_vm2, 0, %v5986_v0 }
  0xd7   : > { %4479 = vmatprep.subr.bf16.mxu1 %v4907_v26  ;;  %4481 = vmatprep.mubr.bf16.mxu1 %v2024_v61  ;;  %v3061_v52 = vsel %vm592_vm0, %v3058_v44, %v3060_v10  ;;  %v2042_v31 = vsel %vm1295_vm15, %v5959_v30, %v2041_v59  ;;  %v3063_v9 = vsel %vm592_vm0, %v3060_v10, %v3062_v51  ;;  %v4921_v30 = vld [vmem:[#allocation2 + $0x38] sm:$0xff]  ;;  %vm6199_vm4 = vcmp.ne.s16.totalorder %v5316_v15, 0 }
  0xd8   : > { %4609 = vmatprep.mubr.bf16.mxu0 %v3059_v35  ;;  %v3065_v42 = vsel %vm592_vm0, %v3062_v51, %v3064_v58  ;;  %v3066_v18 = vrot.slane %v4921_v30, 4  ;;  %v3245_v44 = vsel %vm6199_vm4, 0, %v5813_v16  ;;  %v3271_v19 = vshrl.u32 %v3244_v27, 16 }
  0xd9   : > { %4608 = vmatpush3.bf16.msra.mxu0 %v4908_v57  ;;  %v3274_v55 = vshll.u32 %v3244_v27, 16  ;;  %v3248_v56 = vsel %vm1693_vm9, 0, %v5961_v40  ;;  %v3070_v16 = vrot.slane %v5890_v49, 4  ;;  %v3279_v11 = vshrl.u32 %v3245_v44, 16 }
  0xda   : > { %4480 = vmatpush3.bf16.msra.mxu1 %v4907_v26  ;;  %4625 = vmatprep.subr.bf16.mxu0 %v4909_v14  ;;  %v3067_v28 = vsel %vm592_vm0, %v3064_v58, %v3066_v18  ;;  %vm6204_vm5 = vcmp.ne.s16.totalorder %v6203_v1, 0  ;;  %v3069_v25 = vsel %vm592_vm0, %v3066_v18, %v3068_v12  ;;  %v3282_v21 = vshll.u32 %v3245_v44, 16  ;;  %v4916_v58 = vld [vmem:[%s6155_s5 + $0x238] sm:$0xff]  }
  0xdb   : > { %4657 = vmatprep.subr.bf16.mxu1 %v4909_v14  ;;  %v3246_v43 = vsel %vm6204_vm5, 0, %v5914_v8  ;;  %v3306_v53 = vshrl.u32 %v3248_v56, 16  ;;  %v3309_v40 = vshll.u32 %v3248_v56, 16  ;;  %v3273_v50 = vrot.slane %v3271_v19, 4 }
  0xdc   : > { %4610 = vmatmul.mubr.bf16.vlgmr.msra.gmra.mrb[0].mxu0 %v3061_v52  ;;  %v3276_v60 = vrot.slane %v3274_v55, 5  ;;  %v3072_v63 = vrot.slane %v5912_v29, 4  ;;  %v3071_v8 = vsel %vm592_vm0, %v3068_v12, %v3070_v16  ;;  %v3281_v57 = vrot.slane %v3279_v11, 4  ;;  %v3243_v52 = vld [vmem:[#allocation2 + $0x50] sm:$0x1f] }
  0xdd   : > { %4482 = vmatmul.mubr.bf16.vlgmr.msra.gmra.mrb[0].mxu1 %v5971_v36  ;;  %4626 = vmatpush3.bf16.msra.mxu0 %v4909_v14  ;;  %v2051_v36 = vsel %vm1295_vm15, %v2041_v59, %v2050_v37  ;;  %vm6202_vm15 = vcmp.ne.s16.totalorder %v6201_v13, 0  ;;  %v3250_v2 = vsel %vm1695_vm13, 0, %v4922_v41  ;;  %vm6206_vm7 = vcmp.ne.s16.totalorder %v6205_v4, 0 }
  0xde   : > { %4665 = vmatpush3.bf16.msra.mxu1 %v4909_v14  ;;  %4627 = vmatprep.subr.bf16.mxu0 %v4910_v39  ;;  %v3249_v15 = vsel %vm6202_vm15, 0, %v4921_v30  ;;  %v3247_v26 = vsel %vm6206_vm7, 0, %v5944_v33  ;;  %v3288_v32 = vshrl.u32 %v3246_v43, 16  ;;  %v3291_v5 = vshll.u32 %v3246_v43, 16  ;;  %v4915_v33 = vld [vmem:[%s6155_s5 + $0x230] sm:$0xff]  }
  0xdf   : > { %4658 = vmatprep.subr.bf16.mxu1 %v4910_v39  ;;  %4485 = vmatprep.mubr.bf16.mxu1 %v2042_v31  ;;  %v3315_v34 = vshrl.u32 %v3249_v15, 16  ;;  %v3318_v37 = vshll.u32 %v3249_v15, 16  ;;  %v3251_v61 = vsel %vm1696_vm3, 0, %v5890_v49  ;;  %v3308_v29 = vrot.slane %v3306_v53, 4 }
  0xe0   : > { %4613 = vmatprep.mubr.bf16.mxu0 %v3063_v9  ;;  %v3311_v62 = vrot.slane %v3309_v40, 5  ;;  %v3324_v54 = vshrl.u32 %v3250_v2, 16  ;;  %v3327_v35 = vshll.u32 %v3250_v2, 16  ;;  %v3297_v10 = vshrl.u32 %v3247_v26, 16 }
  0xe1   : > { %4628 = vmatpush3.bf16.msra.mxu0 %v4910_v39  ;;  %v3317_v3 = vrot.slane %v3315_v34, 4  ;;  %v3320_v22 = vrot.slane %v3318_v37, 5  ;;  %v3300_v47 = vshll.u32 %v3247_v26, 16  ;;  %v3333_v46 = vshrl.u32 %v3251_v61, 16 }
  0xe2   : > { %4666 = vmatpush3.bf16.msra.mxu1 %v4910_v39  ;;  %4629 = vmatprep.subr.bf16.mxu0 %v4911_v24  ;;  %v3336_v49 = vshll.u32 %v3251_v61, 16  ;;  %v3073_v14 = vsel %vm592_vm0, %v3070_v16, %v3072_v63  ;;  %v3312_v51 = vor.u32 %v3311_v62, %v3308_v29  ;;  %v3290_v31 = vrot.slane %v3288_v32, 4 }
  0xe3   : > { %4659 = vmatprep.subr.bf16.mxu1 %v4911_v24  ;;  %v3321_v39 = vor.u32 %v3320_v22, %v3317_v3  ;;  %v3293_v9 = vrot.slane %v3291_v5, 5  ;;  %v3302_v30 = vrot.slane %v3300_v47, 5  ;;  %v3335_v18 = vrot.slane %v3333_v46, 4 }
  0xe4   : > { %4614 = vmatmul.mubr.bf16.gmra.mrb[4].mxu0 %v3065_v42  ;;  %v3299_v42 = vrot.slane %v3297_v10, 4  ;;  %vm3657_vm0 = vcmask 1040384  }
  0xe5   : > { %4486 = vmatmul.mubr.bf16.gmra.mrb[4].mxu1 %v2051_v36  ;;  %4630 = vmatpush3.bf16.msra.mxu0 %v4911_v24  ;;  %v3338_v36 = vrot.slane %v3336_v49, 5  ;;  %v3322_v41 = vsel %vm992_vm8, %v3312_v51, %v3321_v39  ;;  %v3294_v12 = vor.u32 %v3293_v9, %v3290_v31 }
  0xe6   : > { %4667 = vmatpush3.bf16.msra.mxu1 %v4911_v24  ;;  %4631 = vmatprep.subr.bf16.mxu0 %v4912_v7  ;;  %v3329_v24 = vrot.slane %v3327_v35, 5 }
  0xe7   : > { %4660 = vmatprep.subr.bf16.mxu1 %v4912_v7  ;;  %4489 = vmatprep.mubr.bf16.mxu1 %v6016_v48  ;;  %v3284_v48 = vrot.slane %v3282_v21, 5 }
  0xe8   : > { %4617 = vmatprep.mubr.bf16.mxu0 %v3067_v28  ;;  %v3303_v28 = vor.u32 %v3302_v30, %v3299_v42 }
  0xe9   : > { %4632 = vmatpush3.bf16.msra.mxu0 %v4912_v7  ;;  %v3285_v59 = vor.u32 %v3284_v48, %v3281_v57 }
  0xea   : > { %4668 = vmatpush3.bf16.msra.mxu1 %v4912_v7  ;;  %4633 = vmatprep.subr.bf16.mxu0 %v4913_v6  ;;  %v3252_v7 = vsel %vm1697_vm14, 0, %v3243_v52  ;;  %v3304_v0 = vsel %vm992_vm8, %v3294_v12, %v3303_v28  ;;  %v3313_v11 = vsel %vm992_vm8, %v3303_v28, %v3312_v51 }
  0xeb   : > { %4661 = vmatprep.subr.bf16.mxu1 %v4913_v6  ;;  %v3342_v19 = vshrl.u32 %v3252_v7, 16  ;;  %v3345_v55 = vshll.u32 %v3252_v7, 16  ;;  %v3295_v38 = vsel %vm992_vm8, %v3285_v59, %v3294_v12 }
  0xec   : > { %4618 = vmatmul.mubr.bf16.gmra.mrb[8].mxu0 %v3069_v25 }
  0xed   : > { %4490 = vmatmul.mubr.bf16.gmra.mrb[8].mxu1 %v6028_v45  ;;  %4634 = vmatpush3.bf16.msra.mxu0 %v4913_v6  ;;  %v3277_v45 = vor.u32 %v3276_v60, %v3273_v50  ;;  %v3344_v56 = vrot.slane %v3342_v19, 4  ;;  %v3347_v13 = vrot.slane %v3345_v55, 5 }
  0xee   : > { %4669 = vmatpush3.bf16.msra.mxu1 %v4913_v6  ;;  %4635 = vmatprep.subr.bf16.mxu0 %v4914_v23  ;;  %v3339_v6 = vor.u32 %v3338_v36, %v3335_v18 }
  0xef   : > { %4662 = vmatprep.subr.bf16.mxu1 %v4914_v23  ;;  %4493 = vmatprep.mubr.bf16.mxu1 %v6031_v20  ;;  %v3326_v20 = vrot.slane %v3324_v54, 4  ;;  %v3286_v27 = vsel %vm992_vm8, %v3277_v45, %v3285_v59  ;;  %v3348_v16 = vor.u32 %v3347_v13, %v3344_v56 }
  0xf0   : > { %4621 = vmatprep.mubr.bf16.mxu0 %v3071_v8 }
  0xf1   : > { %4636 = vmatpush3.bf16.msra.mxu0 %v4914_v23  ;;  %v3330_v44 = vor.u32 %v3329_v24, %v3326_v20  ;;  %v3349_v1 = vsel %vm992_vm8, %v3339_v6, %v3348_v16 }
  0xf2   : > { %4670 = vmatpush3.bf16.msra.mxu1 %v4914_v23  ;;  %4637 = vmatprep.subr.bf16.mxu0 %v4915_v33 }
  0xf3   : > { %4663 = vmatprep.subr.bf16.mxu1 %v4915_v33  ;;  %v3340_v15 = vsel %vm992_vm8, %v3330_v44, %v3339_v6 }
  0xf4   : > { %4622 = vmatmul.mubr.bf16.gmra.mrb[12].mxu0 %v3073_v14 }
  0xf5   : > { %4494 = vmatmul.mubr.bf16.gmra.mrb[12].mxu1 %v6034_v17  ;;  %4638 = vmatpush3.bf16.msra.mxu0 %v4915_v33  ;;  %v3331_v17 = vsel %vm992_vm8, %v3321_v39, %v3330_v44 }
  0xf6   : > { %4671 = vmatpush3.bf16.msra.mxu1 %v4915_v33  ;;  %4639 = vmatprep.subr.bf16.mxu0 %v4916_v58 }
  0xf7   : > { %4664 = vmatprep.subr.bf16.mxu1 %v4916_v58  ;;  %4641 = vmatprep.mubr.bf16.mxu0 %v3286_v27 }
  0xf8   : > { %4649 = vmatprep.mubr.bf16.mxu1 %v3322_v41 }
  0xf9   : > { %4640 = vmatpush3.bf16.msra.mxu0 %v4916_v58 }
  0xfa   : > { %4672 = vmatpush3.bf16.msra.mxu1 %v4916_v58 }
  0xfc   : > { %4642 = vmatmul.mubr.bf16.vlgmr.msra.gmra.mrb[0].mxu0 %v3295_v38 }
  0xfd   : > { %4650 = vmatmul.mubr.bf16.vlgmr.msra.gmra.mrb[16].mxu1 %v3331_v17  ;;  %4645 = vmatprep.mubr.bf16.mxu0 %v3304_v0 }
  0xfe   : > { %4653 = vmatprep.mubr.bf16.mxu1 %v3340_v15 }
 0x104   : > { %4646 = vmatmul.mubr.bf16.gmra.mrb[4].mxu0 %v3313_v11 }
 0x105   : > { %4654 = vmatmul.mubr.bf16.gmra.mrb[20].mxu1 %v3349_v1 }
 0x1b0   : > { %v4483_v43 = vpop.f32.mrb[0].mxu1 }
 0x1b1   : > { %v2178_v25 = vpop.f32.mrb[1].mxu1 }
 0x1b2   : > { %v4484_v21 = vpop.f32.mrb[2].mxu1 }
 0x1b3   : > { %v2181_v53 = vpop.f32.mrb[3].mxu1 }
 0x1b8   : > { %v4487_v40 = vpop.f32.mrb[4].mxu1 }
 0x1b9   : > { %v2194_v34 = vpop.f32.mrb[5].mxu1 }
 0x1ba   : > { %v6108_v37 = vpop.f32.mrb[6].mxu1 }
 0x1bb   : > { %v6110_v50 = vpop.f32.mrb[7].mxu1 }
 0x1bf   : > { %v4619_v60 = vpop.f32.mrb[8].mxu0 }
 0x1c0   : > { %v4491_v23 = vpop.f32.mrb[8].mxu1  ;;  %v3196_v63 = vpop.f32.mrb[9].mxu0 }
 0x1c1   : > { %v4681_v8 = vadd.f32 %v4619_v60, %v4491_v23  ;;  %v2210_v57 = vpop.f32.mrb[9].mxu1  ;;  %v4620_v2 = vpop.f32.mrb[10].mxu0 }
 0x1c2   : > { %v4683_v4 = vadd.f32 %v3196_v63, %v2210_v57  ;;  %v4492_v26 = vpop.f32.mrb[10].mxu1  ;;  %v3199_v48 = vpop.f32.mrb[11].mxu0 }
 0x1c3   : > { %v4685_v32 = vadd.f32 %v4620_v2, %v4492_v26  ;;  %v2213_v5 = vpop.f32.mrb[11].mxu1 }
 0x1c4   : > { %v4687_v61 = vadd.f32 %v3199_v48, %v2213_v5 }
 0x1c7   : > { %v4623_v29 = vpop.f32.mrb[12].mxu0 }
 0x1c8   : > { %v4495_v62 = vpop.f32.mrb[12].mxu1  ;;  %v3212_v3 = vpop.f32.mrb[13].mxu0 }
 0x1c9   : > { %v4689_v22 = vadd.f32 %v4623_v29, %v4495_v62  ;;  %v2226_v33 = vpop.f32.mrb[13].mxu1  ;;  %v4624_v54 = vpop.f32.mrb[14].mxu0 }
 0x1ca   : > { %v4691_v35 = vadd.f32 %v3212_v3, %v2226_v33  ;;  %v4496_v10 = vpop.f32.mrb[14].mxu1  ;;  %v3215_v47 = vpop.f32.mrb[15].mxu0 }
 0x1cb   : > { %v4693_v46 = vadd.f32 %v4624_v54, %v4496_v10  ;;  %v2229_v49 = vpop.f32.mrb[15].mxu1 }
 0x1cc   : > { %v4695_v14 = vadd.f32 %v3215_v47, %v2229_v49 }
 0x1cf   : > { %v4643_v45 = vpop.f32.mrb[0].mxu0 }
 0x1d0   : > { %v4673_v59 = vadd.f32 %v4643_v45, %v4483_v43  ;;  %v4651_v52 = vpop.f32.mrb[16].mxu1  ;;  %v3440_v51 = vpop.f32.mrb[1].mxu0 }
 0x1d1   : > { %v6112_v39 = vadd.f32 %v4681_v8, %v4651_v52  ;;  %v4674_v31 = vadd.f32 %v3440_v51, %v2178_v25  ;;  %v3472_v9 = vpop.f32.mrb[17].mxu1  ;;  %v4644_v58 = vpop.f32.mrb[2].mxu0 }
 0x1d2   : > { %v4684_v20 = vadd.f32 %v4683_v4, %v3472_v9  ;;  %v4675_v24 = vadd.f32 %v4644_v58, %v4484_v21  ;;  %v4652_v42 = vpop.f32.mrb[18].mxu1  ;;  %v3443_v30 = vpop.f32.mrb[3].mxu0  ;;  %v3622_v0 = vmul.f32 %v4673_v59, %v4673_v59 }
 0x1d3   : > { %v6114_v18 = vadd.f32 %v4685_v32, %v4652_v42  ;;  %v4676_v36 = vadd.f32 %v3443_v30, %v2181_v53  ;;  %v3475_v7 = vpop.f32.mrb[19].mxu1  ;;  %v3620_v19 = vmul.f32 %v4674_v31, %v4674_v31  ;;  %v3630_v51 = vmul.f32 %v6112_v39, %v6112_v39 }
 0x1d4   : > { %v4179_v27 = vpack.c.bf16 %v4675_v24, %v4673_v59  ;;  %v4688_v41 = vadd.f32 %v4687_v61, %v3475_v7  ;;  %v3623_v53 = vmul.f32 %v4675_v24, %v4675_v24  ;;  %v3628_v49 = vmul.f32 %v4684_v20, %v4684_v20 }
 0x1d5   : > { %v4199_v12 = vpack.c.bf16 %v6114_v18, %v6112_v39  ;;  %v4174_v44 = vpack.c.bf16 %v4676_v36, %v4674_v31  ;;  %v3599_v28 = vadd.f32 %v4676_v36, %v4674_v31  ;;  %v3621_v55 = vmul.f32 %v4676_v36, %v4676_v36 }
 0x1d6   : > { %4218 = vst [vmem:[%s5067_s12 + $0x8] sm:$0xff] %v4179_v27   ;;  %v4194_v6 = vpack.c.bf16 %v4688_v41, %v4684_v20  ;;  %v3631_v58 = vmul.f32 %v6114_v18, %v6114_v18 }
 0x1d7   : > { %4222 = vst [vmem:[%s5067_s12 + $0x28] sm:$0xff] %v4199_v12   ;;  %4175 = vst [vmem:[%s5067_s12] sm:$0xff] %v4174_v44   ;;  %v3600_v38 = vadd.f32 %v4673_v59, %v3599_v28  ;;  %v4647_v17 = vpop.f32.mrb[4].mxu0  ;;  %v3636_v56 = vadd.f32 %v3621_v55, %v3620_v19 }
 0x1d8   : > { %4221 = vst [vmem:[%s5067_s12 + $0x20] sm:$0xff] %v4194_v6   ;;  %v4677_v13 = vadd.f32 %v4647_v17, %v4487_v40  ;;  %v4655_v15 = vpop.f32.mrb[20].mxu1  ;;  %v3456_v16 = vpop.f32.mrb[5].mxu0 }
 0x1d9   : > { %v4690_v11 = vadd.f32 %v4689_v22, %v4655_v15  ;;  %v4678_v1 = vadd.f32 %v3456_v16, %v2194_v34  ;;  %v3601_v43 = vadd.f32 %v4675_v24, %v3600_v38  ;;  %v3488_v25 = vpop.f32.mrb[21].mxu1  ;;  %v4648_v21 = vpop.f32.mrb[6].mxu0  ;;  %v3637_v60 = vadd.f32 %v3636_v56, %v3622_v0 }
 0x1da   : > { %v4692_v23 = vadd.f32 %v4691_v35, %v3488_v25  ;;  %v4679_v63 = vadd.f32 %v4648_v21, %v6108_v37  ;;  %v4656_v8 = vpop.f32.mrb[22].mxu1  ;;  %v3459_v57 = vpop.f32.mrb[7].mxu0  ;;  %v3626_v33 = vmul.f32 %v4677_v13, %v4677_v13 }
 0x1db   : > { %v3602_v2 = vadd.f32 %v4678_v1, %v3601_v43  ;;  %v3624_v4 = vmul.f32 %v4678_v1, %v4678_v1  ;;  %v4694_v40 = vadd.f32 %v4693_v46, %v4656_v8  ;;  %v3491_v26 = vpop.f32.mrb[23].mxu1  ;;  %v3638_v48 = vadd.f32 %v3637_v60, %v3623_v53 }
 0x1dc   : > { %v4189_v34 = vpack.c.bf16 %v4679_v63, %v4677_v13  ;;  %v4680_v5 = vadd.f32 %v3459_v57, %v6110_v50  ;;  %v4696_v61 = vadd.f32 %v4695_v14, %v3491_v26  ;;  %v3627_v10 = vmul.f32 %v4679_v63, %v4679_v63 }
 0x1dd   : > { %v4209_v32 = vpack.c.bf16 %v4694_v40, %v4690_v11  ;;  %v3639_v29 = vadd.f32 %v3638_v48, %v3624_v4  ;;  %v3629_v50 = vmul.f32 %v4688_v41, %v4688_v41  ;;  %v3632_v30 = vmul.f32 %v4692_v23, %v4692_v23 }
 0x1de   : > { %4220 = vst [vmem:[%s5067_s12 + $0x18] sm:$0xff] %v4189_v34   ;;  %v4184_v62 = vpack.c.bf16 %v4680_v5, %v4678_v1  ;;  %v3603_v3 = vadd.f32 %v4680_v5, %v3602_v2  ;;  %v3625_v37 = vmul.f32 %v4680_v5, %v4680_v5  ;;  %v4204_v22 = vpack.c.bf16 %v4696_v61, %v4692_v23 }
 0x1df   : > { %4224 = vst [vmem:[%s5067_s12 + $0x38] sm:$0xff] %v4209_v32   ;;  %v3633_v27 = vmul.f32 %v4696_v61, %v4696_v61  ;;  %v3634_v44 = vmul.f32 %v4690_v11, %v4690_v11  ;;  %v3635_v19 = vmul.f32 %v4694_v40, %v4694_v40 }
 0x1e0   : > { %4219 = vst [vmem:[%s5067_s12 + $0x10] sm:$0xff] %v4184_v62   ;;  %v3604_v54 = vadd.f32 %v4677_v13, %v3603_v3  ;;  %v3640_v35 = vadd.f32 %v3639_v29, %v3625_v37  ;;  %4223 = vst [vmem:[%s5067_s12 + $0x30] sm:$0xff] %v4204_v22  }
 0x1e2   : > { %v3605_v47 = vadd.f32 %v4679_v63, %v3604_v54  ;;  %v3641_v46 = vadd.f32 %v3640_v35, %v3626_v33 }
 0x1e4   : > { %v3606_v45 = vadd.f32 %v4684_v20, %v3605_v47  ;;  %v3642_v59 = vadd.f32 %v3641_v46, %v3627_v10 }
 0x1e6   : > { %v3643_v14 = vadd.f32 %v3642_v59, %v3628_v49  ;;  %v3607_v52 = vadd.f32 %v4688_v41, %v3606_v45 }
 0x1e8   : > { %v3608_v31 = vadd.f32 %v6112_v39, %v3607_v52  ;;  %v3644_v9 = vadd.f32 %v3643_v14, %v3629_v50 }
 0x1ea   : > { %v3609_v24 = vadd.f32 %v6114_v18, %v3608_v31  ;;  %v3645_v42 = vadd.f32 %v3644_v9, %v3630_v51 }
 0x1ec   : > { %v3610_v36 = vadd.f32 %v4692_v23, %v3609_v24  ;;  %v3646_v7 = vadd.f32 %v3645_v42, %v3631_v58 }
 0x1ee   : > { %v3611_v20 = vadd.f32 %v4696_v61, %v3610_v36  ;;  %v3647_v12 = vadd.f32 %v3646_v7, %v3632_v30 }
 0x1f0   : > { %v3612_v41 = vadd.f32 %v4690_v11, %v3611_v20  ;;  %v3648_v28 = vadd.f32 %v3647_v12, %v3633_v27 }
 0x1f2   : > { %v3613_v55 = vadd.f32 %v4694_v40, %v3612_v41  ;;  %v3649_v6 = vadd.f32 %v3648_v28, %v3634_v44 }
 0x1f4   : > { %v3614_v39 = vrot.slane %v3613_v55, 4  ;;  %v3650_v38 = vadd.f32 %v3649_v6, %v3635_v19 }
 0x1f6   : > { %v3615_v17 = vadd.f32 %v3614_v39, %v3613_v55  ;;  %v3651_v0 = vrot.slane %v3650_v38, 4 }
 0x1f8   : > { %v3616_v56 = vrot.slane %v3615_v17, 2  ;;  %v3652_v18 = vadd.f32 %v3651_v0, %v3650_v38 }
 0x1fa   : > { %v3617_v13 = vadd.f32 %v3616_v56, %v3615_v17  ;;  %v3653_v15 = vrot.slane %v3652_v18, 2 }
 0x1fc   : > { %v3618_v16 = vrot.slane %v3617_v13, 1  ;;  %v3654_v1 = vadd.f32 %v3653_v15, %v3652_v18 }
 0x1fe   : > { %v3655_v43 = vrot.slane %v3654_v1, 1  ;;  %v3619_v25 = vadd.f32 %v3618_v16, %v3617_v13 }
 0x200   : > { %v3656_v21 = vadd.f32 %v3655_v43, %v3654_v1 }
 0x202   : > { %v3658_v11 = vsel %vm3657_vm0, %v3619_v25, %v3656_v21 }
 0x203   : > { %3659 = vst [vmem:[%s5095_s21] sm:$0x3] %v3658_v11 }
 0x204 PF: > { %s18_s28 = sadd.s32 1, %s4961_s28   ;;  %s6207_s24 = smov %s4953_s26 }
 0x205   : > { %p15_p13 = scmp.ge.s32.totalorder %s18_s28, 6   ;;  %s6208_s25 = smov %s4957_s27 }
 0x206   : > { %s6209_s26 = smov %s6212_s29  ;;  %s6210_s27 = smov %s6216_s30 }
 0x207   :  { %17 = sbr.rel (!%p15_p13) target bundleno = 3 (0x3), region = 108 }

</bundles_post_ra>
